<compile_context>
chip_gen: v5e
topology: v5e:2x2
jax: 0.10.0
libtpu: 0.0.40
codegen_flags: <defaults>
</compile_context>

<pallas_src>
import jax
import jax.numpy as jnp
import numpy as np
from jax import lax
from jax.experimental import pallas as pl
from jax.experimental.pallas import tpu as pltpu


def _round_up(x, m):
    return ((x + m - 1) // m) * m


def _device_info():
    """(vmem_capacity_bytes, has_two_tensorcores_per_device)."""
    vmem_cap = 64 * 1024 * 1024                      # conservative default (v7x)
    try:
        vmem_cap = int(pltpu.get_tpu_info().vmem_capacity_bytes)
    except Exception:
        pass
    kind = ""
    try:
        kind = jax.devices()[0].device_kind.lower()
    except Exception:
        pass
    # Chips that expose 2 TensorCores behind one device: v4/v5p megacore, v7x.
    multi_core = any(tag in kind for tag in ("v4", "v5p", "7"))
    return vmem_cap, multi_core


def _vmem_estimate_bytes(L, bb, H, D, fused, weights):
    """Generous per-grid-step VMEM estimate (padded to lane width)."""
    lane = 128
    rows = L * bb
    pH = _round_up(max(H, lane), lane)
    pD = _round_up(max(D, lane), lane)
    if fused:
        scratch = rows * (_round_up(3 * H, lane) * 4 + pH * 2)
    else:
        scratch = rows * (3 * pH * 4 + pH * 2)
    emb = 2 * rows * pD * 2                          # double-buffered bf16 emb tile
    io = 2 * bb * pD * 4 + 2 * bb * lane * 4         # out + seqlen tiles
    temps = 5 * rows * pH * 4                        # gv/keys/hid/q_tiled/weighted
    wbytes = 2 * sum(int(np.prod(w.shape)) * w.dtype.itemsize for w in weights)
    return scratch + emb + io + temps + wbytes


def make_narm_kernel(num_layers: int, L: int, bb: int, H: int,
                     fused: bool, unroll):
    f32 = jnp.float32
    bf16 = jnp.bfloat16
    n_gru = (2 if fused else 6) * num_layers
    n_w = n_gru + 7

    def kernel(seqlen_ref, emb_ref, *refs):
        w_refs = refs[:n_w]
        out_ref = refs[n_w]
        scratch = refs[n_w + 1:]

        gru_w = w_refs[:n_gru]
        (a1_ref, a2_ref, waq_ref, wak_ref,
         v_ref, wfcg_ref, wfcl_ref) = w_refs[n_gru:]

        if fused:
            gx_scr, seq_scr = scratch              # (L*bb, 3H) f32, (L*bb, H) bf16
        else:
            gxr_scr, gxz_scr, gxn_scr, seq_scr = scratch

        sl = seqlen_ref[...]                       # (bb, 1) int32

        # ---------------- GRU stack (torch.nn.GRU, bias=False, gates r|z|n) ------
        h_last = jnp.zeros((bb, H), f32)
        for layer in range(num_layers):
            x_in = emb_ref[...] if layer == 0 else seq_scr[...]       # bf16 slab
            is_last = layer == num_layers - 1

            if fused:
                wi_ref, wh_ref = gru_w[2 * layer:2 * layer + 2]
                # Hoisted input projection: ONE matmul, M = L*bb, N = 3H.
                gx_scr[...] = jnp.dot(x_in, wi_ref[...],
                                      preferred_element_type=f32)

                def step(t, carry, _wh=wh_ref, _last=is_last):
                    h, hl = carry
                    row = pl.multiple_of(t * bb, bb)
                    # ONE fused recurrent matmul per timestep (serial path).
                    gh = jnp.dot(h.astype(bf16), _wh[...],
                                 preferred_element_type=f32)           # (bb, 3H)
                    gx = gx_scr[pl.ds(row, bb), :]                     # (bb, 3H)
                    r = jax.nn.sigmoid(gx[:, :H] + gh[:, :H])
                    z = jax.nn.sigmoid(gx[:, H:2 * H] + gh[:, H:2 * H])
                    n = jnp.tanh(gx[:, 2 * H:] + r * gh[:, 2 * H:])
                    h_new = (1.0 - z) * n + z * h
                    seq_scr[pl.ds(row, bb), :] = h_new.astype(bf16)
                    if _last:
                        # SeqPoolingLayer('last'): keep h at t == seqlen - 1.
                        hl = jnp.where(sl - 1 == t, h_new, hl)
                    return h_new, hl
            else:
                (wir_ref, wiz_ref, win_ref,
                 whr_ref, whz_ref, whn_ref) = gru_w[6 * layer:6 * layer + 6]
                gxr_scr[...] = jnp.dot(x_in, wir_ref[...], preferred_element_type=f32)
                gxz_scr[...] = jnp.dot(x_in, wiz_ref[...], preferred_element_type=f32)
                gxn_scr[...] = jnp.dot(x_in, win_ref[...], preferred_element_type=f32)

                def step(t, carry, _whr=whr_ref, _whz=whz_ref, _whn=whn_ref,
                         _last=is_last):
                    h, hl = carry
                    row = pl.multiple_of(t * bb, bb)
                    hb = h.astype(bf16)
                    ghr = jnp.dot(hb, _whr[...], preferred_element_type=f32)
                    ghz = jnp.dot(hb, _whz[...], preferred_element_type=f32)
                    ghn = jnp.dot(hb, _whn[...], preferred_element_type=f32)
                    r = jax.nn.sigmoid(gxr_scr[pl.ds(row, bb), :] + ghr)
                    z = jax.nn.sigmoid(gxz_scr[pl.ds(row, bb), :] + ghz)
                    n = jnp.tanh(gxn_scr[pl.ds(row, bb), :] + r * ghn)
                    h_new = (1.0 - z) * n + z * h
                    seq_scr[pl.ds(row, bb), :] = h_new.astype(bf16)
                    if _last:
                        hl = jnp.where(sl - 1 == t, h_new, hl)
                    return h_new, hl

            h0 = jnp.zeros((bb, H), f32)
            _, h_last = lax.fori_loop(0, L, step, (h0, h_last), unroll=unroll)

        # ---------------- gru_vec = A_1(gru_out): one batched matmul -------------
        gv = jnp.dot(seq_scr[...], a1_ref[...], preferred_element_type=f32)

        # ---------------- c_global = A_2(A_1(h_last)) (A_1 is linear) ------------
        a1h = jnp.dot(h_last.astype(bf16), a1_ref[...], preferred_element_type=f32)
        c_global = jnp.dot(a1h.astype(bf16), a2_ref[...], preferred_element_type=f32)

        # ---------------- feedforward attention: slab-wide score -----------------
        # alpha_j = v . sigmoid(Wq q + Wk k_j); padded keys (t >= seqlen) weight 0.
        q_part = jnp.dot(c_global.astype(bf16), waq_ref[...],
                         preferred_element_type=f32)                    # (bb, H)
        keys = jnp.dot(gv.astype(bf16), wak_ref[...],
                       preferred_element_type=f32)                      # (L*bb, H)
        q_tiled = jnp.concatenate([q_part] * L, axis=0)                 # (L*bb, H)
        hid = jax.nn.sigmoid(keys + q_tiled)                            # one EUP pass
        alpha = jnp.sum(hid * v_ref[...], axis=-1, keepdims=True)       # (L*bb, 1)
        weighted = alpha * gv                                           # (L*bb, H)
        # Park the weighted values in the (now dead) gate scratch, then accumulate.
        if fused:
            gx_scr[:, pl.ds(0, H)] = weighted
        else:
            gxn_scr[...] = weighted

        def acc_body(t, acc):
            row = pl.multiple_of(t * bb, bb)
            if fused:
                w_t = gx_scr[pl.ds(row, bb), pl.ds(0, H)]
            else:
                w_t = gxn_scr[pl.ds(row, bb), :]
            # key_padding_mask: valid iff t < seqlen (RecStudio trailing 0-padding).
            return acc + jnp.where(sl > t, w_t, 0.0)

        c_local = lax.fori_loop(0, L, acc_body, jnp.zeros((bb, H), f32),
                                unroll=unroll)

        # ---------------- fc(concat([c_global, c_local])) == split matmul --------
        out_ref[...] = (
            jnp.dot(c_global.astype(bf16), wfcg_ref[...], preferred_element_type=f32)
            + jnp.dot(c_local.astype(bf16), wfcl_ref[...], preferred_element_type=f32))

    return kernel


def narm_forward_pallas(params, item_ids, seqlen, *, batch_block=None):
    B, L = item_ids.shape
    emb_table = params["emb_table"]
    D = emb_table.shape[1]
    H = params["a1"].shape[0]
    NL = len(params["gru"])
    fused = (H % 128 == 0)
    bf16 = jnp.bfloat16

    vmem_cap, multi_core = _device_info()
    if batch_block is None:
        # 128-MiB VMEM parts (v5e/v6e): larger batch tile; 64-MiB (v7x): keep 128.
        batch_block = 256 if vmem_cap >= (100 << 20) else 128

    # ---- weights: pre-transposed to (in, out), bf16 MXU operands ----------------
    weights = []
    for (wih, whh) in params["gru"]:
        if fused:
            # torch GRU layout is rows [W_r | W_z | W_n]; transpose keeps the
            # gate blocks as lane-aligned column ranges of a single (in, 3H) mat.
            weights += [jnp.asarray(wih.T, bf16), jnp.asarray(whh.T, bf16)]
        else:
            for g in range(3):                                           # r, z, n
                weights.append(jnp.asarray(wih[g * H:(g + 1) * H, :].T, bf16))
            for g in range(3):
                weights.append(jnp.asarray(whh[g * H:(g + 1) * H, :].T, bf16))
    weights += [
        jnp.asarray(params["a1"].T, bf16),                               # (H, H)
        jnp.asarray(params["a2"].T, bf16),                               # (H, H)
        jnp.asarray(params["w_attn"][:, :H].T, bf16),                    # query part
        jnp.asarray(params["w_attn"][:, H:].T, bf16),                    # key part
        jnp.asarray(params["v_attn"], jnp.float32),                      # VPU: f32
        jnp.asarray(params["w_fc"][:, :H].T, bf16),                      # c_global
        jnp.asarray(params["w_fc"][:, H:].T, bf16),                      # c_local
    ]

    # ---- batch tile: VMEM-fit sweep + >= 2 grid steps on 2-TC chips -------------
    bb = _round_up(min(batch_block, _round_up(B, 8)), 8)
    budget = int(0.72 * vmem_cap)
    while bb > 8 and _vmem_estimate_bytes(L, bb, H, D, fused, weights) > budget:
        bb = _round_up(max(8, bb // 2), 8)
    if multi_core:
        while bb > 8 and _round_up(B, bb) // bb < 2:
            bb = _round_up(max(8, bb // 2), 8)
    B_pad = _round_up(B, bb)
    nb = B_pad // bb

    # ---- item_encoder: bf16 embedding gather, emitted timestep-major ------------
    # Dropouts are eval-mode identities.  The ids are transposed BEFORE the table
    # lookup so the gather emits the (nb, L*bb, D) slab directly (no f32
    # materialize + transpose pass over HBM).
    # TODO(synk): the gather could move in-kernel via PrefetchScalarGridSpec +
    # pl.Element row gather to avoid materializing (B, L, D) in HBM at all.
    ids = item_ids.astype(jnp.int32)
    sl = seqlen.astype(jnp.int32)
    pad = B_pad - B
    if pad:
        ids = jnp.pad(ids, ((0, pad), (0, 0)))
        sl = jnp.pad(sl, (0, pad))
    ids_blk = ids.reshape(nb, bb, L).transpose(0, 2, 1).reshape(nb, L * bb)
    emb_blk = emb_table.astype(bf16)[ids_blk]                # (nb, L*bb, D) bf16
    sl_in = sl.reshape(B_pad, 1)

    def _const_spec(shape):
        nd = len(shape)
        return pl.BlockSpec(shape, lambda i, _nd=nd: (0,) * _nd)         # resident

    # TODO(synk): pipeline_mode=pl.Buffered(1) on these constant-index weight
    # specs would drop their needless double-buffer copy; left at the default
    # pending confirmation of that BlockSpec option on the deployed jax version.
    in_specs = (
        [pl.BlockSpec((bb, 1), lambda i: (i, 0)),                        # seqlen
         pl.BlockSpec((None, L * bb, D), lambda i: (i, 0, 0))]           # emb tile
        + [_const_spec(tuple(w.shape)) for w in weights]
    )
    out_specs = pl.BlockSpec((bb, D), lambda i: (i, 0))

    if fused:
        scratch_shapes = [pltpu.VMEM((L * bb, 3 * H), jnp.float32),
                          pltpu.VMEM((L * bb, H), jnp.bfloat16)]
    else:
        scratch_shapes = ([pltpu.VMEM((L * bb, H), jnp.float32) for _ in range(3)]
                          + [pltpu.VMEM((L * bb, H), jnp.bfloat16)])

    est = _vmem_estimate_bytes(L, bb, H, D, fused, weights)
    vmem_limit = int(min(int(0.85 * vmem_cap), max(2 * est, 32 * 1024 * 1024)))
    vmem_limit = max(vmem_limit, min(int(1.25 * est), int(0.85 * vmem_cap)))

    unroll = True if L <= 16 else 4
    kernel = make_narm_kernel(NL, L, bb, H, fused, unroll)
    out = pl.pallas_call(
        kernel,
        grid=(nb,),
        out_shape=jax.ShapeDtypeStruct((B_pad, D), jnp.float32),
        in_specs=in_specs,
        out_specs=out_specs,
        scratch_shapes=scratch_shapes,
        compiler_params=pltpu.CompilerParams(
            dimension_semantics=("parallel",),
            vmem_limit_bytes=vmem_limit),
    )(sl_in, emb_blk, *weights)
    return out[:B]


def narm_forward_ref(params, item_ids, seqlen):
    """Pure-JAX f32 reference with identical semantics (for verification)."""
    B, L = item_ids.shape
    H = params["a1"].shape[0]
    x = params["emb_table"][item_ids].astype(jnp.float32)            # (B, L, D)
    for (wih, whh) in params["gru"]:
        h = jnp.zeros((B, H), jnp.float32)
        outs = []
        for t in range(L):
            gx = x[:, t, :] @ wih.T
            gh = h @ whh.T
            r = jax.nn.sigmoid(gx[:, :H] + gh[:, :H])
            z = jax.nn.sigmoid(gx[:, H:2 * H] + gh[:, H:2 * H])
            n = jnp.tanh(gx[:, 2 * H:] + r * gh[:, 2 * H:])
            h = (1.0 - z) * n + z * h
            outs.append(h)
        x = jnp.stack(outs, axis=1)
    gru_vec = x @ params["a1"].T                                     # (B, L, H)
    h_last = gru_vec[jnp.arange(B), seqlen - 1]                      # (B, H)
    c_global = h_last @ params["a2"].T
    q = c_global @ params["w_attn"][:, :H].T
    k = gru_vec @ params["w_attn"][:, H:].T
    alpha = jax.nn.sigmoid(q[:, None, :] + k) @ params["v_attn"].T   # (B, L, 1)
    valid = (item_ids != 0).astype(jnp.float32)[..., None]
    c_local = jnp.sum(alpha * valid * gru_vec, axis=1)
    c = jnp.concatenate([c_global, c_local], axis=1)
    return c @ params["w_fc"].T


def init_params(key, num_items, D, H, num_layers):
    ks = jax.random.split(key, 8 + 2 * num_layers)
    bound = 1.0 / np.sqrt(H)
    emb = jax.random.normal(ks[0], (num_items, D), jnp.float32) * 0.1
    emb = emb.at[0].set(0.0)                                         # padding_idx=0
    gru = []
    for l in range(num_layers):
        in_dim = D if l == 0 else H
        wih = jax.random.uniform(ks[1 + 2 * l], (3 * H, in_dim), jnp.float32, -bound, bound)
        whh = jax.random.uniform(ks[2 + 2 * l], (3 * H, H), jnp.float32, -bound, bound)
        gru.append((wih, whh))
    k0 = 1 + 2 * num_layers
    a1 = jax.random.uniform(ks[k0 + 0], (H, H), jnp.float32, -bound, bound)
    a2 = jax.random.uniform(ks[k0 + 1], (H, H), jnp.float32, -bound, bound)
    w_attn = jax.random.uniform(ks[k0 + 2], (H, 2 * H), jnp.float32, -bound, bound)
    v_attn = jax.random.uniform(ks[k0 + 3], (1, H), jnp.float32, -bound, bound)
    w_fc = jax.random.uniform(ks[k0 + 4], (D, 2 * H), jnp.float32, -bound, bound)
    return dict(emb_table=emb, gru=gru, a1=a1, a2=a2,
                w_attn=w_attn, v_attn=v_attn, w_fc=w_fc)


if __name__ == "__main__":
    def run_case(B, L, D, H, num_items, num_layers, key):
        kp, ki, ks = jax.random.split(key, 3)
        params = init_params(kp, num_items, D, H, num_layers)
        item_ids = jax.random.randint(ki, (B, L), 1, num_items, dtype=jnp.int32)
        seqlen = jax.random.randint(ks, (B,), 1, L + 1, dtype=jnp.int32)
        pos = jnp.arange(L)[None, :]
        item_ids = jnp.where(pos < seqlen[:, None], item_ids, 0)    # trailing 0-pad
        out = jax.block_until_ready(narm_forward_pallas(params, item_ids, seqlen))
        ref = narm_forward_ref(params, item_ids, seqlen)
        assert out.shape == (B, D)
        np.testing.assert_allclose(np.asarray(out), np.asarray(ref),
                                   atol=2e-2, rtol=2e-2)

    key = jax.random.PRNGKey(0)
    k1, k2 = jax.random.split(key)
    # Split-gate path (H not a multiple of 128), 1 GRU layer.
    run_case(B=2, L=8, D=32, H=32, num_items=20, num_layers=1, key=k1)
    # Fused-gate path (H % 128 == 0), 2 GRU layers.
    run_case(B=16, L=8, D=64, H=128, num_items=64, num_layers=2, key=k2)
    print("KERNEL_OK")
</pallas_src>

<mosaic_0001>
module attributes {stable_mosaic.version = 11 : i64} {
  func.func @kernel(%arg0: i32, %arg1: memref<8x1xi32, #tpu.memory_space<vmem>>, %arg2: memref<1x64x32xbf16, #tpu.memory_space<vmem>>, %arg3: memref<32x32xbf16, #tpu.memory_space<vmem>>, %arg4: memref<32x32xbf16, #tpu.memory_space<vmem>>, %arg5: memref<32x32xbf16, #tpu.memory_space<vmem>>, %arg6: memref<32x32xbf16, #tpu.memory_space<vmem>>, %arg7: memref<32x32xbf16, #tpu.memory_space<vmem>>, %arg8: memref<32x32xbf16, #tpu.memory_space<vmem>>, %arg9: memref<32x32xbf16, #tpu.memory_space<vmem>>, %arg10: memref<32x32xbf16, #tpu.memory_space<vmem>>, %arg11: memref<32x32xbf16, #tpu.memory_space<vmem>>, %arg12: memref<32x32xbf16, #tpu.memory_space<vmem>>, %arg13: memref<1x32xf32, #tpu.memory_space<vmem>>, %arg14: memref<32x32xbf16, #tpu.memory_space<vmem>>, %arg15: memref<32x32xbf16, #tpu.memory_space<vmem>>, %arg16: memref<8x32xf32, #tpu.memory_space<vmem>>, %arg17: memref<64x32xf32, #tpu.memory_space<vmem>>, %arg18: memref<64x32xf32, #tpu.memory_space<vmem>>, %arg19: memref<64x32xf32, #tpu.memory_space<vmem>>, %arg20: memref<64x32xbf16, #tpu.memory_space<vmem>>) attributes {dimension_semantics = [#tpu.dimension_semantics<parallel>], iteration_bounds = array<i64: 1>, scalar_prefetch = 0 : i64, scratch_operands = 4 : i64, tpu.core_type = #tpu.core_type<tc>, window_params = [{transform_indices = @transform_0, window_bounds = array<i64: 8, 1>}, {transform_indices = @transform_1, window_bounds = array<i64: 1, 64, 32>}, {pipeline_mode = #tpu.pipeline_mode<synchronous>, transform_indices = @transform_2, window_bounds = array<i64: 32, 32>}, {pipeline_mode = #tpu.pipeline_mode<synchronous>, transform_indices = @transform_3, window_bounds = array<i64: 32, 32>}, {pipeline_mode = #tpu.pipeline_mode<synchronous>, transform_indices = @transform_4, window_bounds = array<i64: 32, 32>}, {pipeline_mode = #tpu.pipeline_mode<synchronous>, transform_indices = @transform_5, window_bounds = array<i64: 32, 32>}, {pipeline_mode = #tpu.pipeline_mode<synchronous>, transform_indices = @transform_6, window_bounds = array<i64: 32, 32>}, {pipeline_mode = #tpu.pipeline_mode<synchronous>, transform_indices = @transform_7, window_bounds = array<i64: 32, 32>}, {pipeline_mode = #tpu.pipeline_mode<synchronous>, transform_indices = @transform_8, window_bounds = array<i64: 32, 32>}, {pipeline_mode = #tpu.pipeline_mode<synchronous>, transform_indices = @transform_9, window_bounds = array<i64: 32, 32>}, {pipeline_mode = #tpu.pipeline_mode<synchronous>, transform_indices = @transform_10, window_bounds = array<i64: 32, 32>}, {pipeline_mode = #tpu.pipeline_mode<synchronous>, transform_indices = @transform_11, window_bounds = array<i64: 32, 32>}, {pipeline_mode = #tpu.pipeline_mode<synchronous>, transform_indices = @transform_12, window_bounds = array<i64: 1, 32>}, {pipeline_mode = #tpu.pipeline_mode<synchronous>, transform_indices = @transform_13, window_bounds = array<i64: 32, 32>}, {pipeline_mode = #tpu.pipeline_mode<synchronous>, transform_indices = @transform_14, window_bounds = array<i64: 32, 32>}, {transform_indices = @transform_15, window_bounds = array<i64: 8, 32>}]} {
    %c0 = arith.constant 0 : index
    %c0_0 = arith.constant 0 : index
    %0 = vector.load %arg1[%c0, %c0_0] : memref<8x1xi32, #tpu.memory_space<vmem>>, vector<8x1xi32>
    %cst = arith.constant 0.000000e+00 : f32
    %1 = vector.broadcast %cst : f32 to vector<8x32xf32>
    %c0_1 = arith.constant 0 : index
    %c0_2 = arith.constant 0 : index
    %c0_3 = arith.constant 0 : index
    %2 = vector.load %arg2[%c0_1, %c0_2, %c0_3] : memref<1x64x32xbf16, #tpu.memory_space<vmem>>, vector<1x64x32xbf16>
    %3 = vector.shape_cast %2 : vector<1x64x32xbf16> to vector<64x32xbf16>
    %c0_4 = arith.constant 0 : index
    %c0_5 = arith.constant 0 : index
    %4 = vector.load %arg3[%c0_4, %c0_5] : memref<32x32xbf16, #tpu.memory_space<vmem>>, vector<32x32xbf16>
    %cst_6 = arith.constant dense<0.000000e+00> : vector<64x32xf32>
    %5 = tpu.matmul %3, %4, %cst_6 {dimension_numbers = #tpu.dot_dimension_numbers<[1], [0], [0], [1], [0, 0, 1, 1], [], []>} : vector<64x32xbf16>, vector<32x32xbf16>, vector<64x32xf32> -> vector<64x32xf32>
    %c0_7 = arith.constant 0 : index
    %c0_8 = arith.constant 0 : index
    %6 = vector.load %arg17[%c0_7, %c0_8] : memref<64x32xf32, #tpu.memory_space<vmem>>, vector<64x32xf32>
    tpu.vector_store %arg17[%c0_7, %c0_8], %5 {strides = array<i32>} : memref<64x32xf32, #tpu.memory_space<vmem>>, vector<64x32xf32>,
    %c0_9 = arith.constant 0 : index
    %c0_10 = arith.constant 0 : index
    %7 = vector.load %arg4[%c0_9, %c0_10] : memref<32x32xbf16, #tpu.memory_space<vmem>>, vector<32x32xbf16>
    %cst_11 = arith.constant dense<0.000000e+00> : vector<64x32xf32>
    %8 = tpu.matmul %3, %7, %cst_11 {dimension_numbers = #tpu.dot_dimension_numbers<[1], [0], [0], [1], [0, 0, 1, 1], [], []>} : vector<64x32xbf16>, vector<32x32xbf16>, vector<64x32xf32> -> vector<64x32xf32>
    %c0_12 = arith.constant 0 : index
    %c0_13 = arith.constant 0 : index
    %9 = vector.load %arg18[%c0_12, %c0_13] : memref<64x32xf32, #tpu.memory_space<vmem>>, vector<64x32xf32>
    tpu.vector_store %arg18[%c0_12, %c0_13], %8 {strides = array<i32>} : memref<64x32xf32, #tpu.memory_space<vmem>>, vector<64x32xf32>,
    %c0_14 = arith.constant 0 : index
    %c0_15 = arith.constant 0 : index
    %10 = vector.load %arg5[%c0_14, %c0_15] : memref<32x32xbf16, #tpu.memory_space<vmem>>, vector<32x32xbf16>
    %cst_16 = arith.constant dense<0.000000e+00> : vector<64x32xf32>
    %11 = tpu.matmul %3, %10, %cst_16 {dimension_numbers = #tpu.dot_dimension_numbers<[1], [0], [0], [1], [0, 0, 1, 1], [], []>} : vector<64x32xbf16>, vector<32x32xbf16>, vector<64x32xf32> -> vector<64x32xf32>
    %c0_17 = arith.constant 0 : index
    %c0_18 = arith.constant 0 : index
    %12 = vector.load %arg19[%c0_17, %c0_18] : memref<64x32xf32, #tpu.memory_space<vmem>>, vector<64x32xf32>
    tpu.vector_store %arg19[%c0_17, %c0_18], %11 {strides = array<i32>} : memref<64x32xf32, #tpu.memory_space<vmem>>, vector<64x32xf32>,
    %cst_19 = arith.constant 0.000000e+00 : f32
    %13 = vector.broadcast %cst_19 : f32 to vector<8x32xf32>
    %c0_i32 = arith.constant 0 : i32
    %c8_i32 = arith.constant 8 : i32
    %14 = arith.muli %c0_i32, %c8_i32 : i32
    %15 = tpu.assume_multiple %14, 8 : i32
    %16 = arith.truncf %13 : vector<8x32xf32> to vector<8x32xbf16>
    %c0_20 = arith.constant 0 : index
    %c0_21 = arith.constant 0 : index
    %17 = vector.load %arg6[%c0_20, %c0_21] : memref<32x32xbf16, #tpu.memory_space<vmem>>, vector<32x32xbf16>
    %cst_22 = arith.constant dense<0.000000e+00> : vector<8x32xf32>
    %18 = tpu.matmul %16, %17, %cst_22 {dimension_numbers = #tpu.dot_dimension_numbers<[1], [0], [0], [1], [0, 0, 1, 1], [], []>} : vector<8x32xbf16>, vector<32x32xbf16>, vector<8x32xf32> -> vector<8x32xf32>
    %c0_23 = arith.constant 0 : index
    %c0_24 = arith.constant 0 : index
    %19 = vector.load %arg7[%c0_23, %c0_24] : memref<32x32xbf16, #tpu.memory_space<vmem>>, vector<32x32xbf16>
    %cst_25 = arith.constant dense<0.000000e+00> : vector<8x32xf32>
    %20 = tpu.matmul %16, %19, %cst_25 {dimension_numbers = #tpu.dot_dimension_numbers<[1], [0], [0], [1], [0, 0, 1, 1], [], []>} : vector<8x32xbf16>, vector<32x32xbf16>, vector<8x32xf32> -> vector<8x32xf32>
    %c0_26 = arith.constant 0 : index
    %c0_27 = arith.constant 0 : index
    %21 = vector.load %arg8[%c0_26, %c0_27] : memref<32x32xbf16, #tpu.memory_space<vmem>>, vector<32x32xbf16>
    %cst_28 = arith.constant dense<0.000000e+00> : vector<8x32xf32>
    %22 = tpu.matmul %16, %21, %cst_28 {dimension_numbers = #tpu.dot_dimension_numbers<[1], [0], [0], [1], [0, 0, 1, 1], [], []>} : vector<8x32xbf16>, vector<32x32xbf16>, vector<8x32xf32> -> vector<8x32xf32>
    %23 = arith.index_cast %15 : i32 to index
    %c0_29 = arith.constant 0 : index
    %24 = vector.load %arg17[%23, %c0_29] : memref<64x32xf32, #tpu.memory_space<vmem>>, vector<8x32xf32>
    %25 = arith.addf %24, %18 : vector<8x32xf32>
    %26 = arith.negf %25 : vector<8x32xf32>
    %27 = math.exp %26 : vector<8x32xf32>
    %cst_30 = arith.constant 1.000000e+00 : f32
    %28 = vector.broadcast %cst_30 : f32 to vector<8x32xf32>
    %29 = arith.addf %28, %27 : vector<8x32xf32>
    %30 = arith.divf %28, %29 : vector<8x32xf32>
    %31 = arith.index_cast %15 : i32 to index
    %c0_31 = arith.constant 0 : index
    %32 = vector.load %arg18[%31, %c0_31] : memref<64x32xf32, #tpu.memory_space<vmem>>, vector<8x32xf32>
    %33 = arith.addf %32, %20 : vector<8x32xf32>
    %34 = arith.negf %33 : vector<8x32xf32>
    %35 = math.exp %34 : vector<8x32xf32>
    %cst_32 = arith.constant 1.000000e+00 : f32
    %36 = vector.broadcast %cst_32 : f32 to vector<8x32xf32>
    %37 = arith.addf %36, %35 : vector<8x32xf32>
    %38 = arith.divf %36, %37 : vector<8x32xf32>
    %39 = arith.index_cast %15 : i32 to index
    %c0_33 = arith.constant 0 : index
    %40 = vector.load %arg19[%39, %c0_33] : memref<64x32xf32, #tpu.memory_space<vmem>>, vector<8x32xf32>
    %41 = arith.mulf %30, %22 : vector<8x32xf32>
    %42 = arith.addf %40, %41 : vector<8x32xf32>
    %43 = math.tanh %42 : vector<8x32xf32>
    %cst_34 = arith.constant 1.000000e+00 : f32
    %44 = vector.broadcast %cst_34 : f32 to vector<8x32xf32>
    %45 = arith.subf %44, %38 : vector<8x32xf32>
    %46 = arith.mulf %45, %43 : vector<8x32xf32>
    %47 = arith.mulf %38, %13 : vector<8x32xf32>
    %48 = arith.addf %46, %47 : vector<8x32xf32>
    %49 = arith.truncf %48 : vector<8x32xf32> to vector<8x32xbf16>
    %50 = arith.index_cast %15 : i32 to index
    %c0_35 = arith.constant 0 : index
    %51 = vector.load %arg20[%50, %c0_35] : memref<64x32xbf16, #tpu.memory_space<vmem>>, vector<8x32xbf16>
    tpu.vector_store %arg20[%50, %c0_35], %49 {strides = array<i32>} : memref<64x32xbf16, #tpu.memory_space<vmem>>, vector<8x32xbf16>,
    %c1_i32 = arith.constant 1 : i32
    %52 = vector.broadcast %c1_i32 : i32 to vector<8x1xi32>
    %53 = arith.subi %0, %52 : vector<8x1xi32>
    %54 = vector.broadcast %c0_i32 : i32 to vector<8x1xi32>
    %55 = arith.cmpi eq, %53, %54 : vector<8x1xi32>
    %56 = vector.shape_cast %55 : vector<8x1xi1> to vector<8x1xi1>
    %57 = vector.broadcast %56 : vector<8x1xi1> to vector<8x32xi1>
    %58 = arith.select %57, %48, %1 : vector<8x32xi1>, vector<8x32xf32>
    %c1_i32_36 = arith.constant 1 : i32
    %c8_i32_37 = arith.constant 8 : i32
    %59 = arith.muli %c1_i32_36, %c8_i32_37 : i32
    %60 = tpu.assume_multiple %59, 8 : i32
    %61 = arith.truncf %48 : vector<8x32xf32> to vector<8x32xbf16>
    %c0_38 = arith.constant 0 : index
    %c0_39 = arith.constant 0 : index
    %62 = vector.load %arg6[%c0_38, %c0_39] : memref<32x32xbf16, #tpu.memory_space<vmem>>, vector<32x32xbf16>
    %cst_40 = arith.constant dense<0.000000e+00> : vector<8x32xf32>
    %63 = tpu.matmul %61, %62, %cst_40 {dimension_numbers = #tpu.dot_dimension_numbers<[1], [0], [0], [1], [0, 0, 1, 1], [], []>} : vector<8x32xbf16>, vector<32x32xbf16>, vector<8x32xf32> -> vector<8x32xf32>
    %c0_41 = arith.constant 0 : index
    %c0_42 = arith.constant 0 : index
    %64 = vector.load %arg7[%c0_41, %c0_42] : memref<32x32xbf16, #tpu.memory_space<vmem>>, vector<32x32xbf16>
    %cst_43 = arith.constant dense<0.000000e+00> : vector<8x32xf32>
    %65 = tpu.matmul %61, %64, %cst_43 {dimension_numbers = #tpu.dot_dimension_numbers<[1], [0], [0], [1], [0, 0, 1, 1], [], []>} : vector<8x32xbf16>, vector<32x32xbf16>, vector<8x32xf32> -> vector<8x32xf32>
    %c0_44 = arith.constant 0 : index
    %c0_45 = arith.constant 0 : index
    %66 = vector.load %arg8[%c0_44, %c0_45] : memref<32x32xbf16, #tpu.memory_space<vmem>>, vector<32x32xbf16>
    %cst_46 = arith.constant dense<0.000000e+00> : vector<8x32xf32>
    %67 = tpu.matmul %61, %66, %cst_46 {dimension_numbers = #tpu.dot_dimension_numbers<[1], [0], [0], [1], [0, 0, 1, 1], [], []>} : vector<8x32xbf16>, vector<32x32xbf16>, vector<8x32xf32> -> vector<8x32xf32>
    %68 = arith.index_cast %60 : i32 to index
    %c0_47 = arith.constant 0 : index
    %69 = vector.load %arg17[%68, %c0_47] : memref<64x32xf32, #tpu.memory_space<vmem>>, vector<8x32xf32>
    %70 = arith.addf %69, %63 : vector<8x32xf32>
    %71 = arith.negf %70 : vector<8x32xf32>
    %72 = math.exp %71 : vector<8x32xf32>
    %cst_48 = arith.constant 1.000000e+00 : f32
    %73 = vector.broadcast %cst_48 : f32 to vector<8x32xf32>
    %74 = arith.addf %73, %72 : vector<8x32xf32>
    %75 = arith.divf %73, %74 : vector<8x32xf32>
    %76 = arith.index_cast %60 : i32 to index
    %c0_49 = arith.constant 0 : index
    %77 = vector.load %arg18[%76, %c0_49] : memref<64x32xf32, #tpu.memory_space<vmem>>, vector<8x32xf32>
    %78 = arith.addf %77, %65 : vector<8x32xf32>
    %79 = arith.negf %78 : vector<8x32xf32>
    %80 = math.exp %79 : vector<8x32xf32>
    %cst_50 = arith.constant 1.000000e+00 : f32
    %81 = vector.broadcast %cst_50 : f32 to vector<8x32xf32>
    %82 = arith.addf %81, %80 : vector<8x32xf32>
    %83 = arith.divf %81, %82 : vector<8x32xf32>
    %84 = arith.index_cast %60 : i32 to index
    %c0_51 = arith.constant 0 : index
    %85 = vector.load %arg19[%84, %c0_51] : memref<64x32xf32, #tpu.memory_space<vmem>>, vector<8x32xf32>
    %86 = arith.mulf %75, %67 : vector<8x32xf32>
    %87 = arith.addf %85, %86 : vector<8x32xf32>
    %88 = math.tanh %87 : vector<8x32xf32>
    %cst_52 = arith.constant 1.000000e+00 : f32
    %89 = vector.broadcast %cst_52 : f32 to vector<8x32xf32>
    %90 = arith.subf %89, %83 : vector<8x32xf32>
    %91 = arith.mulf %90, %88 : vector<8x32xf32>
    %92 = arith.mulf %83, %48 : vector<8x32xf32>
    %93 = arith.addf %91, %92 : vector<8x32xf32>
    %94 = arith.truncf %93 : vector<8x32xf32> to vector<8x32xbf16>
    %95 = arith.index_cast %60 : i32 to index
    %c0_53 = arith.constant 0 : index
    %96 = vector.load %arg20[%95, %c0_53] : memref<64x32xbf16, #tpu.memory_space<vmem>>, vector<8x32xbf16>
    tpu.vector_store %arg20[%95, %c0_53], %94 {strides = array<i32>} : memref<64x32xbf16, #tpu.memory_space<vmem>>, vector<8x32xbf16>,
    %c1_i32_54 = arith.constant 1 : i32
    %97 = vector.broadcast %c1_i32_54 : i32 to vector<8x1xi32>
    %98 = arith.subi %0, %97 : vector<8x1xi32>
    %99 = vector.broadcast %c1_i32_36 : i32 to vector<8x1xi32>
    %100 = arith.cmpi eq, %98, %99 : vector<8x1xi32>
    %101 = vector.shape_cast %100 : vector<8x1xi1> to vector<8x1xi1>
    %102 = vector.broadcast %101 : vector<8x1xi1> to vector<8x32xi1>
    %103 = arith.select %102, %93, %58 : vector<8x32xi1>, vector<8x32xf32>
    %c2_i32 = arith.constant 2 : i32
    %c8_i32_55 = arith.constant 8 : i32
    %104 = arith.muli %c2_i32, %c8_i32_55 : i32
    %105 = tpu.assume_multiple %104, 8 : i32
    %106 = arith.truncf %93 : vector<8x32xf32> to vector<8x32xbf16>
    %c0_56 = arith.constant 0 : index
    %c0_57 = arith.constant 0 : index
    %107 = vector.load %arg6[%c0_56, %c0_57] : memref<32x32xbf16, #tpu.memory_space<vmem>>, vector<32x32xbf16>
    %cst_58 = arith.constant dense<0.000000e+00> : vector<8x32xf32>
    %108 = tpu.matmul %106, %107, %cst_58 {dimension_numbers = #tpu.dot_dimension_numbers<[1], [0], [0], [1], [0, 0, 1, 1], [], []>} : vector<8x32xbf16>, vector<32x32xbf16>, vector<8x32xf32> -> vector<8x32xf32>
    %c0_59 = arith.constant 0 : index
    %c0_60 = arith.constant 0 : index
    %109 = vector.load %arg7[%c0_59, %c0_60] : memref<32x32xbf16, #tpu.memory_space<vmem>>, vector<32x32xbf16>
    %cst_61 = arith.constant dense<0.000000e+00> : vector<8x32xf32>
    %110 = tpu.matmul %106, %109, %cst_61 {dimension_numbers = #tpu.dot_dimension_numbers<[1], [0], [0], [1], [0, 0, 1, 1], [], []>} : vector<8x32xbf16>, vector<32x32xbf16>, vector<8x32xf32> -> vector<8x32xf32>
    %c0_62 = arith.constant 0 : index
    %c0_63 = arith.constant 0 : index
    %111 = vector.load %arg8[%c0_62, %c0_63] : memref<32x32xbf16, #tpu.memory_space<vmem>>, vector<32x32xbf16>
    %cst_64 = arith.constant dense<0.000000e+00> : vector<8x32xf32>
    %112 = tpu.matmul %106, %111, %cst_64 {dimension_numbers = #tpu.dot_dimension_numbers<[1], [0], [0], [1], [0, 0, 1, 1], [], []>} : vector<8x32xbf16>, vector<32x32xbf16>, vector<8x32xf32> -> vector<8x32xf32>
    %113 = arith.index_cast %105 : i32 to index
    %c0_65 = arith.constant 0 : index
    %114 = vector.load %arg17[%113, %c0_65] : memref<64x32xf32, #tpu.memory_space<vmem>>, vector<8x32xf32>
    %115 = arith.addf %114, %108 : vector<8x32xf32>
    %116 = arith.negf %115 : vector<8x32xf32>
    %117 = math.exp %116 : vector<8x32xf32>
    %cst_66 = arith.constant 1.000000e+00 : f32
    %118 = vector.broadcast %cst_66 : f32 to vector<8x32xf32>
    %119 = arith.addf %118, %117 : vector<8x32xf32>
    %120 = arith.divf %118, %119 : vector<8x32xf32>
    %121 = arith.index_cast %105 : i32 to index
    %c0_67 = arith.constant 0 : index
    %122 = vector.load %arg18[%121, %c0_67] : memref<64x32xf32, #tpu.memory_space<vmem>>, vector<8x32xf32>
    %123 = arith.addf %122, %110 : vector<8x32xf32>
    %124 = arith.negf %123 : vector<8x32xf32>
    %125 = math.exp %124 : vector<8x32xf32>
    %cst_68 = arith.constant 1.000000e+00 : f32
    %126 = vector.broadcast %cst_68 : f32 to vector<8x32xf32>
    %127 = arith.addf %126, %125 : vector<8x32xf32>
    %128 = arith.divf %126, %127 : vector<8x32xf32>
    %129 = arith.index_cast %105 : i32 to index
    %c0_69 = arith.constant 0 : index
    %130 = vector.load %arg19[%129, %c0_69] : memref<64x32xf32, #tpu.memory_space<vmem>>, vector<8x32xf32>
    %131 = arith.mulf %120, %112 : vector<8x32xf32>
    %132 = arith.addf %130, %131 : vector<8x32xf32>
    %133 = math.tanh %132 : vector<8x32xf32>
    %cst_70 = arith.constant 1.000000e+00 : f32
    %134 = vector.broadcast %cst_70 : f32 to vector<8x32xf32>
    %135 = arith.subf %134, %128 : vector<8x32xf32>
    %136 = arith.mulf %135, %133 : vector<8x32xf32>
    %137 = arith.mulf %128, %93 : vector<8x32xf32>
    %138 = arith.addf %136, %137 : vector<8x32xf32>
    %139 = arith.truncf %138 : vector<8x32xf32> to vector<8x32xbf16>
    %140 = arith.index_cast %105 : i32 to index
    %c0_71 = arith.constant 0 : index
    %141 = vector.load %arg20[%140, %c0_71] : memref<64x32xbf16, #tpu.memory_space<vmem>>, vector<8x32xbf16>
    tpu.vector_store %arg20[%140, %c0_71], %139 {strides = array<i32>} : memref<64x32xbf16, #tpu.memory_space<vmem>>, vector<8x32xbf16>,
    %c1_i32_72 = arith.constant 1 : i32
    %142 = vector.broadcast %c1_i32_72 : i32 to vector<8x1xi32>
    %143 = arith.subi %0, %142 : vector<8x1xi32>
    %144 = vector.broadcast %c2_i32 : i32 to vector<8x1xi32>
    %145 = arith.cmpi eq, %143, %144 : vector<8x1xi32>
    %146 = vector.shape_cast %145 : vector<8x1xi1> to vector<8x1xi1>
    %147 = vector.broadcast %146 : vector<8x1xi1> to vector<8x32xi1>
    %148 = arith.select %147, %138, %103 : vector<8x32xi1>, vector<8x32xf32>
    %c3_i32 = arith.constant 3 : i32
    %c8_i32_73 = arith.constant 8 : i32
    %149 = arith.muli %c3_i32, %c8_i32_73 : i32
    %150 = tpu.assume_multiple %149, 8 : i32
    %151 = arith.truncf %138 : vector<8x32xf32> to vector<8x32xbf16>
    %c0_74 = arith.constant 0 : index
    %c0_75 = arith.constant 0 : index
    %152 = vector.load %arg6[%c0_74, %c0_75] : memref<32x32xbf16, #tpu.memory_space<vmem>>, vector<32x32xbf16>
    %cst_76 = arith.constant dense<0.000000e+00> : vector<8x32xf32>
    %153 = tpu.matmul %151, %152, %cst_76 {dimension_numbers = #tpu.dot_dimension_numbers<[1], [0], [0], [1], [0, 0, 1, 1], [], []>} : vector<8x32xbf16>, vector<32x32xbf16>, vector<8x32xf32> -> vector<8x32xf32>
    %c0_77 = arith.constant 0 : index
    %c0_78 = arith.constant 0 : index
    %154 = vector.load %arg7[%c0_77, %c0_78] : memref<32x32xbf16, #tpu.memory_space<vmem>>, vector<32x32xbf16>
    %cst_79 = arith.constant dense<0.000000e+00> : vector<8x32xf32>
    %155 = tpu.matmul %151, %154, %cst_79 {dimension_numbers = #tpu.dot_dimension_numbers<[1], [0], [0], [1], [0, 0, 1, 1], [], []>} : vector<8x32xbf16>, vector<32x32xbf16>, vector<8x32xf32> -> vector<8x32xf32>
    %c0_80 = arith.constant 0 : index
    %c0_81 = arith.constant 0 : index
    %156 = vector.load %arg8[%c0_80, %c0_81] : memref<32x32xbf16, #tpu.memory_space<vmem>>, vector<32x32xbf16>
    %cst_82 = arith.constant dense<0.000000e+00> : vector<8x32xf32>
    %157 = tpu.matmul %151, %156, %cst_82 {dimension_numbers = #tpu.dot_dimension_numbers<[1], [0], [0], [1], [0, 0, 1, 1], [], []>} : vector<8x32xbf16>, vector<32x32xbf16>, vector<8x32xf32> -> vector<8x32xf32>
    %158 = arith.index_cast %150 : i32 to index
    %c0_83 = arith.constant 0 : index
    %159 = vector.load %arg17[%158, %c0_83] : memref<64x32xf32, #tpu.memory_space<vmem>>, vector<8x32xf32>
    %160 = arith.addf %159, %153 : vector<8x32xf32>
    %161 = arith.negf %160 : vector<8x32xf32>
    %162 = math.exp %161 : vector<8x32xf32>
    %cst_84 = arith.constant 1.000000e+00 : f32
    %163 = vector.broadcast %cst_84 : f32 to vector<8x32xf32>
    %164 = arith.addf %163, %162 : vector<8x32xf32>
    %165 = arith.divf %163, %164 : vector<8x32xf32>
    %166 = arith.index_cast %150 : i32 to index
    %c0_85 = arith.constant 0 : index
    %167 = vector.load %arg18[%166, %c0_85] : memref<64x32xf32, #tpu.memory_space<vmem>>, vector<8x32xf32>
    %168 = arith.addf %167, %155 : vector<8x32xf32>
    %169 = arith.negf %168 : vector<8x32xf32>
    %170 = math.exp %169 : vector<8x32xf32>
    %cst_86 = arith.constant 1.000000e+00 : f32
    %171 = vector.broadcast %cst_86 : f32 to vector<8x32xf32>
    %172 = arith.addf %171, %170 : vector<8x32xf32>
    %173 = arith.divf %171, %172 : vector<8x32xf32>
    %174 = arith.index_cast %150 : i32 to index
    %c0_87 = arith.constant 0 : index
    %175 = vector.load %arg19[%174, %c0_87] : memref<64x32xf32, #tpu.memory_space<vmem>>, vector<8x32xf32>
    %176 = arith.mulf %165, %157 : vector<8x32xf32>
    %177 = arith.addf %175, %176 : vector<8x32xf32>
    %178 = math.tanh %177 : vector<8x32xf32>
    %cst_88 = arith.constant 1.000000e+00 : f32
    %179 = vector.broadcast %cst_88 : f32 to vector<8x32xf32>
    %180 = arith.subf %179, %173 : vector<8x32xf32>
    %181 = arith.mulf %180, %178 : vector<8x32xf32>
    %182 = arith.mulf %173, %138 : vector<8x32xf32>
    %183 = arith.addf %181, %182 : vector<8x32xf32>
    %184 = arith.truncf %183 : vector<8x32xf32> to vector<8x32xbf16>
    %185 = arith.index_cast %150 : i32 to index
    %c0_89 = arith.constant 0 : index
    %186 = vector.load %arg20[%185, %c0_89] : memref<64x32xbf16, #tpu.memory_space<vmem>>, vector<8x32xbf16>
    tpu.vector_store %arg20[%185, %c0_89], %184 {strides = array<i32>} : memref<64x32xbf16, #tpu.memory_space<vmem>>, vector<8x32xbf16>,
    %c1_i32_90 = arith.constant 1 : i32
    %187 = vector.broadcast %c1_i32_90 : i32 to vector<8x1xi32>
    %188 = arith.subi %0, %187 : vector<8x1xi32>
    %189 = vector.broadcast %c3_i32 : i32 to vector<8x1xi32>
    %190 = arith.cmpi eq, %188, %189 : vector<8x1xi32>
    %191 = vector.shape_cast %190 : vector<8x1xi1> to vector<8x1xi1>
    %192 = vector.broadcast %191 : vector<8x1xi1> to vector<8x32xi1>
    %193 = arith.select %192, %183, %148 : vector<8x32xi1>, vector<8x32xf32>
    %c4_i32 = arith.constant 4 : i32
    %c8_i32_91 = arith.constant 8 : i32
    %194 = arith.muli %c4_i32, %c8_i32_91 : i32
    %195 = tpu.assume_multiple %194, 8 : i32
    %196 = arith.truncf %183 : vector<8x32xf32> to vector<8x32xbf16>
    %c0_92 = arith.constant 0 : index
    %c0_93 = arith.constant 0 : index
    %197 = vector.load %arg6[%c0_92, %c0_93] : memref<32x32xbf16, #tpu.memory_space<vmem>>, vector<32x32xbf16>
    %cst_94 = arith.constant dense<0.000000e+00> : vector<8x32xf32>
    %198 = tpu.matmul %196, %197, %cst_94 {dimension_numbers = #tpu.dot_dimension_numbers<[1], [0], [0], [1], [0, 0, 1, 1], [], []>} : vector<8x32xbf16>, vector<32x32xbf16>, vector<8x32xf32> -> vector<8x32xf32>
    %c0_95 = arith.constant 0 : index
    %c0_96 = arith.constant 0 : index
    %199 = vector.load %arg7[%c0_95, %c0_96] : memref<32x32xbf16, #tpu.memory_space<vmem>>, vector<32x32xbf16>
    %cst_97 = arith.constant dense<0.000000e+00> : vector<8x32xf32>
    %200 = tpu.matmul %196, %199, %cst_97 {dimension_numbers = #tpu.dot_dimension_numbers<[1], [0], [0], [1], [0, 0, 1, 1], [], []>} : vector<8x32xbf16>, vector<32x32xbf16>, vector<8x32xf32> -> vector<8x32xf32>
    %c0_98 = arith.constant 0 : index
    %c0_99 = arith.constant 0 : index
    %201 = vector.load %arg8[%c0_98, %c0_99] : memref<32x32xbf16, #tpu.memory_space<vmem>>, vector<32x32xbf16>
    %cst_100 = arith.constant dense<0.000000e+00> : vector<8x32xf32>
    %202 = tpu.matmul %196, %201, %cst_100 {dimension_numbers = #tpu.dot_dimension_numbers<[1], [0], [0], [1], [0, 0, 1, 1], [], []>} : vector<8x32xbf16>, vector<32x32xbf16>, vector<8x32xf32> -> vector<8x32xf32>
    %203 = arith.index_cast %195 : i32 to index
    %c0_101 = arith.constant 0 : index
    %204 = vector.load %arg17[%203, %c0_101] : memref<64x32xf32, #tpu.memory_space<vmem>>, vector<8x32xf32>
    %205 = arith.addf %204, %198 : vector<8x32xf32>
    %206 = arith.negf %205 : vector<8x32xf32>
    %207 = math.exp %206 : vector<8x32xf32>
    %cst_102 = arith.constant 1.000000e+00 : f32
    %208 = vector.broadcast %cst_102 : f32 to vector<8x32xf32>
    %209 = arith.addf %208, %207 : vector<8x32xf32>
    %210 = arith.divf %208, %209 : vector<8x32xf32>
    %211 = arith.index_cast %195 : i32 to index
    %c0_103 = arith.constant 0 : index
    %212 = vector.load %arg18[%211, %c0_103] : memref<64x32xf32, #tpu.memory_space<vmem>>, vector<8x32xf32>
    %213 = arith.addf %212, %200 : vector<8x32xf32>
    %214 = arith.negf %213 : vector<8x32xf32>
    %215 = math.exp %214 : vector<8x32xf32>
    %cst_104 = arith.constant 1.000000e+00 : f32
    %216 = vector.broadcast %cst_104 : f32 to vector<8x32xf32>
    %217 = arith.addf %216, %215 : vector<8x32xf32>
    %218 = arith.divf %216, %217 : vector<8x32xf32>
    %219 = arith.index_cast %195 : i32 to index
    %c0_105 = arith.constant 0 : index
    %220 = vector.load %arg19[%219, %c0_105] : memref<64x32xf32, #tpu.memory_space<vmem>>, vector<8x32xf32>
    %221 = arith.mulf %210, %202 : vector<8x32xf32>
    %222 = arith.addf %220, %221 : vector<8x32xf32>
    %223 = math.tanh %222 : vector<8x32xf32>
    %cst_106 = arith.constant 1.000000e+00 : f32
    %224 = vector.broadcast %cst_106 : f32 to vector<8x32xf32>
    %225 = arith.subf %224, %218 : vector<8x32xf32>
    %226 = arith.mulf %225, %223 : vector<8x32xf32>
    %227 = arith.mulf %218, %183 : vector<8x32xf32>
    %228 = arith.addf %226, %227 : vector<8x32xf32>
    %229 = arith.truncf %228 : vector<8x32xf32> to vector<8x32xbf16>
    %230 = arith.index_cast %195 : i32 to index
    %c0_107 = arith.constant 0 : index
    %231 = vector.load %arg20[%230, %c0_107] : memref<64x32xbf16, #tpu.memory_space<vmem>>, vector<8x32xbf16>
    tpu.vector_store %arg20[%230, %c0_107], %229 {strides = array<i32>} : memref<64x32xbf16, #tpu.memory_space<vmem>>, vector<8x32xbf16>,
    %c1_i32_108 = arith.constant 1 : i32
    %232 = vector.broadcast %c1_i32_108 : i32 to vector<8x1xi32>
    %233 = arith.subi %0, %232 : vector<8x1xi32>
    %234 = vector.broadcast %c4_i32 : i32 to vector<8x1xi32>
    %235 = arith.cmpi eq, %233, %234 : vector<8x1xi32>
    %236 = vector.shape_cast %235 : vector<8x1xi1> to vector<8x1xi1>
    %237 = vector.broadcast %236 : vector<8x1xi1> to vector<8x32xi1>
    %238 = arith.select %237, %228, %193 : vector<8x32xi1>, vector<8x32xf32>
    %c5_i32 = arith.constant 5 : i32
    %c8_i32_109 = arith.constant 8 : i32
    %239 = arith.muli %c5_i32, %c8_i32_109 : i32
    %240 = tpu.assume_multiple %239, 8 : i32
    %241 = arith.truncf %228 : vector<8x32xf32> to vector<8x32xbf16>
    %c0_110 = arith.constant 0 : index
    %c0_111 = arith.constant 0 : index
    %242 = vector.load %arg6[%c0_110, %c0_111] : memref<32x32xbf16, #tpu.memory_space<vmem>>, vector<32x32xbf16>
    %cst_112 = arith.constant dense<0.000000e+00> : vector<8x32xf32>
    %243 = tpu.matmul %241, %242, %cst_112 {dimension_numbers = #tpu.dot_dimension_numbers<[1], [0], [0], [1], [0, 0, 1, 1], [], []>} : vector<8x32xbf16>, vector<32x32xbf16>, vector<8x32xf32> -> vector<8x32xf32>
    %c0_113 = arith.constant 0 : index
    %c0_114 = arith.constant 0 : index
    %244 = vector.load %arg7[%c0_113, %c0_114] : memref<32x32xbf16, #tpu.memory_space<vmem>>, vector<32x32xbf16>
    %cst_115 = arith.constant dense<0.000000e+00> : vector<8x32xf32>
    %245 = tpu.matmul %241, %244, %cst_115 {dimension_numbers = #tpu.dot_dimension_numbers<[1], [0], [0], [1], [0, 0, 1, 1], [], []>} : vector<8x32xbf16>, vector<32x32xbf16>, vector<8x32xf32> -> vector<8x32xf32>
    %c0_116 = arith.constant 0 : index
    %c0_117 = arith.constant 0 : index
    %246 = vector.load %arg8[%c0_116, %c0_117] : memref<32x32xbf16, #tpu.memory_space<vmem>>, vector<32x32xbf16>
    %cst_118 = arith.constant dense<0.000000e+00> : vector<8x32xf32>
    %247 = tpu.matmul %241, %246, %cst_118 {dimension_numbers = #tpu.dot_dimension_numbers<[1], [0], [0], [1], [0, 0, 1, 1], [], []>} : vector<8x32xbf16>, vector<32x32xbf16>, vector<8x32xf32> -> vector<8x32xf32>
    %248 = arith.index_cast %240 : i32 to index
    %c0_119 = arith.constant 0 : index
    %249 = vector.load %arg17[%248, %c0_119] : memref<64x32xf32, #tpu.memory_space<vmem>>, vector<8x32xf32>
    %250 = arith.addf %249, %243 : vector<8x32xf32>
    %251 = arith.negf %250 : vector<8x32xf32>
    %252 = math.exp %251 : vector<8x32xf32>
    %cst_120 = arith.constant 1.000000e+00 : f32
    %253 = vector.broadcast %cst_120 : f32 to vector<8x32xf32>
    %254 = arith.addf %253, %252 : vector<8x32xf32>
    %255 = arith.divf %253, %254 : vector<8x32xf32>
    %256 = arith.index_cast %240 : i32 to index
    %c0_121 = arith.constant 0 : index
    %257 = vector.load %arg18[%256, %c0_121] : memref<64x32xf32, #tpu.memory_space<vmem>>, vector<8x32xf32>
    %258 = arith.addf %257, %245 : vector<8x32xf32>
    %259 = arith.negf %258 : vector<8x32xf32>
    %260 = math.exp %259 : vector<8x32xf32>
    %cst_122 = arith.constant 1.000000e+00 : f32
    %261 = vector.broadcast %cst_122 : f32 to vector<8x32xf32>
    %262 = arith.addf %261, %260 : vector<8x32xf32>
    %263 = arith.divf %261, %262 : vector<8x32xf32>
    %264 = arith.index_cast %240 : i32 to index
    %c0_123 = arith.constant 0 : index
    %265 = vector.load %arg19[%264, %c0_123] : memref<64x32xf32, #tpu.memory_space<vmem>>, vector<8x32xf32>
    %266 = arith.mulf %255, %247 : vector<8x32xf32>
    %267 = arith.addf %265, %266 : vector<8x32xf32>
    %268 = math.tanh %267 : vector<8x32xf32>
    %cst_124 = arith.constant 1.000000e+00 : f32
    %269 = vector.broadcast %cst_124 : f32 to vector<8x32xf32>
    %270 = arith.subf %269, %263 : vector<8x32xf32>
    %271 = arith.mulf %270, %268 : vector<8x32xf32>
    %272 = arith.mulf %263, %228 : vector<8x32xf32>
    %273 = arith.addf %271, %272 : vector<8x32xf32>
    %274 = arith.truncf %273 : vector<8x32xf32> to vector<8x32xbf16>
    %275 = arith.index_cast %240 : i32 to index
    %c0_125 = arith.constant 0 : index
    %276 = vector.load %arg20[%275, %c0_125] : memref<64x32xbf16, #tpu.memory_space<vmem>>, vector<8x32xbf16>
    tpu.vector_store %arg20[%275, %c0_125], %274 {strides = array<i32>} : memref<64x32xbf16, #tpu.memory_space<vmem>>, vector<8x32xbf16>,
    %c1_i32_126 = arith.constant 1 : i32
    %277 = vector.broadcast %c1_i32_126 : i32 to vector<8x1xi32>
    %278 = arith.subi %0, %277 : vector<8x1xi32>
    %279 = vector.broadcast %c5_i32 : i32 to vector<8x1xi32>
    %280 = arith.cmpi eq, %278, %279 : vector<8x1xi32>
    %281 = vector.shape_cast %280 : vector<8x1xi1> to vector<8x1xi1>
    %282 = vector.broadcast %281 : vector<8x1xi1> to vector<8x32xi1>
    %283 = arith.select %282, %273, %238 : vector<8x32xi1>, vector<8x32xf32>
    %c6_i32 = arith.constant 6 : i32
    %c8_i32_127 = arith.constant 8 : i32
    %284 = arith.muli %c6_i32, %c8_i32_127 : i32
    %285 = tpu.assume_multiple %284, 8 : i32
    %286 = arith.truncf %273 : vector<8x32xf32> to vector<8x32xbf16>
    %c0_128 = arith.constant 0 : index
    %c0_129 = arith.constant 0 : index
    %287 = vector.load %arg6[%c0_128, %c0_129] : memref<32x32xbf16, #tpu.memory_space<vmem>>, vector<32x32xbf16>
    %cst_130 = arith.constant dense<0.000000e+00> : vector<8x32xf32>
    %288 = tpu.matmul %286, %287, %cst_130 {dimension_numbers = #tpu.dot_dimension_numbers<[1], [0], [0], [1], [0, 0, 1, 1], [], []>} : vector<8x32xbf16>, vector<32x32xbf16>, vector<8x32xf32> -> vector<8x32xf32>
    %c0_131 = arith.constant 0 : index
    %c0_132 = arith.constant 0 : index
    %289 = vector.load %arg7[%c0_131, %c0_132] : memref<32x32xbf16, #tpu.memory_space<vmem>>, vector<32x32xbf16>
    %cst_133 = arith.constant dense<0.000000e+00> : vector<8x32xf32>
    %290 = tpu.matmul %286, %289, %cst_133 {dimension_numbers = #tpu.dot_dimension_numbers<[1], [0], [0], [1], [0, 0, 1, 1], [], []>} : vector<8x32xbf16>, vector<32x32xbf16>, vector<8x32xf32> -> vector<8x32xf32>
    %c0_134 = arith.constant 0 : index
    %c0_135 = arith.constant 0 : index
    %291 = vector.load %arg8[%c0_134, %c0_135] : memref<32x32xbf16, #tpu.memory_space<vmem>>, vector<32x32xbf16>
    %cst_136 = arith.constant dense<0.000000e+00> : vector<8x32xf32>
    %292 = tpu.matmul %286, %291, %cst_136 {dimension_numbers = #tpu.dot_dimension_numbers<[1], [0], [0], [1], [0, 0, 1, 1], [], []>} : vector<8x32xbf16>, vector<32x32xbf16>, vector<8x32xf32> -> vector<8x32xf32>
    %293 = arith.index_cast %285 : i32 to index
    %c0_137 = arith.constant 0 : index
    %294 = vector.load %arg17[%293, %c0_137] : memref<64x32xf32, #tpu.memory_space<vmem>>, vector<8x32xf32>
    %295 = arith.addf %294, %288 : vector<8x32xf32>
    %296 = arith.negf %295 : vector<8x32xf32>
    %297 = math.exp %296 : vector<8x32xf32>
    %cst_138 = arith.constant 1.000000e+00 : f32
    %298 = vector.broadcast %cst_138 : f32 to vector<8x32xf32>
    %299 = arith.addf %298, %297 : vector<8x32xf32>
    %300 = arith.divf %298, %299 : vector<8x32xf32>
    %301 = arith.index_cast %285 : i32 to index
    %c0_139 = arith.constant 0 : index
    %302 = vector.load %arg18[%301, %c0_139] : memref<64x32xf32, #tpu.memory_space<vmem>>, vector<8x32xf32>
    %303 = arith.addf %302, %290 : vector<8x32xf32>
    %304 = arith.negf %303 : vector<8x32xf32>
    %305 = math.exp %304 : vector<8x32xf32>
    %cst_140 = arith.constant 1.000000e+00 : f32
    %306 = vector.broadcast %cst_140 : f32 to vector<8x32xf32>
    %307 = arith.addf %306, %305 : vector<8x32xf32>
    %308 = arith.divf %306, %307 : vector<8x32xf32>
    %309 = arith.index_cast %285 : i32 to index
    %c0_141 = arith.constant 0 : index
    %310 = vector.load %arg19[%309, %c0_141] : memref<64x32xf32, #tpu.memory_space<vmem>>, vector<8x32xf32>
    %311 = arith.mulf %300, %292 : vector<8x32xf32>
    %312 = arith.addf %310, %311 : vector<8x32xf32>
    %313 = math.tanh %312 : vector<8x32xf32>
    %cst_142 = arith.constant 1.000000e+00 : f32
    %314 = vector.broadcast %cst_142 : f32 to vector<8x32xf32>
    %315 = arith.subf %314, %308 : vector<8x32xf32>
    %316 = arith.mulf %315, %313 : vector<8x32xf32>
    %317 = arith.mulf %308, %273 : vector<8x32xf32>
    %318 = arith.addf %316, %317 : vector<8x32xf32>
    %319 = arith.truncf %318 : vector<8x32xf32> to vector<8x32xbf16>
    %320 = arith.index_cast %285 : i32 to index
    %c0_143 = arith.constant 0 : index
    %321 = vector.load %arg20[%320, %c0_143] : memref<64x32xbf16, #tpu.memory_space<vmem>>, vector<8x32xbf16>
    tpu.vector_store %arg20[%320, %c0_143], %319 {strides = array<i32>} : memref<64x32xbf16, #tpu.memory_space<vmem>>, vector<8x32xbf16>,
    %c1_i32_144 = arith.constant 1 : i32
    %322 = vector.broadcast %c1_i32_144 : i32 to vector<8x1xi32>
    %323 = arith.subi %0, %322 : vector<8x1xi32>
    %324 = vector.broadcast %c6_i32 : i32 to vector<8x1xi32>
    %325 = arith.cmpi eq, %323, %324 : vector<8x1xi32>
    %326 = vector.shape_cast %325 : vector<8x1xi1> to vector<8x1xi1>
    %327 = vector.broadcast %326 : vector<8x1xi1> to vector<8x32xi1>
    %328 = arith.select %327, %318, %283 : vector<8x32xi1>, vector<8x32xf32>
    %c7_i32 = arith.constant 7 : i32
    %c8_i32_145 = arith.constant 8 : i32
    %329 = arith.muli %c7_i32, %c8_i32_145 : i32
    %330 = tpu.assume_multiple %329, 8 : i32
    %331 = arith.truncf %318 : vector<8x32xf32> to vector<8x32xbf16>
    %c0_146 = arith.constant 0 : index
    %c0_147 = arith.constant 0 : index
    %332 = vector.load %arg6[%c0_146, %c0_147] : memref<32x32xbf16, #tpu.memory_space<vmem>>, vector<32x32xbf16>
    %cst_148 = arith.constant dense<0.000000e+00> : vector<8x32xf32>
    %333 = tpu.matmul %331, %332, %cst_148 {dimension_numbers = #tpu.dot_dimension_numbers<[1], [0], [0], [1], [0, 0, 1, 1], [], []>} : vector<8x32xbf16>, vector<32x32xbf16>, vector<8x32xf32> -> vector<8x32xf32>
    %c0_149 = arith.constant 0 : index
    %c0_150 = arith.constant 0 : index
    %334 = vector.load %arg7[%c0_149, %c0_150] : memref<32x32xbf16, #tpu.memory_space<vmem>>, vector<32x32xbf16>
    %cst_151 = arith.constant dense<0.000000e+00> : vector<8x32xf32>
    %335 = tpu.matmul %331, %334, %cst_151 {dimension_numbers = #tpu.dot_dimension_numbers<[1], [0], [0], [1], [0, 0, 1, 1], [], []>} : vector<8x32xbf16>, vector<32x32xbf16>, vector<8x32xf32> -> vector<8x32xf32>
    %c0_152 = arith.constant 0 : index
    %c0_153 = arith.constant 0 : index
    %336 = vector.load %arg8[%c0_152, %c0_153] : memref<32x32xbf16, #tpu.memory_space<vmem>>, vector<32x32xbf16>
    %cst_154 = arith.constant dense<0.000000e+00> : vector<8x32xf32>
    %337 = tpu.matmul %331, %336, %cst_154 {dimension_numbers = #tpu.dot_dimension_numbers<[1], [0], [0], [1], [0, 0, 1, 1], [], []>} : vector<8x32xbf16>, vector<32x32xbf16>, vector<8x32xf32> -> vector<8x32xf32>
    %338 = arith.index_cast %330 : i32 to index
    %c0_155 = arith.constant 0 : index
    %339 = vector.load %arg17[%338, %c0_155] : memref<64x32xf32, #tpu.memory_space<vmem>>, vector<8x32xf32>
    %340 = arith.addf %339, %333 : vector<8x32xf32>
    %341 = arith.negf %340 : vector<8x32xf32>
    %342 = math.exp %341 : vector<8x32xf32>
    %cst_156 = arith.constant 1.000000e+00 : f32
    %343 = vector.broadcast %cst_156 : f32 to vector<8x32xf32>
    %344 = arith.addf %343, %342 : vector<8x32xf32>
    %345 = arith.divf %343, %344 : vector<8x32xf32>
    %346 = arith.index_cast %330 : i32 to index
    %c0_157 = arith.constant 0 : index
    %347 = vector.load %arg18[%346, %c0_157] : memref<64x32xf32, #tpu.memory_space<vmem>>, vector<8x32xf32>
    %348 = arith.addf %347, %335 : vector<8x32xf32>
    %349 = arith.negf %348 : vector<8x32xf32>
    %350 = math.exp %349 : vector<8x32xf32>
    %cst_158 = arith.constant 1.000000e+00 : f32
    %351 = vector.broadcast %cst_158 : f32 to vector<8x32xf32>
    %352 = arith.addf %351, %350 : vector<8x32xf32>
    %353 = arith.divf %351, %352 : vector<8x32xf32>
    %354 = arith.index_cast %330 : i32 to index
    %c0_159 = arith.constant 0 : index
    %355 = vector.load %arg19[%354, %c0_159] : memref<64x32xf32, #tpu.memory_space<vmem>>, vector<8x32xf32>
    %356 = arith.mulf %345, %337 : vector<8x32xf32>
    %357 = arith.addf %355, %356 : vector<8x32xf32>
    %358 = math.tanh %357 : vector<8x32xf32>
    %cst_160 = arith.constant 1.000000e+00 : f32
    %359 = vector.broadcast %cst_160 : f32 to vector<8x32xf32>
    %360 = arith.subf %359, %353 : vector<8x32xf32>
    %361 = arith.mulf %360, %358 : vector<8x32xf32>
    %362 = arith.mulf %353, %318 : vector<8x32xf32>
    %363 = arith.addf %361, %362 : vector<8x32xf32>
    %364 = arith.truncf %363 : vector<8x32xf32> to vector<8x32xbf16>
    %365 = arith.index_cast %330 : i32 to index
    %c0_161 = arith.constant 0 : index
    %366 = vector.load %arg20[%365, %c0_161] : memref<64x32xbf16, #tpu.memory_space<vmem>>, vector<8x32xbf16>
    tpu.vector_store %arg20[%365, %c0_161], %364 {strides = array<i32>} : memref<64x32xbf16, #tpu.memory_space<vmem>>, vector<8x32xbf16>,
    %c1_i32_162 = arith.constant 1 : i32
    %367 = vector.broadcast %c1_i32_162 : i32 to vector<8x1xi32>
    %368 = arith.subi %0, %367 : vector<8x1xi32>
    %369 = vector.broadcast %c7_i32 : i32 to vector<8x1xi32>
    %370 = arith.cmpi eq, %368, %369 : vector<8x1xi32>
    %371 = vector.shape_cast %370 : vector<8x1xi1> to vector<8x1xi1>
    %372 = vector.broadcast %371 : vector<8x1xi1> to vector<8x32xi1>
    %373 = arith.select %372, %363, %328 : vector<8x32xi1>, vector<8x32xf32>
    %c8_i32_163 = arith.constant 8 : i32
    %c0_164 = arith.constant 0 : index
    %c0_165 = arith.constant 0 : index
    %374 = vector.load %arg20[%c0_164, %c0_165] : memref<64x32xbf16, #tpu.memory_space<vmem>>, vector<64x32xbf16>
    %c0_166 = arith.constant 0 : index
    %c0_167 = arith.constant 0 : index
    %375 = vector.load %arg9[%c0_166, %c0_167] : memref<32x32xbf16, #tpu.memory_space<vmem>>, vector<32x32xbf16>
    %cst_168 = arith.constant dense<0.000000e+00> : vector<64x32xf32>
    %376 = tpu.matmul %374, %375, %cst_168 {dimension_numbers = #tpu.dot_dimension_numbers<[1], [0], [0], [1], [0, 0, 1, 1], [], []>} : vector<64x32xbf16>, vector<32x32xbf16>, vector<64x32xf32> -> vector<64x32xf32>
    %377 = arith.truncf %373 : vector<8x32xf32> to vector<8x32xbf16>
    %c0_169 = arith.constant 0 : index
    %c0_170 = arith.constant 0 : index
    %378 = vector.load %arg9[%c0_169, %c0_170] : memref<32x32xbf16, #tpu.memory_space<vmem>>, vector<32x32xbf16>
    %cst_171 = arith.constant dense<0.000000e+00> : vector<8x32xf32>
    %379 = tpu.matmul %377, %378, %cst_171 {dimension_numbers = #tpu.dot_dimension_numbers<[1], [0], [0], [1], [0, 0, 1, 1], [], []>} : vector<8x32xbf16>, vector<32x32xbf16>, vector<8x32xf32> -> vector<8x32xf32>
    %380 = arith.truncf %379 : vector<8x32xf32> to vector<8x32xbf16>
    %c0_172 = arith.constant 0 : index
    %c0_173 = arith.constant 0 : index
    %381 = vector.load %arg10[%c0_172, %c0_173] : memref<32x32xbf16, #tpu.memory_space<vmem>>, vector<32x32xbf16>
    %cst_174 = arith.constant dense<0.000000e+00> : vector<8x32xf32>
    %382 = tpu.matmul %380, %381, %cst_174 {dimension_numbers = #tpu.dot_dimension_numbers<[1], [0], [0], [1], [0, 0, 1, 1], [], []>} : vector<8x32xbf16>, vector<32x32xbf16>, vector<8x32xf32> -> vector<8x32xf32>
    %383 = arith.truncf %382 : vector<8x32xf32> to vector<8x32xbf16>
    %c0_175 = arith.constant 0 : index
    %c0_176 = arith.constant 0 : index
    %384 = vector.load %arg11[%c0_175, %c0_176] : memref<32x32xbf16, #tpu.memory_space<vmem>>, vector<32x32xbf16>
    %cst_177 = arith.constant dense<0.000000e+00> : vector<8x32xf32>
    %385 = tpu.matmul %383, %384, %cst_177 {dimension_numbers = #tpu.dot_dimension_numbers<[1], [0], [0], [1], [0, 0, 1, 1], [], []>} : vector<8x32xbf16>, vector<32x32xbf16>, vector<8x32xf32> -> vector<8x32xf32>
    %386 = arith.truncf %376 : vector<64x32xf32> to vector<64x32xbf16>
    %c0_178 = arith.constant 0 : index
    %c0_179 = arith.constant 0 : index
    %387 = vector.load %arg12[%c0_178, %c0_179] : memref<32x32xbf16, #tpu.memory_space<vmem>>, vector<32x32xbf16>
    %cst_180 = arith.constant dense<0.000000e+00> : vector<64x32xf32>
    %388 = tpu.matmul %386, %387, %cst_180 {dimension_numbers = #tpu.dot_dimension_numbers<[1], [0], [0], [1], [0, 0, 1, 1], [], []>} : vector<64x32xbf16>, vector<32x32xbf16>, vector<64x32xf32> -> vector<64x32xf32>
    %389 = tpu.concatenate %385, %385, %385, %385, %385, %385, %385, %385 in 0 : vector<8x32xf32>, vector<8x32xf32>, vector<8x32xf32>, vector<8x32xf32>, vector<8x32xf32>, vector<8x32xf32>, vector<8x32xf32>, vector<8x32xf32> -> vector<64x32xf32>
    %390 = arith.addf %388, %389 : vector<64x32xf32>
    %391 = arith.negf %390 : vector<64x32xf32>
    %392 = math.exp %391 : vector<64x32xf32>
    %cst_181 = arith.constant 1.000000e+00 : f32
    %393 = vector.broadcast %cst_181 : f32 to vector<64x32xf32>
    %394 = arith.addf %393, %392 : vector<64x32xf32>
    %395 = arith.divf %393, %394 : vector<64x32xf32>
    %c0_182 = arith.constant 0 : index
    %c0_183 = arith.constant 0 : index
    %396 = vector.load %arg13[%c0_182, %c0_183] : memref<1x32xf32, #tpu.memory_space<vmem>>, vector<1x32xf32>
    %397 = vector.broadcast %396 : vector<1x32xf32> to vector<64x32xf32>
    %398 = arith.mulf %395, %397 : vector<64x32xf32>
    %cst_184 = arith.constant dense<0.000000e+00> : vector<64xf32>
    %399 = vector.multi_reduction <add>, %398, %cst_184 [1] : vector<64x32xf32> to vector<64xf32>
    %400 = vector.shape_cast %399 : vector<64xf32> to vector<64x1xf32>
    %401 = vector.broadcast %400 : vector<64x1xf32> to vector<64x32xf32>
    %402 = arith.mulf %401, %376 : vector<64x32xf32>
    %c0_185 = arith.constant 0 : index
    %c0_186 = arith.constant 0 : index
    %403 = vector.load %arg19[%c0_185, %c0_186] : memref<64x32xf32, #tpu.memory_space<vmem>>, vector<64x32xf32>
    tpu.vector_store %arg19[%c0_185, %c0_186], %402 {strides = array<i32>} : memref<64x32xf32, #tpu.memory_space<vmem>>, vector<64x32xf32>,
    %cst_187 = arith.constant 0.000000e+00 : f32
    %404 = vector.broadcast %cst_187 : f32 to vector<8x32xf32>
    %c0_i32_188 = arith.constant 0 : i32
    %c8_i32_189 = arith.constant 8 : i32
    %405 = arith.muli %c0_i32_188, %c8_i32_189 : i32
    %406 = tpu.assume_multiple %405, 8 : i32
    %407 = arith.index_cast %406 : i32 to index
    %c0_190 = arith.constant 0 : index
    %408 = vector.load %arg19[%407, %c0_190] : memref<64x32xf32, #tpu.memory_space<vmem>>, vector<8x32xf32>
    %409 = vector.broadcast %c0_i32_188 : i32 to vector<8x1xi32>
    %410 = arith.cmpi sgt, %0, %409 : vector<8x1xi32>
    %cst_191 = arith.constant 0.000000e+00 : f32
    %411 = vector.shape_cast %410 : vector<8x1xi1> to vector<8x1xi1>
    %412 = vector.broadcast %411 : vector<8x1xi1> to vector<8x32xi1>
    %413 = vector.broadcast %cst_191 : f32 to vector<8x32xf32>
    %414 = arith.select %412, %408, %413 : vector<8x32xi1>, vector<8x32xf32>
    %415 = arith.addf %404, %414 : vector<8x32xf32>
    %c1_i32_192 = arith.constant 1 : i32
    %c8_i32_193 = arith.constant 8 : i32
    %416 = arith.muli %c1_i32_192, %c8_i32_193 : i32
    %417 = tpu.assume_multiple %416, 8 : i32
    %418 = arith.index_cast %417 : i32 to index
    %c0_194 = arith.constant 0 : index
    %419 = vector.load %arg19[%418, %c0_194] : memref<64x32xf32, #tpu.memory_space<vmem>>, vector<8x32xf32>
    %420 = vector.broadcast %c1_i32_192 : i32 to vector<8x1xi32>
    %421 = arith.cmpi sgt, %0, %420 : vector<8x1xi32>
    %cst_195 = arith.constant 0.000000e+00 : f32
    %422 = vector.shape_cast %421 : vector<8x1xi1> to vector<8x1xi1>
    %423 = vector.broadcast %422 : vector<8x1xi1> to vector<8x32xi1>
    %424 = vector.broadcast %cst_195 : f32 to vector<8x32xf32>
    %425 = arith.select %423, %419, %424 : vector<8x32xi1>, vector<8x32xf32>
    %426 = arith.addf %415, %425 : vector<8x32xf32>
    %c2_i32_196 = arith.constant 2 : i32
    %c8_i32_197 = arith.constant 8 : i32
    %427 = arith.muli %c2_i32_196, %c8_i32_197 : i32
    %428 = tpu.assume_multiple %427, 8 : i32
    %429 = arith.index_cast %428 : i32 to index
    %c0_198 = arith.constant 0 : index
    %430 = vector.load %arg19[%429, %c0_198] : memref<64x32xf32, #tpu.memory_space<vmem>>, vector<8x32xf32>
    %431 = vector.broadcast %c2_i32_196 : i32 to vector<8x1xi32>
    %432 = arith.cmpi sgt, %0, %431 : vector<8x1xi32>
    %cst_199 = arith.constant 0.000000e+00 : f32
    %433 = vector.shape_cast %432 : vector<8x1xi1> to vector<8x1xi1>
    %434 = vector.broadcast %433 : vector<8x1xi1> to vector<8x32xi1>
    %435 = vector.broadcast %cst_199 : f32 to vector<8x32xf32>
    %436 = arith.select %434, %430, %435 : vector<8x32xi1>, vector<8x32xf32>
    %437 = arith.addf %426, %436 : vector<8x32xf32>
    %c3_i32_200 = arith.constant 3 : i32
    %c8_i32_201 = arith.constant 8 : i32
    %438 = arith.muli %c3_i32_200, %c8_i32_201 : i32
    %439 = tpu.assume_multiple %438, 8 : i32
    %440 = arith.index_cast %439 : i32 to index
    %c0_202 = arith.constant 0 : index
    %441 = vector.load %arg19[%440, %c0_202] : memref<64x32xf32, #tpu.memory_space<vmem>>, vector<8x32xf32>
    %442 = vector.broadcast %c3_i32_200 : i32 to vector<8x1xi32>
    %443 = arith.cmpi sgt, %0, %442 : vector<8x1xi32>
    %cst_203 = arith.constant 0.000000e+00 : f32
    %444 = vector.shape_cast %443 : vector<8x1xi1> to vector<8x1xi1>
    %445 = vector.broadcast %444 : vector<8x1xi1> to vector<8x32xi1>
    %446 = vector.broadcast %cst_203 : f32 to vector<8x32xf32>
    %447 = arith.select %445, %441, %446 : vector<8x32xi1>, vector<8x32xf32>
    %448 = arith.addf %437, %447 : vector<8x32xf32>
    %c4_i32_204 = arith.constant 4 : i32
    %c8_i32_205 = arith.constant 8 : i32
    %449 = arith.muli %c4_i32_204, %c8_i32_205 : i32
    %450 = tpu.assume_multiple %449, 8 : i32
    %451 = arith.index_cast %450 : i32 to index
    %c0_206 = arith.constant 0 : index
    %452 = vector.load %arg19[%451, %c0_206] : memref<64x32xf32, #tpu.memory_space<vmem>>, vector<8x32xf32>
    %453 = vector.broadcast %c4_i32_204 : i32 to vector<8x1xi32>
    %454 = arith.cmpi sgt, %0, %453 : vector<8x1xi32>
    %cst_207 = arith.constant 0.000000e+00 : f32
    %455 = vector.shape_cast %454 : vector<8x1xi1> to vector<8x1xi1>
    %456 = vector.broadcast %455 : vector<8x1xi1> to vector<8x32xi1>
    %457 = vector.broadcast %cst_207 : f32 to vector<8x32xf32>
    %458 = arith.select %456, %452, %457 : vector<8x32xi1>, vector<8x32xf32>
    %459 = arith.addf %448, %458 : vector<8x32xf32>
    %c5_i32_208 = arith.constant 5 : i32
    %c8_i32_209 = arith.constant 8 : i32
    %460 = arith.muli %c5_i32_208, %c8_i32_209 : i32
    %461 = tpu.assume_multiple %460, 8 : i32
    %462 = arith.index_cast %461 : i32 to index
    %c0_210 = arith.constant 0 : index
    %463 = vector.load %arg19[%462, %c0_210] : memref<64x32xf32, #tpu.memory_space<vmem>>, vector<8x32xf32>
    %464 = vector.broadcast %c5_i32_208 : i32 to vector<8x1xi32>
    %465 = arith.cmpi sgt, %0, %464 : vector<8x1xi32>
    %cst_211 = arith.constant 0.000000e+00 : f32
    %466 = vector.shape_cast %465 : vector<8x1xi1> to vector<8x1xi1>
    %467 = vector.broadcast %466 : vector<8x1xi1> to vector<8x32xi1>
    %468 = vector.broadcast %cst_211 : f32 to vector<8x32xf32>
    %469 = arith.select %467, %463, %468 : vector<8x32xi1>, vector<8x32xf32>
    %470 = arith.addf %459, %469 : vector<8x32xf32>
    %c6_i32_212 = arith.constant 6 : i32
    %c8_i32_213 = arith.constant 8 : i32
    %471 = arith.muli %c6_i32_212, %c8_i32_213 : i32
    %472 = tpu.assume_multiple %471, 8 : i32
    %473 = arith.index_cast %472 : i32 to index
    %c0_214 = arith.constant 0 : index
    %474 = vector.load %arg19[%473, %c0_214] : memref<64x32xf32, #tpu.memory_space<vmem>>, vector<8x32xf32>
    %475 = vector.broadcast %c6_i32_212 : i32 to vector<8x1xi32>
    %476 = arith.cmpi sgt, %0, %475 : vector<8x1xi32>
    %cst_215 = arith.constant 0.000000e+00 : f32
    %477 = vector.shape_cast %476 : vector<8x1xi1> to vector<8x1xi1>
    %478 = vector.broadcast %477 : vector<8x1xi1> to vector<8x32xi1>
    %479 = vector.broadcast %cst_215 : f32 to vector<8x32xf32>
    %480 = arith.select %478, %474, %479 : vector<8x32xi1>, vector<8x32xf32>
    %481 = arith.addf %470, %480 : vector<8x32xf32>
    %c7_i32_216 = arith.constant 7 : i32
    %c8_i32_217 = arith.constant 8 : i32
    %482 = arith.muli %c7_i32_216, %c8_i32_217 : i32
    %483 = tpu.assume_multiple %482, 8 : i32
    %484 = arith.index_cast %483 : i32 to index
    %c0_218 = arith.constant 0 : index
    %485 = vector.load %arg19[%484, %c0_218] : memref<64x32xf32, #tpu.memory_space<vmem>>, vector<8x32xf32>
    %486 = vector.broadcast %c7_i32_216 : i32 to vector<8x1xi32>
    %487 = arith.cmpi sgt, %0, %486 : vector<8x1xi32>
    %cst_219 = arith.constant 0.000000e+00 : f32
    %488 = vector.shape_cast %487 : vector<8x1xi1> to vector<8x1xi1>
    %489 = vector.broadcast %488 : vector<8x1xi1> to vector<8x32xi1>
    %490 = vector.broadcast %cst_219 : f32 to vector<8x32xf32>
    %491 = arith.select %489, %485, %490 : vector<8x32xi1>, vector<8x32xf32>
    %492 = arith.addf %481, %491 : vector<8x32xf32>
    %c8_i32_220 = arith.constant 8 : i32
    %493 = arith.truncf %382 : vector<8x32xf32> to vector<8x32xbf16>
    %c0_221 = arith.constant 0 : index
    %c0_222 = arith.constant 0 : index
    %494 = vector.load %arg14[%c0_221, %c0_222] : memref<32x32xbf16, #tpu.memory_space<vmem>>, vector<32x32xbf16>
    %cst_223 = arith.constant dense<0.000000e+00> : vector<8x32xf32>
    %495 = tpu.matmul %493, %494, %cst_223 {dimension_numbers = #tpu.dot_dimension_numbers<[1], [0], [0], [1], [0, 0, 1, 1], [], []>} : vector<8x32xbf16>, vector<32x32xbf16>, vector<8x32xf32> -> vector<8x32xf32>
    %496 = arith.truncf %492 : vector<8x32xf32> to vector<8x32xbf16>
    %c0_224 = arith.constant 0 : index
    %c0_225 = arith.constant 0 : index
    %497 = vector.load %arg15[%c0_224, %c0_225] : memref<32x32xbf16, #tpu.memory_space<vmem>>, vector<32x32xbf16>
    %cst_226 = arith.constant dense<0.000000e+00> : vector<8x32xf32>
    %498 = tpu.matmul %496, %497, %cst_226 {dimension_numbers = #tpu.dot_dimension_numbers<[1], [0], [0], [1], [0, 0, 1, 1], [], []>} : vector<8x32xbf16>, vector<32x32xbf16>, vector<8x32xf32> -> vector<8x32xf32>
    %499 = arith.addf %495, %498 : vector<8x32xf32>
    %c0_227 = arith.constant 0 : index
    %c0_228 = arith.constant 0 : index
    %500 = vector.load %arg16[%c0_227, %c0_228] : memref<8x32xf32, #tpu.memory_space<vmem>>, vector<8x32xf32>
    tpu.vector_store %arg16[%c0_227, %c0_228], %499 {strides = array<i32>} : memref<8x32xf32, #tpu.memory_space<vmem>>, vector<8x32xf32>,
    return
  }
  func.func @transform_0(%arg0: i32) -> (i32, i32) {
    %c0_i32 = arith.constant 0 : i32
    %c0_i32_0 = arith.constant 0 : i32
    return %arg0, %c0_i32 : i32, i32
  }
  func.func @transform_1(%arg0: i32) -> (i32, i32, i32) {
    %c0_i32 = arith.constant 0 : i32
    %c0_i32_0 = arith.constant 0 : i32
    %c0_i32_1 = arith.constant 0 : i32
    return %arg0, %c0_i32, %c0_i32_0 : i32, i32, i32
  }
  func.func @transform_2(%arg0: i32) -> (i32, i32) {
    %c0_i32 = arith.constant 0 : i32
    %c0_i32_0 = arith.constant 0 : i32
    %c0_i32_1 = arith.constant 0 : i32
    return %c0_i32, %c0_i32_0 : i32, i32
  }
  func.func @transform_3(%arg0: i32) -> (i32, i32) {
    %c0_i32 = arith.constant 0 : i32
    %c0_i32_0 = arith.constant 0 : i32
    %c0_i32_1 = arith.constant 0 : i32
    return %c0_i32, %c0_i32_0 : i32, i32
  }
  func.func @transform_4(%arg0: i32) -> (i32, i32) {
    %c0_i32 = arith.constant 0 : i32
    %c0_i32_0 = arith.constant 0 : i32
    %c0_i32_1 = arith.constant 0 : i32
    return %c0_i32, %c0_i32_0 : i32, i32
  }
  func.func @transform_5(%arg0: i32) -> (i32, i32) {
    %c0_i32 = arith.constant 0 : i32
    %c0_i32_0 = arith.constant 0 : i32
    %c0_i32_1 = arith.constant 0 : i32
    return %c0_i32, %c0_i32_0 : i32, i32
  }
  func.func @transform_6(%arg0: i32) -> (i32, i32) {
    %c0_i32 = arith.constant 0 : i32
    %c0_i32_0 = arith.constant 0 : i32
    %c0_i32_1 = arith.constant 0 : i32
    return %c0_i32, %c0_i32_0 : i32, i32
  }
  func.func @transform_7(%arg0: i32) -> (i32, i32) {
    %c0_i32 = arith.constant 0 : i32
    %c0_i32_0 = arith.constant 0 : i32
    %c0_i32_1 = arith.constant 0 : i32
    return %c0_i32, %c0_i32_0 : i32, i32
  }
  func.func @transform_8(%arg0: i32) -> (i32, i32) {
    %c0_i32 = arith.constant 0 : i32
    %c0_i32_0 = arith.constant 0 : i32
    %c0_i32_1 = arith.constant 0 : i32
    return %c0_i32, %c0_i32_0 : i32, i32
  }
  func.func @transform_9(%arg0: i32) -> (i32, i32) {
    %c0_i32 = arith.constant 0 : i32
    %c0_i32_0 = arith.constant 0 : i32
    %c0_i32_1 = arith.constant 0 : i32
    return %c0_i32, %c0_i32_0 : i32, i32
  }
  func.func @transform_10(%arg0: i32) -> (i32, i32) {
    %c0_i32 = arith.constant 0 : i32
    %c0_i32_0 = arith.constant 0 : i32
    %c0_i32_1 = arith.constant 0 : i32
    return %c0_i32, %c0_i32_0 : i32, i32
  }
  func.func @transform_11(%arg0: i32) -> (i32, i32) {
    %c0_i32 = arith.constant 0 : i32
    %c0_i32_0 = arith.constant 0 : i32
    %c0_i32_1 = arith.constant 0 : i32
    return %c0_i32, %c0_i32_0 : i32, i32
  }
  func.func @transform_12(%arg0: i32) -> (i32, i32) {
    %c0_i32 = arith.constant 0 : i32
    %c0_i32_0 = arith.constant 0 : i32
    %c0_i32_1 = arith.constant 0 : i32
    return %c0_i32, %c0_i32_0 : i32, i32
  }
  func.func @transform_13(%arg0: i32) -> (i32, i32) {
    %c0_i32 = arith.constant 0 : i32
    %c0_i32_0 = arith.constant 0 : i32
    %c0_i32_1 = arith.constant 0 : i32
    return %c0_i32, %c0_i32_0 : i32, i32
  }
  func.func @transform_14(%arg0: i32) -> (i32, i32) {
    %c0_i32 = arith.constant 0 : i32
    %c0_i32_0 = arith.constant 0 : i32
    %c0_i32_1 = arith.constant 0 : i32
    return %c0_i32, %c0_i32_0 : i32, i32
  }
  func.func @transform_15(%arg0: i32) -> (i32, i32) {
    %c0_i32 = arith.constant 0 : i32
    %c0_i32_0 = arith.constant 0 : i32
    return %arg0, %c0_i32 : i32, i32
  }
}

</mosaic_0001>

<bundles_post_ra>
// kernel: tpu_custom_call.1
= control target key start
LH: loop header
LB: loop body
LE: loop exit
PB: predicated region body
PF: predicated region fallthrough
CT: control target
= control target key end

     0   :  { %20 = vsyncpa [#allocation7], 0  ;;  %s3515_s0 = inlined_call_operand.vmem [shape: s32[8,1], index: 0, kind: input, shape index: {}]   ;;  %s3516_s1 = inlined_call_operand.vmem [shape: bf16[1,64,32], index: 1, kind: input, shape index: {}]   ;;  %s3517_s2 = inlined_call_operand.vmem [shape: bf16[32,32], index: 2, kind: input, shape index: {}]   ;;  %s3518_s3 = inlined_call_operand.vmem [shape: bf16[32,32], index: 3, kind: input, shape index: {}]   ;;  %s3519_s4 = inlined_call_operand.vmem [shape: bf16[32,32], index: 4, kind: input, shape index: {}]   ;;  %s3520_s5 = inlined_call_operand.hbm [shape: bf16[32,32], index: 5, kind: input, shape index: {}]   ;;  %s3521_s6 = inlined_call_operand.hbm [shape: bf16[32,32], index: 6, kind: input, shape index: {}]   ;;  %s3522_s7 = inlined_call_operand.hbm [shape: bf16[32,32], index: 7, kind: input, shape index: {}]   ;;  %s3523_s8 = inlined_call_operand.vmem [shape: bf16[32,32], index: 8, kind: input, shape index: {}]   ;;  %s3524_s9 = inlined_call_operand.hbm [shape: bf16[32,32], index: 9, kind: input, shape index: {}]   ;;  %s3525_s10 = inlined_call_operand.hbm [shape: bf16[32,32], index: 10, kind: input, shape index: {}]   ;;  %s3526_s11 = inlined_call_operand.hbm [shape: bf16[32,32], index: 11, kind: input, shape index: {}]   ;;  %s3527_s12 = inlined_call_operand.vmem [shape: f32[1,32], index: 12, kind: input, shape index: {}]   ;;  %s3528_s13 = inlined_call_operand.hbm [shape: bf16[32,32], index: 13, kind: input, shape index: {}]   ;;  %s3529_s14 = inlined_call_operand.hbm [shape: bf16[32,32], index: 14, kind: input, shape index: {}]   ;;  %s3530_s15 = inlined_call_operand.hbm [shape: f32[8,32], index: 15, kind: output, shape index: {}]  }
   0x1   :  { %21 = vsyncpa [#allocation10], 0 }
   0x2   :  { %22 = vsyncpa [#allocation13], 0 }
   0x3   :  { %23 = vsyncpa [#allocation16], 0 }
   0x4   :  { %24 = vsyncpa [#allocation19], 0 }
   0x5   :  { %25 = vsyncpa [#allocation8], 0  ;;  %s53_s20 = sshll.u32 %s3521_s6, 4  ;;  %s2989_s21 = smov [#allocation9]   ;;  %s54_s20 = int_to_ptr.hbm [resolvable:$true] %s53_s20 }
   0x6   :  { %s55_s22 = sshll.u32 %s2989_s21, 4  ;;  %s81_s25 = sshll.u32 %s3524_s9, 4  ;;  %s56_s22 = int_to_ptr.vmem [resolvable:$true] %s55_s22  ;;  %s82_s25 = int_to_ptr.hbm [resolvable:$true] %s81_s25 }
   0x7   :  { %s2990_s26 = smov 64   ;;  %s2991_s27 = smov 4  }
   0x8   :  { %61 = dma.hbm_to_vmem [thread:$0]  %s54_s20, 256, %s56_s22, [#allocation10], %s2990_s26, %s2990_s26, %s2991_s27  }
   0x9   :  { %s2992_s28 = smov [#allocation12]   ;;  %s107_s6 = sshll.u32 %s3526_s11, 4  ;;  %s108_s6 = int_to_ptr.hbm [resolvable:$true] %s107_s6 }
   0xa   :  { %s83_s29 = sshll.u32 %s2992_s28, 4  ;;  %s40_s18 = sshll.u32 %s3520_s5, 4  ;;  %s84_s29 = int_to_ptr.vmem [resolvable:$true] %s83_s29  ;;  %s41_s18 = int_to_ptr.hbm [resolvable:$true] %s40_s18 }
   0xb   :  { %89 = dma.hbm_to_vmem [thread:$0]  %s82_s25, 256, %s84_s29, [#allocation13], %s2990_s26, %s2990_s26, %s2991_s27  }
   0xc   :  { %s2993_s19 = smov [#allocation15]   ;;  %s2994_s20 = smov [#allocation6]  }
   0xd   :  { %s109_s21 = sshll.u32 %s2993_s19, 4  ;;  %s42_s11 = sshll.u32 %s2994_s20, 4  ;;  %s110_s21 = int_to_ptr.vmem [resolvable:$true] %s109_s21  ;;  %s43_s11 = int_to_ptr.vmem [resolvable:$true] %s42_s11 }
   0xe   :  { %115 = dma.hbm_to_vmem [thread:$0]  %s108_s6, 256, %s110_s21, [#allocation16], %s2990_s26, %s2990_s26, %s2991_s27  }
   0xf   :  { %s66_s24 = sshll.u32 %s3522_s7, 4  ;;  %s94_s28 = sshll.u32 %s3525_s10, 4  ;;  %s67_s24 = int_to_ptr.hbm [resolvable:$true] %s66_s24  ;;  %s95_s28 = int_to_ptr.hbm [resolvable:$true] %s94_s28 }
  0x10   :  { %48 = dma.hbm_to_vmem [thread:$0]  %s41_s18, 256, %s43_s11, [#allocation7], %s2990_s26, %s2990_s26, %s2991_s27  }
  0x11   :  { %s2995_s29 = smov [#allocation11]   ;;  %s2996_s16 = smov [#allocation14]  }
  0x12   :  { %s68_s30 = sshll.u32 %s2995_s29, 4  ;;  %s96_s7 = sshll.u32 %s2996_s16, 4  ;;  %s69_s30 = int_to_ptr.vmem [resolvable:$true] %s68_s30  ;;  %s97_s7 = int_to_ptr.vmem [resolvable:$true] %s96_s7 }
  0x13   :  { %74 = dma.hbm_to_vmem [thread:$0]  %s67_s24, 256, %s69_s30, [#allocation10], %s2990_s26, %s2990_s26, %s2991_s27  }
  0x14   :  { %s122_s17 = sshll.u32 %s3528_s13, 4  ;;  %s135_s19 = sshll.u32 %s3529_s14, 4  ;;  %s123_s17 = int_to_ptr.hbm [resolvable:$true] %s122_s17  ;;  %s136_s19 = int_to_ptr.hbm [resolvable:$true] %s135_s19 }
  0x15   :  { %102 = dma.hbm_to_vmem [thread:$0]  %s95_s28, 256, %s97_s7, [#allocation13], %s2990_s26, %s2990_s26, %s2991_s27  }
  0x16   :  { %s2997_s21 = smov [#allocation17]   ;;  %s2998_s11 = smov [#allocation18]  }
  0x17   :  { %s124_s20 = sshll.u32 %s2997_s21, 4  ;;  %s137_s13 = sshll.u32 %s2998_s11, 4  ;;  %s125_s20 = int_to_ptr.vmem [resolvable:$true] %s124_s20  ;;  %s138_s13 = int_to_ptr.vmem [resolvable:$true] %s137_s13 }
  0x18   :  { %130 = dma.hbm_to_vmem [thread:$0]  %s123_s17, 256, %s125_s20, [#allocation16], %s2990_s26, %s2990_s26, %s2991_s27  }
  0x19   :  { %143 = dma.hbm_to_vmem [thread:$0]  %s136_s19, 256, %s138_s13, [#allocation19], %s2990_s26, %s2990_s26, %s2991_s27  }
  0x1a   :  { %2977 = dma.done.wait [#allocation7], 256  }
  0x1b   :  { %2978 = vsyncadd [#allocation7], 4294967040 }
  0x1c   :  { %2979 = dma.done.wait [#allocation10], 512  }
  0x1d   :  { %2980 = vsyncadd [#allocation10], 4294966784 }
  0x1e   :  { %2981 = dma.done.wait [#allocation13], 512  }
  0x1f   :  { %2982 = vsyncadd [#allocation13], 4294966784 }
  0x20   :  { %2983 = dma.done.wait [#allocation16], 512  }
  0x21   :  { %2984 = vsyncadd [#allocation16], 4294966784 }
  0x22   :  { %2985 = dma.done.wait [#allocation19], 256  }
  0x23   :  { %2986 = vsyncadd [#allocation19], 4294967040  ;;  %v2999_v0 = vmov 0   ;;  %v2561_v1 = vld [vmem:[%s3517_s2 + $0x8] sm:$0xff]  ;;  %v2560_v4 = vld [vmem:[%s3517_s2] sm:$0xff]  ;;  %vm222_vm0 = vcmask 261120  }
  0x24   :  { %2644 = vset.pattern.permute.xlu0 %v2999_v0  ;;  %2645 = vset.pattern.permute.xlu1 %v2999_v0  ;;  %v2567_v2 = vld [vmem:[#allocation6 + $0x8] sm:$0xff]  ;;  %v2566_v5 = vld [vmem:[#allocation6] sm:$0xff]  ;;  %v2569_v6 = vld [vmem:[#allocation9 + $0x8] sm:$0xff]  ;;  %vm519_vm11 = vcmask 257024   ;;  %s2175_s23 = sshll.u32 %s3530_s15, 4  ;;  %s2176_s23 = int_to_ptr.hbm [resolvable:$true] %s2175_s23 }
  0x25   :  { %2646 = vset.pattern.permute.xlu2 %v2999_v0  ;;  %v2563_v3 = vld [vmem:[%s3518_s3 + $0x8] sm:$0xff]  ;;  %241 = vmatpush.bf16.msra.mxu0 %v2561_v1  ;;  %v2562_v7 = vld [vmem:[%s3518_s3] sm:$0xff]  ;;  %v3153_v10 = vld [vmem:[%s3516_s1 + $0x18] sm:$0xff] }
  0x26   :  { %403 = vmatpush.bf16.msra.mxu3 %v2567_v2  ;;  %294 = vmatpush.bf16.msra.mxu1 %v2563_v3  ;;  %v2556_v8 = vld [vmem:[%s3516_s1] sm:$0xff]  ;;  %v2565_v9 = vld [vmem:[%s3519_s4 + $0x8] sm:$0xff]  ;;  %v2568_v11 = vld [vmem:[#allocation9] sm:$0xff] }
  0x27   :  { %2630 = vmatpush.bf16.msra.mxu2 %v2563_v3  ;;  %v2571_v12 = vld [vmem:[#allocation11 + $0x8] sm:$0xff]  ;;  %v177_v13 = vld [vmem:[%s3515_s0] sm:$0xff]  ;;  %v2558_v28 = vld [vmem:[%s3516_s1 + $0x10] sm:$0xff] }
  0x28   :  { %v2564_v14 = vld [vmem:[%s3519_s4] sm:$0xff]  ;;  %v3164_v15 = vadd.s32 4294967295, %v177_v13  ;;  %v2557_v18 = vld [vmem:[%s3516_s1 + $0x8] sm:$0xff]  ;;  %v2575_v44 = vld [vmem:[#allocation9 + $0x8] sm:$0xff] }
  0x29   :  { %242 = vmatpush.bf16.msra.mxu0 %v2560_v4  ;;  %v2570_v16 = vld [vmem:[#allocation11] sm:$0xff]  ;;  %v2573_v29 = vld [vmem:[#allocation6 + $0x8] sm:$0xff]  ;;  %v2574_v47 = vld [vmem:[#allocation9] sm:$0xff] }
  0x2a   :  { %404 = vmatpush.bf16.msra.mxu3 %v2566_v5  ;;  %295 = vmatpush.bf16.msra.mxu1 %v2562_v7  ;;  %vm522_vm1 = vcmp.eq.s32.totalorder %v3164_v15, 0  ;;  %v2577_v31 = vld [vmem:[#allocation11 + $0x8] sm:$0xff]  ;;  %v2572_v32 = vld [vmem:[#allocation6] sm:$0xff]  ;;  %vm675_vm6 = vcmp.eq.s32.totalorder %v3164_v15, 1  ;;  %vm828_vm12 = vcmp.eq.s32.totalorder %v3164_v15, 2 }
  0x2b   :  { %2631 = vmatpush.bf16.msra.mxu2 %v2562_v7  ;;  %v523_v17 = vsel %vm522_vm1, 1, %v2999_v0  ;;  %v2576_v40 = vld [vmem:[#allocation11] sm:$0xff]  ;;  %v676_v4 = vsel %vm675_vm6, 1, %v2999_v0  ;;  %vm981_vm6 = vcmp.eq.s32.totalorder %v3164_v15, 3 }
  0x2c   :  { %2213 = vmatmul.msk.bf16.vlgmr.msra.gmra.mxu0 %vm222_vm0, %v2556_v8  ;;  %525 = vperm.xlu0 %2644, %v523_v17  }
  0x2d   :  { %405 = vmatmul.bf16.vlgmr.msra.gmra.mxu3 %v2999_v0  ;;  %2225 = vmatmul.msk.bf16.vlgmr.msra.gmra.mxu1 %vm222_vm0, %v2556_v8 }
  0x2e   :  { %432 = vmatpush.bf16.msrb.mxu3 %v2569_v6  ;;  %2228 = vmatmul.msk.bf16.vlgmr.msra.gmra.mxu2 %vm222_vm0, %v3153_v10 }
  0x2f   :  { %347 = vmatpush.bf16.msrb.mxu2 %v2565_v9  ;;  %612 = vmatpush.bf16.msrb.mxu1 %v2577_v31  ;;  %v2583_v31 = vld [vmem:[#allocation11 + $0x8] sm:$0xff] }
  0x30   :  { %765 = vmatpush.bf16.msrb.mxu0 %v2583_v31 }
  0x32   :  { %433 = vmatpush.bf16.msrb.mxu3 %v2568_v11 }
  0x33   :  { %348 = vmatpush.bf16.msrb.mxu2 %v2564_v14  ;;  %613 = vmatpush.bf16.msrb.mxu1 %v2576_v40  ;;  %v2582_v40 = vld [vmem:[#allocation11] sm:$0xff] }
  0x34   :  { %678 = vperm.xlu0 %2644, %v676_v4   ;;  %766 = vmatpush.bf16.msrb.mxu0 %v2582_v40 }
  0x36   :  { %461 = vmatpush.bf16.msra.mxu3 %v2571_v12 }
  0x3a   :  { %462 = vmatpush.bf16.msra.mxu3 %v2570_v16 }
  0x3c   :  { %2214 = vmatmul.msk.bf16.gmra.mxu0 %vm222_vm0, %v2557_v18 }
  0x3d   :  { %434 = vmatmul.bf16.vlgmr.msrb.gmra.mxu3 %v2999_v0  ;;  %2226 = vmatmul.msk.bf16.gmra.mxu1 %vm222_vm0, %v2557_v18 }
  0x3e   :  { %2237 = vmatmul.msk.bf16.vlgmr.msrb.gmra.mxu2 %vm222_vm0, %v2556_v8  ;;  %554 = vmatpush.bf16.msrb.mxu3 %v2573_v29 }
  0x42   :  { %555 = vmatpush.bf16.msrb.mxu3 %v2572_v32  ;;  %v2581_v32 = vld [vmem:[#allocation9 + $0x8] sm:$0xff] }
  0x4c   :  { %2215 = vmatmul.msk.bf16.gmra.mxu0 %vm222_vm0, %v2558_v28 }
  0x4d   :  { %463 = vmatmul.bf16.vlgmr.msra.gmra.mxu3 %v2999_v0  ;;  %2227 = vmatmul.msk.bf16.gmra.mxu1 %vm222_vm0, %v2558_v28 }
  0x4e   :  { %2238 = vmatmul.msk.bf16.gmra.mxu2 %vm222_vm0, %v2557_v18  ;;  %583 = vmatpush.bf16.msra.mxu3 %v2575_v44  ;;  %v2579_v18 = vld [vmem:[#allocation6 + $0x8] sm:$0xff] }
  0x4f   :  { %707 = vmatpush.bf16.msra.mxu2 %v2579_v18 }
  0x52   :  { %584 = vmatpush.bf16.msra.mxu3 %v2574_v47 }
  0x5c   :  { %2216 = vmatmul.msk.bf16.gmra.mxu0 %vm222_vm0, %v3153_v10 }
  0x5e   :  { %2239 = vmatmul.msk.bf16.gmra.mxu2 %vm222_vm0, %v2558_v28 }
  0x6e   :  { %2240 = vmatmul.msk.bf16.gmra.mxu2 %vm222_vm0, %v3153_v10 }
  0xa9   :  { %v244_v19 = vpop.f32.mrf.mxu0 }
  0xaa   :  { %264 = vst.msk [vmem:[#allocation2] sm:$0xff] %vm222_vm0, %v244_v19  ;;  %v297_v20 = vpop.f32.mrf.mxu1 }
  0xab   :  { %317 = vst.msk [vmem:[#allocation3] sm:$0xff] %vm222_vm0, %v297_v20 }
  0xb0   :  { %v406_v21 = vpop.f32.mrf.mxu3 }
  0xb1   :  { %v468_v22 = vld [vmem:[#allocation2] sm:$0xff]  ;;  %v246_v23 = vpop.f32.mrf.mxu0  ;;  %v312_v24 = vpop.f32.mrf.mxu2 }
  0xb2   :  { %v469_v25 = vadd.f32 %v468_v22, %v406_v21  ;;  %265 = vst.msk [vmem:[#allocation2 + $0x8] sm:$0xff] %vm222_vm0, %v246_v23  ;;  %v299_v26 = vpop.f32.mrf.mxu1  ;;  %v489_v36 = vld [vmem:[#allocation3] sm:$0xff] }
  0xb3   :  { %323 = vst.msk [vmem:[#allocation3 + $0x30] sm:$0xff] %vm222_vm0, %v312_v24 }
  0xb4   :  { %v2265_v27 = vmul.f32 -1.442695, %v469_v25  ;;  %318 = vst.msk [vmem:[#allocation3 + $0x8] sm:$0xff] %vm222_vm0, %v299_v26 }
  0xb6   :  { %2648 = vpow2.f32 %v2265_v27 }
  0xb8   :  { %v408_v30 = vpop.f32.mrf.mxu3 }
  0xb9   :  { %v314_v33 = vpop.f32.mrf.mxu2  ;;  %v620_v25 = vld [vmem:[#allocation2 + $0x8] sm:$0xff]  ;;  %v2578_v30 = vld [vmem:[#allocation6] sm:$0xff] }
  0xba   :  { %324 = vst.msk [vmem:[#allocation3 + $0x38] sm:$0xff] %vm222_vm0, %v314_v33  ;;  %v302_v19 = vpop.f32.mrf.mxu1  ;;  %708 = vmatpush.bf16.msra.mxu2 %v2578_v30 }
  0xbb   :  { %319 = vst.msk [vmem:[#allocation3 + $0x10] sm:$0xff] %vm222_vm0, %v302_v19 }
  0xbc   :  { %v2649_v34 = vpop.eup %2648 }
  0xbd   :  { %v473_v35 = vadd.f32 1.0, %v2649_v34 }
  0xbf   :  { %2650 = vrcp.f32 %v473_v35  ;;  %v485_v49 = vand.u32 2147483648, %v473_v35  ;;  %v483_v52 = vand.u32 2147483647, %v473_v35  ;;  %vm479_vm3 = vweird.f32 %v473_v35 }
  0xc0   :  { %v435_v37 = vpop.f32.mrf.mxu3 }
  0xc1   :  { %v490_v38 = vadd.f32 %v489_v36, %v435_v37  ;;  %v350_v39 = vpop.f32.mrf.mxu2  ;;  %v486_v55 = vor.u32 1.1754944e-38, %v485_v49  ;;  %vm484_vm5 = vcmp.eq.f32.partialorder %v483_v52, 8.507059e+37  ;;  %v642_v36 = vld [vmem:[#allocation3 + $0x8] sm:$0xff]  ;;  %v249_v49 = vpop.f32.mrf.mxu0 }
  0xc2   :  { %370 = vst.msk [vmem:[#allocation4] sm:$0xff] %vm222_vm0, %v350_v39  ;;  %v304_v20 = vpop.f32.mrf.mxu1  ;;  %v2580_v39 = vld [vmem:[#allocation9] sm:$0xff] }
  0xc3   :  { %v2266_v41 = vmul.f32 -1.442695, %v490_v38  ;;  %320 = vst.msk [vmem:[#allocation3 + $0x18] sm:$0xff] %vm222_vm0, %v304_v20 }
  0xc4   :  { %266 = vst.msk [vmem:[#allocation2 + $0x10] sm:$0xff] %vm222_vm0, %v249_v49 }
  0xc5   :  { %2652 = vpow2.f32 %v2266_v41  ;;  %v2651_v42 = vpop.eup %2650 }
  0xc6   :  { %v475_v43 = vmul.f32 %v2651_v42, %v473_v35  ;;  %vm480_vm2 = vweird.f32 %v2651_v42 }
  0xc7   :  { %vm481_vm4 = vmor %vm479_vm3, %vm480_vm2 }
  0xc8   :  { %v437_v45 = vpop.f32.mrf.mxu3  ;;  %v476_v46 = vsub.f32 1.0, %v475_v43 }
  0xc9   :  { %v352_v48 = vpop.f32.mrf.mxu2  ;;  %v510_v60 = vld [vmem:[#allocation4] sm:$0xff] }
  0xca   :  { %371 = vst.msk [vmem:[#allocation4 + $0x8] sm:$0xff] %vm222_vm0, %v352_v48  ;;  %v477_v51 = vmul.f32 %v2651_v42, %v476_v46  ;;  %v307_v21 = vpop.f32.mrf.mxu1  ;;  %v829_v48 = vsel %vm828_vm12, 1, %v2999_v0 }
  0xcb   :  { %v2653_v50 = vpop.eup %2652  ;;  %321 = vst.msk [vmem:[#allocation3 + $0x20] sm:$0xff] %vm222_vm0, %v307_v21  ;;  %831 = vperm.xlu1 %2645, %v829_v48   ;;  %v773_v31 = vld [vmem:[#allocation2 + $0x10] sm:$0xff] }
  0xcc   :  { %v494_v53 = vadd.f32 1.0, %v2653_v50  ;;  %v478_v54 = vadd.f32 %v2651_v42, %v477_v51 }
  0xce   :  { %2654 = vrcp.f32 %v494_v53  ;;  %v482_v56 = vsel %vm481_vm4, %v2651_v42, %v478_v54  ;;  %v506_v3 = vand.u32 2147483648, %v494_v53  ;;  %v504_v6 = vand.u32 2147483647, %v494_v53 }
  0xcf   :  { %v487_v58 = vsel %vm484_vm5, %v486_v55, %v482_v56  ;;  %vm500_vm8 = vweird.f32 %v494_v53 }
  0xd0   :  { %v464_v57 = vpop.f32.mrf.mxu3  ;;  %v507_v8 = vor.u32 1.1754944e-38, %v506_v3  ;;  %vm505_vm10 = vcmp.eq.f32.partialorder %v504_v6, 8.507059e+37 }
  0xd1   :  { %v511_v59 = vmul.f32 %v487_v58, %v464_v57  ;;  %v355_v45 = vpop.f32.mrf.mxu2  ;;  %v251_v58 = vpop.f32.mrf.mxu0 }
  0xd2   :  { %v309_v22 = vpop.f32.mrf.mxu1  ;;  %372 = vst.msk [vmem:[#allocation4 + $0x10] sm:$0xff] %vm222_vm0, %v355_v45  ;;  %v2588_v45 = vld [vmem:[#allocation11] sm:$0xff] }
  0xd3   :  { %v512_v63 = vadd.f32 %v511_v59, %v510_v60  ;;  %322 = vst.msk [vmem:[#allocation3 + $0x28] sm:$0xff] %vm222_vm0, %v309_v22 }
  0xd4   :  { %v2655_v61 = vpop.eup %2654  ;;  %267 = vst.msk [vmem:[#allocation2 + $0x18] sm:$0xff] %vm222_vm0, %v251_v58 }
  0xd5   :  { %v496_v62 = vmul.f32 %v2655_v61, %v494_v53  ;;  %vm501_vm7 = vweird.f32 %v2655_v61  ;;  %2656 = vtanh.f32 %v512_v63 }
  0xd6   :  { %vm502_vm9 = vmor %vm500_vm8, %vm501_vm7 }
  0xd7   :  { %v497_v1 = vsub.f32 1.0, %v496_v62  ;;  %v664_v62 = vld [vmem:[#allocation4 + $0x8] sm:$0xff] }
  0xd8   :  { %v466_v2 = vpop.f32.mrf.mxu3 }
  0xd9   :  { %v498_v5 = vmul.f32 %v2655_v61, %v497_v1  ;;  %v357_v57 = vpop.f32.mrf.mxu2  ;;  %v254_v6 = vpop.f32.mrf.mxu0 }
  0xda   :  { %373 = vst.msk [vmem:[#allocation4 + $0x18] sm:$0xff] %vm222_vm0, %v357_v57 }
  0xdb   :  { %v499_v7 = vadd.f32 %v2655_v61, %v498_v5  ;;  %v2657_v12 = vpop.eup %2656  ;;  %268 = vst.msk [vmem:[#allocation2 + $0x20] sm:$0xff] %vm222_vm0, %v254_v6 }
  0xdd   :  { %v503_v9 = vsel %vm502_vm9, %v2655_v61, %v499_v7 }
  0xde   :  { %v508_v10 = vsel %vm505_vm10, %v507_v8, %v503_v9 }
  0xdf   :  { %v514_v11 = vsub.f32 1.0, %v508_v10  ;;  %v516_v14 = vmul.f32 0.0, %v508_v10 }
  0xe1   :  { %v515_v13 = vmul.f32 %v2657_v12, %v514_v11  ;;  %v360_v3 = vpop.f32.mrf.mxu2  ;;  %v256_v18 = vpop.f32.mrf.mxu0 }
  0xe2   :  { %374 = vst.msk [vmem:[#allocation4 + $0x20] sm:$0xff] %vm222_vm0, %v360_v3  ;;  %v817_v3 = vld [vmem:[#allocation4 + $0x10] sm:$0xff] }
  0xe3   :  { %v3199_v16 = vadd.f32 %v516_v14, %v515_v13  ;;  %269 = vst.msk [vmem:[#allocation2 + $0x28] sm:$0xff] %vm222_vm0, %v256_v18 }
  0xe5   :  { %v518_v17 = vpack.c.bf16 %v3199_v16, %v3199_v16 }
  0xe7   :  { %520 = vst.msk [vmem:[#allocation5] sm:$0xf] %vm519_vm11, %v518_v17  ;;  %2276 = vmatmul.msk.bf16.vlgmr.msrb.gmra.mxu3 %vm222_vm0, %v518_v17  ;;  %2294 = vmatmul.msk.bf16.vlgmr.msrb.gmra.mxu1 %vm222_vm0, %v518_v17 }
  0xe8   :  { %736 = vmatpush.bf16.msrb.mxu3 %v2581_v32 }
  0xe9   :  { %v362_v13 = vpop.f32.mrf.mxu2  ;;  %v259_v22 = vpop.f32.mrf.mxu0 }
  0xea   :  { %375 = vst.msk [vmem:[#allocation4 + $0x28] sm:$0xff] %vm222_vm0, %v362_v13 }
  0xeb   :  { %270 = vst.msk [vmem:[#allocation2 + $0x30] sm:$0xff] %vm222_vm0, %v259_v22  ;;  %v2593_v22 = vld [vmem:[#allocation9 + $0x8] sm:$0xff] }
  0xec   :  { %737 = vmatpush.bf16.msrb.mxu3 %v2580_v39 }
  0xf1   :  { %v365_v21 = vpop.f32.mrf.mxu2 }
  0xf2   :  { %376 = vst.msk [vmem:[#allocation4 + $0x30] sm:$0xff] %vm222_vm0, %v365_v21  ;;  %v2591_v21 = vld [vmem:[#allocation6 + $0x8] sm:$0xff] }
  0xf3   :  { %1013 = vmatpush.bf16.msra.mxu0 %v2591_v21  ;;  %v2596_v21 = vld [vmem:[#allocation6] sm:$0xff] }
  0xf7   :  { %2285 = vmatmul.msk.bf16.vlgmr.msra.gmra.mxu3 %vm222_vm0, %v518_v17 }
 0x164   :  { %v615_v23 = vpop.f32.mrf.mxu1 }
 0x16a   :  { %v557_v24 = vpop.f32.mrf.mxu3 }
 0x16b   :  { %v621_v26 = vadd.f32 %v620_v25, %v557_v24  ;;  %v261_v24 = vpop.f32.mrf.mxu0 }
 0x16c   :  { %v617_v27 = vpop.f32.mrf.mxu1  ;;  %271 = vst.msk [vmem:[#allocation2 + $0x38] sm:$0xff] %vm222_vm0, %v261_v24  ;;  %v2590_v24 = vld [vmem:[#allocation6] sm:$0xff] }
 0x16d   :  { %v2295_v28 = vmul.f32 -1.442695, %v621_v26  ;;  %v2585_v26 = vld [vmem:[#allocation6 + $0x8] sm:$0xff]  ;;  %v2587_v27 = vld [vmem:[#allocation9 + $0x8] sm:$0xff]  ;;  %1014 = vmatpush.bf16.msra.mxu0 %v2590_v24 }
 0x16e   :  { %860 = vmatpush.bf16.msra.mxu1 %v2585_v26  ;;  %889 = vmatpush.bf16.msrb.mxu2 %v2587_v27  ;;  %v948_v26 = vld [vmem:[#allocation3 + $0x18] sm:$0xff] }
 0x16f   :  { %2658 = vpow2.f32 %v2295_v28  ;;  %v795_v28 = vld [vmem:[#allocation3 + $0x10] sm:$0xff] }
 0x172   :  { %v559_v29 = vpop.f32.mrf.mxu3 }
 0x173   :  { %v2589_v29 = vld [vmem:[#allocation11 + $0x8] sm:$0xff] }
 0x174   :  { %918 = vmatpush.bf16.msra.mxu3 %v2589_v29 }
 0x175   :  { %v2659_v33 = vpop.eup %2658 }
 0x176   :  { %v625_v34 = vadd.f32 1.0, %v2659_v33  ;;  %v2584_v33 = vld [vmem:[#allocation6] sm:$0xff] }
 0x177   :  { %861 = vmatpush.bf16.msra.mxu1 %v2584_v33  ;;  %v2592_v33 = vld [vmem:[#allocation9] sm:$0xff] }
 0x178   :  { %2660 = vrcp.f32 %v625_v34  ;;  %v637_v47 = vand.u32 2147483648, %v625_v34  ;;  %v635_v50 = vand.u32 2147483647, %v625_v34  ;;  %vm631_vm14 = vweird.f32 %v625_v34  ;;  %919 = vmatpush.bf16.msra.mxu3 %v2588_v45 }
 0x17a   :  { %v586_v35 = vpop.f32.mrf.mxu3  ;;  %v638_v55 = vor.u32 1.1754944e-38, %v637_v47  ;;  %vm636_vm1 = vcmp.eq.f32.partialorder %v635_v50, 8.507059e+37  ;;  %v982_v47 = vsel %vm981_vm6, 1, %v2999_v0 }
 0x17b   :  { %v643_v37 = vadd.f32 %v642_v36, %v586_v35  ;;  %984 = vperm.xlu1 %2645, %v982_v47   ;;  %1042 = vmatpush.bf16.msrb.mxu1 %v2593_v22 }
 0x17d   :  { %v2296_v38 = vmul.f32 -1.442695, %v643_v37 }
 0x17e   :  { %v2661_v41 = vpop.eup %2660 }
 0x17f   :  { %v627_v42 = vmul.f32 %v2661_v41, %v625_v34  ;;  %2662 = vpow2.f32 %v2296_v38  ;;  %vm632_vm13 = vweird.f32 %v2661_v41  ;;  %v2586_v34 = vld [vmem:[#allocation9] sm:$0xff]  ;;  %1043 = vmatpush.bf16.msrb.mxu1 %v2592_v33 }
 0x180   :  { %vm633_vm15 = vmor %vm631_vm14, %vm632_vm13  ;;  %890 = vmatpush.bf16.msrb.mxu2 %v2586_v34  ;;  %v2594_v34 = vld [vmem:[#allocation11] sm:$0xff] }
 0x181   :  { %v628_v43 = vsub.f32 1.0, %v627_v42 }
 0x182   :  { %v588_v44 = vpop.f32.mrf.mxu3 }
 0x183   :  { %v629_v46 = vmul.f32 %v2661_v41, %v628_v43 }
 0x185   :  { %v2663_v51 = vpop.eup %2662  ;;  %v630_v52 = vadd.f32 %v2661_v41, %v629_v46 }
 0x186   :  { %v647_v53 = vadd.f32 1.0, %v2663_v51 }
 0x187   :  { %v634_v54 = vsel %vm633_vm15, %v2661_v41, %v630_v52 }
 0x188   :  { %2664 = vrcp.f32 %v647_v53  ;;  %v639_v56 = vsel %vm636_vm1, %v638_v55, %v634_v54  ;;  %v659_v2 = vand.u32 2147483648, %v647_v53  ;;  %v657_v5 = vand.u32 2147483647, %v647_v53 }
 0x189   :  { %v665_v59 = vmul.f32 %v639_v56, %v615_v23  ;;  %vm653_vm3 = vweird.f32 %v647_v53  ;;  %v367_v23 = vpop.f32.mrf.mxu2  ;;  %vm1134_vm1 = vcmp.eq.s32.totalorder %v3164_v15, 4 }
 0x18a   :  { %v660_v8 = vor.u32 1.1754944e-38, %v659_v2  ;;  %vm658_vm5 = vcmp.eq.f32.partialorder %v657_v5, 8.507059e+37  ;;  %377 = vst.msk [vmem:[#allocation4 + $0x38] sm:$0xff] %vm222_vm0, %v367_v23  ;;  %v2595_v23 = vld [vmem:[#allocation11 + $0x8] sm:$0xff] }
 0x18b   :  { %v666_v63 = vadd.f32 %v665_v59, %v664_v62 }
 0x18d   :  { %2666 = vtanh.f32 %v666_v63 }
 0x18e   :  { %v2665_v60 = vpop.eup %2664 }
 0x18f   :  { %v649_v61 = vmul.f32 %v2665_v60, %v647_v53  ;;  %vm654_vm2 = vweird.f32 %v2665_v60 }
 0x190   :  { %vm655_vm4 = vmor %vm653_vm3, %vm654_vm2 }
 0x191   :  { %v650_v1 = vsub.f32 1.0, %v649_v61 }
 0x193   :  { %v651_v4 = vmul.f32 %v2665_v60, %v650_v1  ;;  %v2667_v12 = vpop.eup %2666 }
 0x195   :  { %v652_v7 = vadd.f32 %v2665_v60, %v651_v4 }
 0x197   :  { %v656_v9 = vsel %vm655_vm4, %v2665_v60, %v652_v7 }
 0x198   :  { %v661_v10 = vsel %vm658_vm5, %v660_v8, %v656_v9 }
 0x199   :  { %v668_v11 = vsub.f32 1.0, %v661_v10  ;;  %v670_v17 = vmul.f32 %v661_v10, %v3199_v16 }
 0x19b   :  { %v669_v14 = vmul.f32 %v2667_v12, %v668_v11 }
 0x19d   :  { %v3222_v19 = vadd.f32 %v670_v17, %v669_v14  ;;  %v926_v17 = vld [vmem:[#allocation2 + $0x18] sm:$0xff] }
 0x19f   :  { %v672_v20 = vpack.c.bf16 %v3222_v19, %v3222_v19 }
 0x1a1   :  { %674 = vst.msk [vmem:[#allocation5 + $0x4] sm:$0xf] %vm519_vm11, %v672_v20  ;;  %2305 = vmatmul.msk.bf16.vlgmr.msra.gmra.mxu2 %vm222_vm0, %v672_v20  ;;  %2314 = vmatmul.msk.bf16.vlgmr.msrb.gmra.mxu3 %vm222_vm0, %v672_v20 }
 0x1a2   :  { %2323 = vmatmul.msk.bf16.vlgmr.msrb.gmra.mxu0 %vm222_vm0, %v672_v20  ;;  %1071 = vmatpush.bf16.msra.mxu2 %v2595_v23 }
 0x1a6   :  { %1072 = vmatpush.bf16.msra.mxu2 %v2594_v34 }
 0x21f   :  { %v768_v25 = vpop.f32.mrf.mxu0 }
 0x224   :  { %v710_v30 = vpop.f32.mrf.mxu2  ;;  %v739_v32 = vpop.f32.mrf.mxu3 }
 0x225   :  { %v774_v35 = vadd.f32 %v773_v31, %v710_v30  ;;  %v796_v36 = vadd.f32 %v795_v28, %v739_v32 }
 0x227   :  { %v2324_v37 = vmul.f32 -1.442695, %v774_v35  ;;  %v2325_v38 = vmul.f32 -1.442695, %v796_v36  ;;  %v770_v39 = vpop.f32.mrf.mxu0 }
 0x228   :  { %v1135_v39 = vsel %vm1134_vm1, 1, %v2999_v0 }
 0x229   :  { %2668 = vpow2.f32 %v2324_v37  ;;  %1137 = vperm.xlu2 %2646, %v1135_v39  }
 0x22a   :  { %2670 = vpow2.f32 %v2325_v38 }
 0x22c   :  { %v712_v40 = vpop.f32.mrf.mxu2  ;;  %v741_v41 = vpop.f32.mrf.mxu3 }
 0x22f   :  { %v2669_v42 = vpop.eup %2668 }
 0x230   :  { %v2671_v43 = vpop.eup %2670  ;;  %v778_v44 = vadd.f32 1.0, %v2669_v42 }
 0x231   :  { %v800_v46 = vadd.f32 1.0, %v2671_v43 }
 0x232   :  { %2672 = vrcp.f32 %v778_v44  ;;  %v790_v53 = vand.u32 2147483648, %v778_v44  ;;  %v788_v56 = vand.u32 2147483647, %v778_v44  ;;  %vm784_vm8 = vweird.f32 %v778_v44 }
 0x233   :  { %2674 = vrcp.f32 %v800_v46  ;;  %v812_v63 = vand.u32 2147483648, %v800_v46  ;;  %vm806_vm13 = vweird.f32 %v800_v46  ;;  %v810_v2 = vand.u32 2147483647, %v800_v46 }
 0x234   :  { %v791_v59 = vor.u32 1.1754944e-38, %v790_v53  ;;  %vm789_vm10 = vcmp.eq.f32.partialorder %v788_v56, 8.507059e+37  ;;  %v970_v56 = vld [vmem:[#allocation4 + $0x18] sm:$0xff] }
 0x235   :  { %v813_v6 = vor.u32 1.1754944e-38, %v812_v63  ;;  %vm811_vm15 = vcmp.eq.f32.partialorder %v810_v2, 8.507059e+37 }
 0x238   :  { %v2673_v48 = vpop.eup %2672 }
 0x239   :  { %v2675_v49 = vpop.eup %2674  ;;  %v780_v50 = vmul.f32 %v2673_v48, %v778_v44  ;;  %vm785_vm7 = vweird.f32 %v2673_v48 }
 0x23a   :  { %v802_v51 = vmul.f32 %v2675_v49, %v800_v46  ;;  %vm786_vm9 = vmor %vm784_vm8, %vm785_vm7  ;;  %vm807_vm12 = vweird.f32 %v2675_v49 }
 0x23b   :  { %v781_v52 = vsub.f32 1.0, %v780_v50  ;;  %vm808_vm14 = vmor %vm806_vm13, %vm807_vm12 }
 0x23c   :  { %v803_v54 = vsub.f32 1.0, %v802_v51 }
 0x23d   :  { %v782_v55 = vmul.f32 %v2673_v48, %v781_v52 }
 0x23e   :  { %v804_v57 = vmul.f32 %v2675_v49, %v803_v54 }
 0x23f   :  { %v783_v58 = vadd.f32 %v2673_v48, %v782_v55 }
 0x240   :  { %v805_v62 = vadd.f32 %v2675_v49, %v804_v57 }
 0x241   :  { %v787_v60 = vsel %vm786_vm9, %v2673_v48, %v783_v58 }
 0x242   :  { %v792_v61 = vsel %vm789_vm10, %v791_v59, %v787_v60  ;;  %v809_v5 = vsel %vm808_vm14, %v2675_v49, %v805_v62  ;;  %vm1287_vm10 = vcmp.eq.s32.totalorder %v3164_v15, 5 }
 0x243   :  { %v818_v1 = vmul.f32 %v792_v61, %v768_v25  ;;  %v814_v7 = vsel %vm811_vm15, %v813_v6, %v809_v5 }
 0x244   :  { %v821_v8 = vsub.f32 1.0, %v814_v7  ;;  %v823_v11 = vmul.f32 %v814_v7, %v3222_v19  ;;  %v1079_v7 = vld [vmem:[#allocation2 + $0x20] sm:$0xff] }
 0x245   :  { %v819_v4 = vadd.f32 %v818_v1, %v817_v3 }
 0x247   :  { %2676 = vtanh.f32 %v819_v4 }
 0x24d   :  { %v2677_v9 = vpop.eup %2676 }
 0x24e   :  { %v822_v10 = vmul.f32 %v2677_v9, %v821_v8  ;;  %v1101_v9 = vld [vmem:[#allocation3 + $0x20] sm:$0xff] }
 0x250   :  { %v3237_v12 = vadd.f32 %v823_v11, %v822_v10 }
 0x252   :  { %v825_v13 = vpack.c.bf16 %v3237_v12, %v3237_v12 }
 0x254   :  { %827 = vst.msk [vmem:[#allocation5 + $0x8] sm:$0xf] %vm519_vm11, %v825_v13  ;;  %2334 = vmatmul.msk.bf16.vlgmr.msra.gmra.mxu1 %vm222_vm0, %v825_v13  ;;  %2343 = vmatmul.msk.bf16.vlgmr.msrb.gmra.mxu2 %vm222_vm0, %v825_v13 }
 0x255   :  { %2352 = vmatmul.msk.bf16.vlgmr.msra.gmra.mxu3 %vm222_vm0, %v825_v13 }
 0x2d1   :  { %v863_v14 = vpop.f32.mrf.mxu1 }
 0x2d2   :  { %v927_v18 = vadd.f32 %v926_v17, %v863_v14  ;;  %v2597_v17 = vld [vmem:[#allocation6 + $0x8] sm:$0xff] }
 0x2d3   :  { %1166 = vmatpush.bf16.msrb.mxu3 %v2597_v17 }
 0x2d4   :  { %v2353_v20 = vmul.f32 -1.442695, %v927_v18  ;;  %v2599_v18 = vld [vmem:[#allocation9 + $0x8] sm:$0xff] }
 0x2d5   :  { %1195 = vmatpush.bf16.msrb.mxu0 %v2599_v18 }
 0x2d6   :  { %2678 = vpow2.f32 %v2353_v20  ;;  %v2601_v20 = vld [vmem:[#allocation11 + $0x8] sm:$0xff] }
 0x2d7   :  { %v892_v25 = vpop.f32.mrf.mxu2  ;;  %1224 = vmatpush.bf16.msra.mxu1 %v2601_v20  ;;  %1167 = vmatpush.bf16.msrb.mxu3 %v2596_v21 }
 0x2d8   :  { %v949_v27 = vadd.f32 %v948_v26, %v892_v25  ;;  %v921_v28 = vpop.f32.mrf.mxu3 }
 0x2d9   :  { %v865_v29 = vpop.f32.mrf.mxu1 }
 0x2da   :  { %v2354_v30 = vmul.f32 -1.442695, %v949_v27  ;;  %v2600_v29 = vld [vmem:[#allocation11] sm:$0xff] }
 0x2db   :  { %1225 = vmatpush.bf16.msra.mxu1 %v2600_v29  ;;  %v3276_v29 = vld [vmem:[%s3523_s8] sm:$0xff] }
 0x2dc   :  { %v2679_v31 = vpop.eup %2678  ;;  %2680 = vpow2.f32 %v2354_v30 }
 0x2dd   :  { %v931_v32 = vadd.f32 1.0, %v2679_v31 }
 0x2df   :  { %2682 = vrcp.f32 %v931_v32  ;;  %v894_v35 = vpop.f32.mrf.mxu2  ;;  %v943_v43 = vand.u32 2147483648, %v931_v32  ;;  %v941_v45 = vand.u32 2147483647, %v931_v32  ;;  %vm937_vm3 = vweird.f32 %v931_v32 }
 0x2e0   :  { %v923_v36 = vpop.f32.mrf.mxu3 }
 0x2e1   :  { %v944_v49 = vor.u32 1.1754944e-38, %v943_v43  ;;  %vm942_vm5 = vcmp.eq.f32.partialorder %v941_v45, 8.507059e+37 }
 0x2e2   :  { %v2681_v37 = vpop.eup %2680 }
 0x2e3   :  { %v953_v38 = vadd.f32 1.0, %v2681_v37 }
 0x2e5   :  { %v2683_v40 = vpop.eup %2682  ;;  %2684 = vrcp.f32 %v953_v38  ;;  %v965_v55 = vand.u32 2147483648, %v953_v38  ;;  %v963_v57 = vand.u32 2147483647, %v953_v38  ;;  %vm959_vm7 = vweird.f32 %v953_v38 }
 0x2e6   :  { %v933_v41 = vmul.f32 %v2683_v40, %v931_v32  ;;  %vm938_vm2 = vweird.f32 %v2683_v40  ;;  %v1288_v32 = vsel %vm1287_vm10, 1, %v2999_v0 }
 0x2e7   :  { %vm939_vm4 = vmor %vm937_vm3, %vm938_vm2  ;;  %v966_v61 = vor.u32 1.1754944e-38, %v965_v55  ;;  %vm964_vm9 = vcmp.eq.f32.partialorder %v963_v57, 8.507059e+37  ;;  %1290 = vperm.xlu2 %2646, %v1288_v32  }
 0x2e8   :  { %v934_v42 = vsub.f32 1.0, %v933_v41 }
 0x2ea   :  { %v935_v44 = vmul.f32 %v2683_v40, %v934_v42 }
 0x2eb   :  { %v2685_v46 = vpop.eup %2684 }
 0x2ec   :  { %v955_v47 = vmul.f32 %v2685_v46, %v953_v38  ;;  %v936_v48 = vadd.f32 %v2683_v40, %v935_v44  ;;  %vm960_vm6 = vweird.f32 %v2685_v46 }
 0x2ed   :  { %vm961_vm8 = vmor %vm959_vm7, %vm960_vm6 }
 0x2ee   :  { %v956_v50 = vsub.f32 1.0, %v955_v47  ;;  %v940_v51 = vsel %vm939_vm4, %v2683_v40, %v936_v48 }
 0x2ef   :  { %v945_v52 = vsel %vm942_vm5, %v944_v49, %v940_v51 }
 0x2f0   :  { %v957_v53 = vmul.f32 %v2685_v46, %v956_v50  ;;  %v971_v54 = vmul.f32 %v945_v52, %v921_v28  ;;  %v2598_v28 = vld [vmem:[#allocation9] sm:$0xff]  ;;  %v1123_v50 = vld [vmem:[#allocation4 + $0x20] sm:$0xff] }
 0x2f1   :  { %1196 = vmatpush.bf16.msrb.mxu0 %v2598_v28 }
 0x2f2   :  { %v972_v58 = vadd.f32 %v971_v54, %v970_v56  ;;  %v958_v59 = vadd.f32 %v2685_v46, %v957_v53 }
 0x2f4   :  { %2686 = vtanh.f32 %v972_v58  ;;  %v962_v60 = vsel %vm961_vm8, %v2685_v46, %v958_v59 }
 0x2f5   :  { %v967_v62 = vsel %vm964_vm9, %v966_v61, %v962_v60 }
 0x2f6   :  { %v974_v63 = vsub.f32 1.0, %v967_v62  ;;  %v976_v3 = vmul.f32 %v967_v62, %v3237_v12 }
 0x2fa   :  { %v2687_v1 = vpop.eup %2686 }
 0x2fb   :  { %v975_v2 = vmul.f32 %v2687_v1, %v974_v63  ;;  %v1254_v63 = vld [vmem:[#allocation3 + $0x28] sm:$0xff] }
 0x2fd   :  { %v3248_v4 = vadd.f32 %v976_v3, %v975_v2 }
 0x2ff   :  { %v978_v5 = vpack.c.bf16 %v3248_v4, %v3248_v4 }
 0x301   :  { %980 = vst.msk [vmem:[#allocation5 + $0xc] sm:$0xf] %vm519_vm11, %v978_v5  ;;  %2363 = vmatmul.msk.bf16.vlgmr.msra.gmra.mxu0 %vm222_vm0, %v978_v5  ;;  %2372 = vmatmul.msk.bf16.vlgmr.msrb.gmra.mxu1 %vm222_vm0, %v978_v5 }
 0x302   :  { %2381 = vmatmul.msk.bf16.vlgmr.msra.gmra.mxu2 %vm222_vm0, %v978_v5  ;;  %v2603_v5 = vld [vmem:[#allocation6 + $0x8] sm:$0xff] }
 0x303   :  { %1319 = vmatpush.bf16.msrb.mxu2 %v2603_v5  ;;  %v1407_v5 = vld [vmem:[#allocation3 + $0x30] sm:$0xff] }
 0x37e   :  { %v1016_v6 = vpop.f32.mrf.mxu0  ;;  %v1045_v8 = vpop.f32.mrf.mxu1 }
 0x37f   :  { %v1080_v10 = vadd.f32 %v1079_v7, %v1016_v6  ;;  %v1102_v11 = vadd.f32 %v1101_v9, %v1045_v8  ;;  %v2605_v6 = vld [vmem:[#allocation9 + $0x8] sm:$0xff]  ;;  %v2607_v7 = vld [vmem:[#allocation11 + $0x8] sm:$0xff] }
 0x380   :  { %v1232_v9 = vld [vmem:[#allocation2 + $0x28] sm:$0xff]  ;;  %1348 = vmatpush.bf16.msra.mxu3 %v2605_v6  ;;  %1377 = vmatpush.bf16.msra.mxu0 %v2607_v7 }
 0x381   :  { %v2382_v13 = vmul.f32 -1.442695, %v1080_v10  ;;  %v2383_v14 = vmul.f32 -1.442695, %v1102_v11  ;;  %v2602_v10 = vld [vmem:[#allocation6] sm:$0xff] }
 0x382   :  { %1320 = vmatpush.bf16.msrb.mxu2 %v2602_v10 }
 0x383   :  { %2688 = vpow2.f32 %v2382_v13 }
 0x384   :  { %2690 = vpow2.f32 %v2383_v14 }
 0x385   :  { %v1074_v22 = vpop.f32.mrf.mxu2 }
 0x386   :  { %v1018_v23 = vpop.f32.mrf.mxu0  ;;  %v1047_v24 = vpop.f32.mrf.mxu1 }
 0x387   :  { %v2604_v24 = vld [vmem:[#allocation9] sm:$0xff] }
 0x388   :  { %1349 = vmatpush.bf16.msra.mxu3 %v2604_v24  ;;  %v2612_v24 = vld [vmem:[#allocation11] sm:$0xff] }
 0x389   :  { %v2689_v25 = vpop.eup %2688 }
 0x38a   :  { %v2691_v26 = vpop.eup %2690  ;;  %v1084_v27 = vadd.f32 1.0, %v2689_v25  ;;  %v2606_v25 = vld [vmem:[#allocation11] sm:$0xff] }
 0x38b   :  { %v1106_v30 = vadd.f32 1.0, %v2691_v26  ;;  %1378 = vmatpush.bf16.msra.mxu0 %v2606_v25 }
 0x38c   :  { %2692 = vrcp.f32 %v1084_v27  ;;  %v1096_v39 = vand.u32 2147483648, %v1084_v27  ;;  %v1094_v41 = vand.u32 2147483647, %v1084_v27  ;;  %vm1090_vm13 = vweird.f32 %v1084_v27 }
 0x38d   :  { %2694 = vrcp.f32 %v1106_v30  ;;  %v1076_v31 = vpop.f32.mrf.mxu2  ;;  %v1118_v49 = vand.u32 2147483648, %v1106_v30  ;;  %vm1112_vm2 = vweird.f32 %v1106_v30  ;;  %v1116_v51 = vand.u32 2147483647, %v1106_v30 }
 0x38e   :  { %v1097_v44 = vor.u32 1.1754944e-38, %v1096_v39  ;;  %vm1095_vm15 = vcmp.eq.f32.partialorder %v1094_v41, 8.507059e+37 }
 0x38f   :  { %v1119_v54 = vor.u32 1.1754944e-38, %v1118_v49  ;;  %vm1117_vm4 = vcmp.eq.f32.partialorder %v1116_v51, 8.507059e+37 }
 0x392   :  { %v2693_v33 = vpop.eup %2692 }
 0x393   :  { %v2695_v34 = vpop.eup %2694  ;;  %v1086_v35 = vmul.f32 %v2693_v33, %v1084_v27  ;;  %vm1091_vm12 = vweird.f32 %v2693_v33  ;;  %v3270_v27 = vld [vmem:[%s3523_s8 + $0x8] sm:$0xff] }
 0x394   :  { %v1108_v36 = vmul.f32 %v2695_v34, %v1106_v30  ;;  %vm1092_vm14 = vmor %vm1090_vm13, %vm1091_vm12  ;;  %vm1113_vm1 = vweird.f32 %v2695_v34 }
 0x395   :  { %v1087_v37 = vsub.f32 1.0, %v1086_v35  ;;  %vm1114_vm3 = vmor %vm1112_vm2, %vm1113_vm1  ;;  %vm1593_vm1 = vcmp.eq.s32.totalorder %v3164_v15, 7 }
 0x396   :  { %v1109_v38 = vsub.f32 1.0, %v1108_v36 }
 0x397   :  { %v1088_v40 = vmul.f32 %v2693_v33, %v1087_v37 }
 0x398   :  { %v1110_v42 = vmul.f32 %v2695_v34, %v1109_v38 }
 0x399   :  { %v1089_v43 = vadd.f32 %v2693_v33, %v1088_v40 }
 0x39a   :  { %v1111_v47 = vadd.f32 %v2695_v34, %v1110_v42 }
 0x39b   :  { %v1093_v45 = vsel %vm1092_vm14, %v2693_v33, %v1089_v43  ;;  %vm1440_vm14 = vcmp.eq.s32.totalorder %v3164_v15, 6 }
 0x39c   :  { %v1098_v46 = vsel %vm1095_vm15, %v1097_v44, %v1093_v45  ;;  %v1115_v53 = vsel %vm1114_vm3, %v2695_v34, %v1111_v47 }
 0x39d   :  { %v1124_v48 = vmul.f32 %v1098_v46, %v1074_v22  ;;  %v1120_v55 = vsel %vm1117_vm4, %v1119_v54, %v1115_v53  ;;  %v1276_v46 = vld [vmem:[#allocation4 + $0x28] sm:$0xff] }
 0x39e   :  { %v1127_v56 = vsub.f32 1.0, %v1120_v55  ;;  %v1129_v59 = vmul.f32 %v1120_v55, %v3248_v4 }
 0x39f   :  { %v1125_v52 = vadd.f32 %v1124_v48, %v1123_v50 }
 0x3a1   :  { %2696 = vtanh.f32 %v1125_v52 }
 0x3a7   :  { %v2697_v57 = vpop.eup %2696 }
 0x3a8   :  { %v1128_v58 = vmul.f32 %v2697_v57, %v1127_v56  ;;  %v2614_v57 = vld [vmem:[#allocation5] sm:$0xff] }
 0x3aa   :  { %v3259_v60 = vadd.f32 %v1129_v59, %v1128_v58  ;;  %v1441_v58 = vsel %vm1440_vm14, 1, %v2999_v0  ;;  %v2615_v59 = vld [vmem:[#allocation5 + $0x8] sm:$0xff] }
 0x3ab   :  { %1443 = vperm.xlu0 %2644, %v1441_v58  }
 0x3ac   :  { %v1131_v61 = vpack.c.bf16 %v3259_v60, %v3259_v60 }
 0x3ae   :  { %1133 = vst.msk [vmem:[#allocation5 + $0x10] sm:$0xf] %vm519_vm11, %v1131_v61  ;;  %2392 = vmatmul.msk.bf16.vlgmr.msrb.gmra.mxu3 %vm222_vm0, %v1131_v61  ;;  %2401 = vmatmul.msk.bf16.vlgmr.msrb.gmra.mxu0 %vm222_vm0, %v1131_v61 }
 0x3af   :  { %2410 = vmatmul.msk.bf16.vlgmr.msra.gmra.mxu1 %vm222_vm0, %v1131_v61  ;;  %1662 = vmatpush.bf16.msrb.mxu0 %v3270_v27 }
 0x3b3   :  { %1663 = vmatpush.bf16.msrb.mxu0 %v3276_v29 }
 0x42b   :  { %v1198_v62 = vpop.f32.mrf.mxu0 }
 0x42c   :  { %v1255_v1 = vadd.f32 %v1254_v63, %v1198_v62  ;;  %v1227_v2 = vpop.f32.mrf.mxu1  ;;  %v2609_v63 = vld [vmem:[#allocation6 + $0x8] sm:$0xff] }
 0x42d   :  { %1472 = vmatpush.bf16.msrb.mxu1 %v2609_v63 }
 0x42e   :  { %v2412_v3 = vmul.f32 -1.442695, %v1255_v1 }
 0x430   :  { %2698 = vpow2.f32 %v2412_v3 }
 0x431   :  { %v1169_v8 = vpop.f32.mrf.mxu3 }
 0x432   :  { %v1233_v11 = vadd.f32 %v1232_v9, %v1169_v8 }
 0x433   :  { %v1200_v13 = vpop.f32.mrf.mxu0 }
 0x434   :  { %v2411_v14 = vmul.f32 -1.442695, %v1233_v11  ;;  %v1229_v17 = vpop.f32.mrf.mxu1  ;;  %v2611_v11 = vld [vmem:[#allocation9 + $0x8] sm:$0xff]  ;;  %v2608_v13 = vld [vmem:[#allocation6] sm:$0xff] }
 0x435   :  { %1501 = vmatpush.bf16.msra.mxu2 %v2611_v11  ;;  %1473 = vmatpush.bf16.msrb.mxu1 %v2608_v13 }
 0x436   :  { %v2699_v18 = vpop.eup %2698  ;;  %2700 = vpow2.f32 %v2411_v14  ;;  %v2613_v14 = vld [vmem:[#allocation11 + $0x8] sm:$0xff] }
 0x437   :  { %v1259_v20 = vadd.f32 1.0, %v2699_v18  ;;  %1530 = vmatpush.bf16.msrb.mxu3 %v2613_v14 }
 0x439   :  { %v1171_v21 = vpop.f32.mrf.mxu3  ;;  %2702 = vrcp.f32 %v1259_v20  ;;  %v1271_v43 = vand.u32 2147483648, %v1259_v20  ;;  %vm1265_vm10 = vweird.f32 %v1259_v20  ;;  %v1269_v45 = vand.u32 2147483647, %v1259_v20  ;;  %1695 = vmatpush.bf16.msra.mxu1 %v3270_v27 }
 0x43a   :  { %v2610_v21 = vld [vmem:[#allocation9] sm:$0xff] }
 0x43b   :  { %v1272_v49 = vor.u32 1.1754944e-38, %v1271_v43  ;;  %vm1270_vm13 = vcmp.eq.f32.partialorder %v1269_v45, 8.507059e+37  ;;  %1502 = vmatpush.bf16.msra.mxu2 %v2610_v21  ;;  %1531 = vmatpush.bf16.msrb.mxu3 %v2612_v24 }
 0x43c   :  { %v2701_v22 = vpop.eup %2700 }
 0x43d   :  { %v1237_v23 = vadd.f32 1.0, %v2701_v22  ;;  %1696 = vmatpush.bf16.msra.mxu1 %v3276_v29 }
 0x43f   :  { %2704 = vrcp.f32 %v1237_v23  ;;  %v2703_v26 = vpop.eup %2702  ;;  %v1249_v34 = vand.u32 2147483648, %v1237_v23  ;;  %v1247_v36 = vand.u32 2147483647, %v1237_v23  ;;  %vm1243_vm6 = vweird.f32 %v1237_v23 }
 0x440   :  { %v1261_v28 = vmul.f32 %v2703_v26, %v1259_v20  ;;  %vm1266_vm9 = vweird.f32 %v2703_v26 }
 0x441   :  { %v1250_v39 = vor.u32 1.1754944e-38, %v1249_v34  ;;  %vm1248_vm8 = vcmp.eq.f32.partialorder %v1247_v36, 8.507059e+37  ;;  %vm1267_vm12 = vmor %vm1265_vm10, %vm1266_vm9 }
 0x442   :  { %v1262_v32 = vsub.f32 1.0, %v1261_v28  ;;  %v3300_v28 = vld [vmem:[%s3515_s0] sm:$0xff] }
 0x443   :  { %vm2043_vm15 = vcmp.gt.s32.totalorder %v3300_v28, 1  ;;  %vm2034_vm2 = vcmp.gt.s32.totalorder %v3300_v28, 0  ;;  %vm2061_vm3 = vcmp.gt.s32.totalorder %v3300_v28, 3  ;;  %vm2052_vm4 = vcmp.gt.s32.totalorder %v3300_v28, 2 }
 0x444   :  { %v1263_v37 = vmul.f32 %v2703_v26, %v1262_v32  ;;  %v2035_v15 = vsel %vm2034_vm2, 1, %v2999_v0 }
 0x445   :  { %v2705_v30 = vpop.eup %2704  ;;  %2037 = vperm.xlu2 %2646, %v2035_v15  }
 0x446   :  { %v1239_v31 = vmul.f32 %v2705_v30, %v1237_v23  ;;  %vm1244_vm5 = vweird.f32 %v2705_v30  ;;  %v1264_v42 = vadd.f32 %v2703_v26, %v1263_v37 }
 0x447   :  { %vm1245_vm7 = vmor %vm1243_vm6, %vm1244_vm5 }
 0x448   :  { %v1240_v33 = vsub.f32 1.0, %v1239_v31  ;;  %v1268_v48 = vsel %vm1267_vm12, %v2703_v26, %v1264_v42  ;;  %v1594_v31 = vsel %vm1593_vm1, 1, %v2999_v0 }
 0x449   :  { %v1273_v50 = vsel %vm1270_vm13, %v1272_v49, %v1268_v48  ;;  %1596 = vperm.xlu1 %2645, %v1594_v31  }
 0x44a   :  { %v1241_v35 = vmul.f32 %v2705_v30, %v1240_v33  ;;  %v1280_v51 = vsub.f32 1.0, %v1273_v50  ;;  %v1282_v54 = vmul.f32 %v1273_v50, %v3259_v60  ;;  %v1429_v50 = vld [vmem:[#allocation4 + $0x30] sm:$0xff] }
 0x44c   :  { %v1242_v38 = vadd.f32 %v2705_v30, %v1241_v35 }
 0x44e   :  { %v1246_v40 = vsel %vm1245_vm7, %v2705_v30, %v1242_v38  ;;  %v2044_v30 = vsel %vm2043_vm15, 1, %v2999_v0  ;;  %vm2070_vm7 = vcmp.gt.s32.totalorder %v3300_v28, 4 }
 0x44f   :  { %v1251_v41 = vsel %vm1248_vm8, %v1250_v39, %v1246_v40  ;;  %2046 = vperm.xlu0 %2644, %v2044_v30   ;;  %v2062_v40 = vsel %vm2061_vm3, 1, %v2999_v0 }
 0x450   :  { %v1277_v44 = vmul.f32 %v1251_v41, %v1227_v2  ;;  %v1385_v2 = vld [vmem:[#allocation2 + $0x30] sm:$0xff]  ;;  %v2053_v41 = vsel %vm2052_vm4, 1, %v2999_v0 }
 0x451   :  { %2055 = vperm.xlu1 %2645, %v2053_v41  }
 0x452   :  { %v1278_v47 = vadd.f32 %v1277_v44, %v1276_v46  ;;  %v2071_v46 = vsel %vm2070_vm7, 1, %v2999_v0 }
 0x453   :  { %2073 = vperm.xlu2 %2646, %v2071_v46  }
 0x454   :  { %2706 = vtanh.f32 %v1278_v47 }
 0x457   :  { %2064 = vperm.xlu0 %2644, %v2062_v40  }
 0x45a   :  { %v2707_v52 = vpop.eup %2706 }
 0x45b   :  { %v1281_v53 = vmul.f32 %v2707_v52, %v1280_v51 }
 0x45d   :  { %v3280_v55 = vadd.f32 %v1282_v54, %v1281_v53 }
 0x45f   :  { %v1284_v56 = vpack.c.bf16 %v3280_v55, %v3280_v55 }
 0x461   :  { %1286 = vst.msk [vmem:[#allocation5 + $0x14] sm:$0xf] %vm519_vm11, %v1284_v56  ;;  %2421 = vmatmul.msk.bf16.vlgmr.msrb.gmra.mxu2 %vm222_vm0, %v1284_v56  ;;  %2430 = vmatmul.msk.bf16.vlgmr.msra.gmra.mxu3 %vm222_vm0, %v1284_v56 }
 0x462   :  { %2439 = vmatmul.msk.bf16.vlgmr.msra.gmra.mxu0 %vm222_vm0, %v1284_v56 }
 0x468   :  { %v2616_v61 = vld [vmem:[#allocation5 + $0x10] sm:$0xff] }
 0x472   :  { %2495 = vmatmul.msk.bf16.vlgmr.msrb.gmra.mxu0 %vm222_vm0, %v2614_v57 }
 0x482   :  { %2496 = vmatmul.msk.bf16.gmra.mxu0 %vm222_vm0, %v2615_v59 }
 0x492   :  { %2497 = vmatmul.msk.bf16.gmra.mxu0 %vm222_vm0, %v2616_v61 }
 0x4df   :  { %v3293_v62 = vpop.f32.mrf.mxu0 }
 0x4e4   :  { %v1322_v1 = vpop.f32.mrf.mxu2  ;;  %v1351_v3 = vpop.f32.mrf.mxu3 }
 0x4e5   :  { %v1386_v6 = vadd.f32 %v1385_v2, %v1322_v1  ;;  %v1408_v7 = vadd.f32 %v1407_v5, %v1351_v3  ;;  %v1538_v1 = vld [vmem:[#allocation2 + $0x38] sm:$0xff] }
 0x4e7   :  { %v2440_v8 = vmul.f32 -1.442695, %v1386_v6  ;;  %v2441_v9 = vmul.f32 -1.442695, %v1408_v7  ;;  %v1382_v10 = vpop.f32.mrf.mxu0  ;;  %v1560_v6 = vld [vmem:[#allocation3 + $0x38] sm:$0xff] }
 0x4e9   :  { %2708 = vpow2.f32 %v2440_v8 }
 0x4ea   :  { %2710 = vpow2.f32 %v2441_v9 }
 0x4ec   :  { %v1324_v17 = vpop.f32.mrf.mxu2  ;;  %v1353_v18 = vpop.f32.mrf.mxu3 }
 0x4ef   :  { %v2709_v20 = vpop.eup %2708 }
 0x4f0   :  { %v2711_v22 = vpop.eup %2710  ;;  %v1390_v23 = vadd.f32 1.0, %v2709_v20 }
 0x4f1   :  { %v1412_v25 = vadd.f32 1.0, %v2711_v22 }
 0x4f2   :  { %2712 = vrcp.f32 %v1390_v23  ;;  %v1402_v34 = vand.u32 2147483648, %v1390_v23  ;;  %v1400_v37 = vand.u32 2147483647, %v1390_v23  ;;  %vm1396_vm6 = vweird.f32 %v1390_v23 }
 0x4f3   :  { %2714 = vrcp.f32 %v1412_v25  ;;  %v1424_v47 = vand.u32 2147483648, %v1412_v25  ;;  %vm1418_vm12 = vweird.f32 %v1412_v25  ;;  %v1422_v49 = vand.u32 2147483647, %v1412_v25 }
 0x4f4   :  { %v1403_v42 = vor.u32 1.1754944e-38, %v1402_v34  ;;  %vm1401_vm9 = vcmp.eq.f32.partialorder %v1400_v37, 8.507059e+37  ;;  %v832_v34 = vpop.permute.xlu1 %831  ;;  %v1138_v37 = vpop.permute.xlu2 %1137 }
 0x4f5   :  { %v1425_v53 = vor.u32 1.1754944e-38, %v1424_v47  ;;  %vm1423_vm14 = vcmp.eq.f32.partialorder %v1422_v49, 8.507059e+37 }
 0x4f8   :  { %v2713_v26 = vpop.eup %2712 }
 0x4f9   :  { %v2715_v27 = vpop.eup %2714  ;;  %v1392_v29 = vmul.f32 %v2713_v26, %v1390_v23  ;;  %vm1397_vm5 = vweird.f32 %v2713_v26  ;;  %v526_v23 = vpop.permute.xlu0 %525 }
 0x4fa   :  { %v1414_v32 = vmul.f32 %v2715_v27, %v1412_v25  ;;  %vm1398_vm8 = vmor %vm1396_vm6, %vm1397_vm5  ;;  %vm1419_vm10 = vweird.f32 %v2715_v27  ;;  %vm527_vm7 = vcmp.eq.s32.totalorder %v526_v23, 1 }
 0x4fb   :  { %v1393_v33 = vsub.f32 1.0, %v1392_v29  ;;  %vm1420_vm13 = vmor %vm1418_vm12, %vm1419_vm10  ;;  %v2625_v29 = vld [vmem:[#allocation15 + $0x8] sm:$0xff]  ;;  %vm833_vm10 = vcmp.eq.s32.totalorder %v832_v34, 1 }
 0x4fc   :  { %v1415_v35 = vsub.f32 1.0, %v1414_v32  ;;  %v985_v49 = vpop.permute.xlu1 %984 }
 0x4fd   :  { %v1394_v36 = vmul.f32 %v2713_v26, %v1393_v33  ;;  %v2624_v33 = vld [vmem:[#allocation15] sm:$0xff]  ;;  %vm986_vm12 = vcmp.eq.s32.totalorder %v985_v49, 1 }
 0x4fe   :  { %v1416_v38 = vmul.f32 %v2715_v27, %v1415_v35 }
 0x4ff   :  { %v1395_v39 = vadd.f32 %v2713_v26, %v1394_v36 }
 0x500   :  { %v1417_v45 = vadd.f32 %v2715_v27, %v1416_v38 }
 0x501   :  { %v1399_v43 = vsel %vm1398_vm8, %v2713_v26, %v1395_v39  ;;  %v679_v39 = vpop.permute.xlu0 %678 }
 0x502   :  { %v1404_v44 = vsel %vm1401_vm9, %v1403_v42, %v1399_v43  ;;  %v1421_v52 = vsel %vm1420_vm13, %v2715_v27, %v1417_v45  ;;  %v1582_v43 = vld [vmem:[#allocation4 + $0x38] sm:$0xff]  ;;  %vm680_vm9 = vcmp.eq.s32.totalorder %v679_v39, 1  ;;  %vm1139_vm13 = vcmp.eq.s32.totalorder %v1138_v37, 1 }
 0x503   :  { %v1430_v48 = vmul.f32 %v1404_v44, %v3293_v62  ;;  %v1426_v54 = vsel %vm1423_vm14, %v1425_v53, %v1421_v52  ;;  %v528_v52 = vsel %vm527_vm7, %v3199_v16, 0.0 }
 0x504   :  { %v1433_v56 = vsub.f32 1.0, %v1426_v54  ;;  %v1435_v59 = vmul.f32 %v1426_v54, %v3280_v55  ;;  %v681_v54 = vsel %vm680_vm9, %v3222_v19, %v528_v52  ;;  %v1597_v19 = vpop.permute.xlu1 %1596 }
 0x505   :  { %v1431_v51 = vadd.f32 %v1430_v48, %v1429_v50 }
 0x507   :  { %2716 = vtanh.f32 %v1431_v51  ;;  %v1291_v51 = vpop.permute.xlu2 %1290 }
 0x508   :  { %vm1292_vm14 = vcmp.eq.s32.totalorder %v1291_v51, 1 }
 0x509   :  { %v1444_v53 = vpop.permute.xlu0 %1443 }
 0x50d   :  { %v2717_v57 = vpop.eup %2716 }
 0x50e   :  { %v1434_v58 = vmul.f32 %v2717_v57, %v1433_v56 }
 0x510   :  { %v3316_v61 = vadd.f32 %v1435_v59, %v1434_v58  ;;  %v834_v58 = vsel %vm833_vm10, %v3237_v12, %v681_v54 }
 0x511   :  { %v987_v59 = vsel %vm986_vm12, %v3248_v4, %v834_v58 }
 0x512   :  { %v1437_v62 = vpack.c.bf16 %v3316_v61, %v3316_v61  ;;  %v1140_v16 = vsel %vm1139_vm13, %v3259_v60, %v987_v59 }
 0x514   :  { %1439 = vst.msk [vmem:[#allocation5 + $0x18] sm:$0xf] %vm519_vm11, %v1437_v62  ;;  %2450 = vmatmul.msk.bf16.vlgmr.msrb.gmra.mxu1 %vm222_vm0, %v1437_v62  ;;  %2459 = vmatmul.msk.bf16.vlgmr.msra.gmra.mxu2 %vm222_vm0, %v1437_v62 }
 0x515   :  { %2468 = vmatmul.msk.bf16.vlgmr.msrb.gmra.mxu3 %vm222_vm0, %v1437_v62  ;;  %1806 = vmatpush.bf16.msrb.mxu1 %v2625_v29  ;;  %v3328_v62 = vpop.f32.mrf.mxu0  ;;  %v2626_v29 = vld [vmem:[#allocation17] sm:$0xff] }
 0x519   :  { %1807 = vmatpush.bf16.msrb.mxu1 %v2624_v33 }
 0x51d   :  { %v3336_v4 = vpop.f32.mrf.mxu0 }
 0x525   :  { %v3339_v60 = vpop.f32.mrf.mxu0 }
 0x591   :  { %v1475_v63 = vpop.f32.mrf.mxu1 }
 0x592   :  { %v1539_v2 = vadd.f32 %v1538_v1, %v1475_v63 }
 0x594   :  { %v2469_v3 = vmul.f32 -1.442695, %v1539_v2  ;;  %v1293_v2 = vsel %vm1292_vm14, %v3280_v55, %v1140_v16  ;;  %v1768_v55 = vpack.c.bf16 %v3336_v4, %v3328_v62 }
 0x596   :  { %2718 = vpow2.f32 %v2469_v3 }
 0x597   :  { %v1504_v5 = vpop.f32.mrf.mxu2 }
 0x598   :  { %v1561_v7 = vadd.f32 %v1560_v6, %v1504_v5  ;;  %v1533_v8 = vpop.f32.mrf.mxu3 }
 0x599   :  { %v1477_v9 = vpop.f32.mrf.mxu1 }
 0x59a   :  { %v2470_v10 = vmul.f32 -1.442695, %v1561_v7  ;;  %v2620_v9 = vld [vmem:[#allocation12] sm:$0xff] }
 0x59c   :  { %v2719_v11 = vpop.eup %2718  ;;  %2720 = vpow2.f32 %v2470_v10  ;;  %v3344_v10 = vpop.f32.mrf.mxu0 }
 0x59d   :  { %v1543_v13 = vadd.f32 1.0, %v2719_v11  ;;  %v1769_v11 = vpack.c.bf16 %v3344_v10, %v3339_v60 }
 0x59f   :  { %2722 = vrcp.f32 %v1543_v13  ;;  %v1506_v14 = vpop.f32.mrf.mxu2  ;;  %v1555_v25 = vand.u32 2147483648, %v1543_v13  ;;  %v1553_v27 = vand.u32 2147483647, %v1543_v13  ;;  %vm1549_vm1 = vweird.f32 %v1543_v13 }
 0x5a0   :  { %v1535_v17 = vpop.f32.mrf.mxu3 }
 0x5a1   :  { %v1556_v35 = vor.u32 1.1754944e-38, %v1555_v25  ;;  %vm1554_vm3 = vcmp.eq.f32.partialorder %v1553_v27, 8.507059e+37  ;;  %v2623_v25 = vld [vmem:[#allocation14 + $0x8] sm:$0xff] }
 0x5a2   :  { %v2721_v18 = vpop.eup %2720  ;;  %1761 = vmatpush.bf16.msra.mxu3 %v2623_v25  ;;  %v2627_v27 = vld [vmem:[#allocation17 + $0x8] sm:$0xff] }
 0x5a3   :  { %v1565_v20 = vadd.f32 1.0, %v2721_v18 }
 0x5a5   :  { %v2723_v21 = vpop.eup %2722  ;;  %2724 = vrcp.f32 %v1565_v20  ;;  %v1577_v42 = vand.u32 2147483648, %v1565_v20  ;;  %v1575_v44 = vand.u32 2147483647, %v1565_v20  ;;  %vm1571_vm5 = vweird.f32 %v1565_v20 }
 0x5a6   :  { %v1545_v22 = vmul.f32 %v2723_v21, %v1543_v13  ;;  %vm1550_vm15 = vweird.f32 %v2723_v21  ;;  %v3349_v13 = vpop.f32.mrf.mxu0 }
 0x5a7   :  { %vm1551_vm2 = vmor %vm1549_vm1, %vm1550_vm15  ;;  %v1578_v48 = vor.u32 1.1754944e-38, %v1577_v42  ;;  %vm1576_vm8 = vcmp.eq.f32.partialorder %v1575_v44, 8.507059e+37  ;;  %vm1445_vm15 = vcmp.eq.s32.totalorder %v1444_v53, 1  ;;  %vm1598_vm1 = vcmp.eq.s32.totalorder %v1597_v19, 1 }
 0x5a8   :  { %v1546_v24 = vsub.f32 1.0, %v1545_v22  ;;  %v1446_v5 = vsel %vm1445_vm15, %v3316_v61, %v1293_v2 }
 0x5aa   :  { %v1547_v26 = vmul.f32 %v2723_v21, %v1546_v24 }
 0x5ab   :  { %v2725_v30 = vpop.eup %2724 }
 0x5ac   :  { %v1567_v31 = vmul.f32 %v2725_v30, %v1565_v20  ;;  %v1548_v32 = vadd.f32 %v2723_v21, %v1547_v26  ;;  %vm1572_vm4 = vweird.f32 %v2725_v30  ;;  %v2622_v26 = vld [vmem:[#allocation14] sm:$0xff] }
 0x5ad   :  { %vm1573_vm6 = vmor %vm1571_vm5, %vm1572_vm4  ;;  %1762 = vmatpush.bf16.msra.mxu3 %v2622_v26 }
 0x5ae   :  { %v1568_v15 = vsub.f32 1.0, %v1567_v31  ;;  %v1552_v36 = vsel %vm1551_vm2, %v2723_v21, %v1548_v32  ;;  %v3351_v14 = vpop.f32.mrf.mxu0 }
 0x5af   :  { %v1557_v38 = vsel %vm1554_vm3, %v1556_v35, %v1552_v36  ;;  %v1770_v17 = vpack.c.bf16 %v3351_v14, %v3349_v13 }
 0x5b0   :  { %v1569_v40 = vmul.f32 %v2725_v30, %v1568_v15  ;;  %v1583_v41 = vmul.f32 %v1557_v38, %v1533_v8 }
 0x5b1   :  { %2160 = vmatpush.bf16.msrb.mxu3 %v2627_v27 }
 0x5b2   :  { %v1584_v45 = vadd.f32 %v1583_v41, %v1582_v43  ;;  %v1570_v46 = vadd.f32 %v2725_v30, %v1569_v40 }
 0x5b4   :  { %2726 = vtanh.f32 %v1584_v45  ;;  %v1574_v47 = vsel %vm1573_vm6, %v2725_v30, %v1570_v46 }
 0x5b5   :  { %v1579_v50 = vsel %vm1576_vm8, %v1578_v48, %v1574_v47  ;;  %2161 = vmatpush.bf16.msrb.mxu3 %v2626_v29 }
 0x5b6   :  { %v1586_v56 = vsub.f32 1.0, %v1579_v50  ;;  %v1588_v1 = vmul.f32 %v1579_v50, %v3316_v61  ;;  %v2621_v61 = vld [vmem:[#allocation12 + $0x8] sm:$0xff] }
 0x5b7   :  { %1728 = vmatpush.bf16.msrb.mxu2 %v2621_v61 }
 0x5ba   :  { %v2727_v57 = vpop.eup %2726 }
 0x5bb   :  { %v1587_v63 = vmul.f32 %v2727_v57, %v1586_v56  ;;  %1729 = vmatpush.bf16.msrb.mxu2 %v2620_v9 }
 0x5bd   :  { %v1589_v3 = vadd.f32 %v1588_v1, %v1587_v63 }
 0x5bf   :  { %v1590_v6 = vpack.c.bf16 %v1589_v3, %v1589_v3  ;;  %v1599_v12 = vsel %vm1598_vm1, %v1589_v3, %v1446_v5 }
 0x5c0   :  { %v1685_v7 = vpack.c.bf16 %v1599_v12, %v1599_v12 }
 0x5c1   :  { %1592 = vst.msk [vmem:[#allocation5 + $0x1c] sm:$0xf] %vm519_vm11, %v1590_v6 }
 0x5c2   :  { %2499 = vmatmul.msk.bf16.vlgmr.msra.gmra.mxu1 %vm222_vm0, %v1685_v7 }
 0x5c8   :  { %v2617_v8 = vld [vmem:[#allocation5 + $0x18] sm:$0xff] }
 0x5c9   :  { %2498 = vmatmul.msk.bf16.gmra.mxu0 %vm222_vm0, %v2617_v8 }
 0x5d2   :  { %2526 = vmatmul.msk.bf16.vlgmr.msrb.gmra.mxu1 %vm222_vm0, %v1768_v55 }
 0x5e2   :  { %2527 = vmatmul.msk.bf16.gmra.mxu1 %vm222_vm0, %v1769_v11 }
 0x5f2   :  { %2528 = vmatmul.msk.bf16.gmra.mxu1 %vm222_vm0, %v1770_v17 }
 0x63f   :  { %v1698_v18 = vpop.f32.mrf.mxu1 }
 0x640   :  { %v1702_v20 = vpack.c.bf16 %v1698_v18, %v1698_v18 }
 0x642   :  { %2508 = vmatmul.msk.bf16.vlgmr.msrb.gmra.mxu2 %vm222_vm0, %v1702_v20 }
 0x646   :  { %v3357_v22 = vpop.f32.mrf.mxu0 }
 0x647   :  { %v1700_v21 = vpop.f32.mrf.mxu1 }
 0x64e   :  { %v3359_v23 = vpop.f32.mrf.mxu0 }
 0x64f   :  { %v1771_v24 = vpack.c.bf16 %v3359_v23, %v3357_v22  ;;  %v1809_v33 = vpop.f32.mrf.mxu1 }
 0x651   :  { %2529 = vmatmul.msk.bf16.gmra.mxu1 %vm222_vm0, %v1771_v24 }
 0x657   :  { %v1811_v34 = vpop.f32.mrf.mxu1 }
 0x65f   :  { %v1814_v35 = vpop.f32.mrf.mxu1 }
 0x667   :  { %v1816_v15 = vpop.f32.mrf.mxu1 }
 0x66f   :  { %v1819_v36 = vpop.f32.mrf.mxu1 }
 0x677   :  { %v1821_v37 = vpop.f32.mrf.mxu1 }
 0x6c5   :  { %v1731_v30 = vpop.f32.mrf.mxu2 }
 0x6c6   :  { %v1735_v31 = vpack.c.bf16 %v1731_v30, %v1731_v30 }
 0x6c8   :  { %2517 = vmatmul.msk.bf16.vlgmr.msra.gmra.mxu3 %vm222_vm0, %v1735_v31 }
 0x6cd   :  { %v1733_v32 = vpop.f32.mrf.mxu2 }
 0x6ce   :  { %v1824_v38 = vpop.f32.mrf.mxu1 }
 0x6d6   :  { %v1826_v52 = vpop.f32.mrf.mxu1 }
 0x6d8   :  { %2555 = vmatmul.msk.bf16.vlgmr.msrb.gmra.mxu3 %vm222_vm0, %v1735_v31 }
 0x74b   :  { %v1764_v39 = vpop.f32.mrf.mxu3 }
 0x74c   :  { %v1810_v40 = vadd.f32 %v1809_v33, %v1764_v39  ;;  %v1812_v41 = vadd.f32 %v1811_v34, %v1764_v39  ;;  %v1815_v42 = vadd.f32 %v1814_v35, %v1764_v39  ;;  %v1817_v43 = vadd.f32 %v1816_v15, %v1764_v39 }
 0x74d   :  { %v1822_v44 = vadd.f32 %v1821_v37, %v1764_v39  ;;  %v1825_v45 = vadd.f32 %v1824_v38, %v1764_v39  ;;  %v1827_v53 = vadd.f32 %v1826_v52, %v1764_v39  ;;  %v1820_v56 = vadd.f32 %v1819_v36, %v1764_v39 }
 0x74e   :  { %v2530_v46 = vmul.f32 -1.442695, %v1810_v40  ;;  %v2531_v47 = vmul.f32 -1.442695, %v1812_v41  ;;  %v2532_v48 = vmul.f32 -1.442695, %v1815_v42 }
 0x74f   :  { %v2535_v49 = vmul.f32 -1.442695, %v1822_v44  ;;  %v2536_v50 = vmul.f32 -1.442695, %v1825_v45  ;;  %v2533_v51 = vmul.f32 -1.442695, %v1817_v43 }
 0x750   :  { %2728 = vpow2.f32 %v2532_v48  ;;  %v2537_v59 = vmul.f32 -1.442695, %v1827_v53  ;;  %v2534_v16 = vmul.f32 -1.442695, %v1820_v56  ;;  %v3426_v56 = vld [vmem:[%s3527_s12] ss:$0 sm:$0xff] }
 0x751   :  { %2730 = vpow2.f32 %v2531_v47  ;;  %s3000_s12 = smov [#allocation20]  }
 0x752   :  { %2732 = vpow2.f32 %v2530_v46  ;;  %s2173_s22 = sshll.u32 %s3000_s12, 4  ;;  %s2174_s22 = int_to_ptr.vmem [resolvable:$true] %s2173_s22 }
 0x753   :  { %v1766_v54 = vpop.f32.mrf.mxu3  ;;  %2734 = vpow2.f32 %v2536_v50 }
 0x754   :  { %2736 = vpow2.f32 %v2535_v49 }
 0x755   :  { %2738 = vpow2.f32 %v2533_v51 }
 0x756   :  { %v2729_v57 = vpop.eup %2728 }
 0x757   :  { %v2731_v58 = vpop.eup %2730  ;;  %v3366_v63 = vadd.f32 1.0, %v2729_v57 }
 0x758   :  { %v2733_v1 = vpop.eup %2732  ;;  %v3368_v2 = vadd.f32 1.0, %v2731_v58 }
 0x759   :  { %v2735_v3 = vpop.eup %2734  ;;  %2740 = vrcp.f32 %v3366_v63  ;;  %v3374_v12 = vadd.f32 1.0, %v2733_v1  ;;  %v1900_v8 = vand.u32 2147483647, %v3366_v63  ;;  %v1902_v55 = vand.u32 2147483648, %v3366_v63 }
 0x75a   :  { %v2737_v19 = vpop.eup %2736  ;;  %2742 = vrcp.f32 %v3368_v2  ;;  %v3376_v7 = vadd.f32 1.0, %v2735_v3  ;;  %v1885_v9 = vand.u32 2147483647, %v3368_v2  ;;  %v1887_v11 = vand.u32 2147483648, %v3368_v2 }
 0x75b   :  { %v2739_v5 = vpop.eup %2738  ;;  %v3372_v6 = vpop.f32.mrf.mxu3  ;;  %2744 = vpow2.f32 %v2537_v59  ;;  %v3380_v61 = vadd.f32 1.0, %v2737_v19  ;;  %v1872_v17 = vand.u32 2147483648, %v3374_v12  ;;  %vm1896_vm11 = vweird.f32 %v3366_v63 }
 0x75c   :  { %2746 = vpow2.f32 %v2534_v16  ;;  %v3387_v18 = vadd.f32 1.0, %v2739_v5  ;;  %vm1881_vm2 = vweird.f32 %v3368_v2  ;;  %v1962_v21 = vand.u32 2147483648, %v3376_v7 }
 0x75d   :  { %2748 = vrcp.f32 %v3374_v12  ;;  %vm3394_vm3 = vcmp.eq.f32.partialorder %v1900_v8, 8.507059e+37  ;;  %v1903_v27 = vor.u32 1.1754944e-38, %v1902_v55  ;;  %v1870_v29 = vand.u32 2147483647, %v3374_v12 }
 0x75e   :  { %2750 = vrcp.f32 %v3376_v7  ;;  %vm3400_vm4 = vcmp.eq.f32.partialorder %v1885_v9, 8.507059e+37  ;;  %v1888_v33 = vor.u32 1.1754944e-38, %v1887_v11  ;;  %v1960_v34 = vand.u32 2147483647, %v3376_v7 }
 0x75f   :  { %v2741_v20 = vpop.eup %2740  ;;  %2752 = vrcp.f32 %v3380_v61  ;;  %v1947_v35 = vand.u32 2147483648, %v3380_v61  ;;  %vm1866_vm6 = vweird.f32 %v3374_v12  ;;  %v1873_v37 = vor.u32 1.1754944e-38, %v1872_v17 }
 0x760   :  { %v2743_v24 = vpop.eup %2742  ;;  %v1892_v25 = vmul.f32 %v2741_v20, %v3366_v63  ;;  %vm1897_vm5 = vweird.f32 %v2741_v20  ;;  %2754 = vrcp.f32 %v3387_v18  ;;  %vm1956_vm8 = vweird.f32 %v3376_v7 }
 0x761   :  { %v2745_v30 = vpop.eup %2744  ;;  %v1877_v31 = vmul.f32 %v2743_v24, %v3368_v2  ;;  %vm1882_vm7 = vweird.f32 %v2743_v24  ;;  %v1963_v41 = vor.u32 1.1754944e-38, %v1962_v21  ;;  %v1945_v42 = vand.u32 2147483647, %v3380_v61  ;;  %vm1898_vm15 = vmor %vm1896_vm11, %vm1897_vm5 }
 0x762   :  { %v2747_v15 = vpop.eup %2746  ;;  %v1893_v36 = vsub.f32 1.0, %v1892_v25  ;;  %vm3411_vm9 = vcmp.eq.f32.partialorder %v1870_v29, 8.507059e+37  ;;  %v1948_v47 = vor.u32 1.1754944e-38, %v1947_v35  ;;  %v1915_v48 = vand.u32 2147483647, %v3387_v18  ;;  %vm1883_vm10 = vmor %vm1881_vm2, %vm1882_vm7 }
 0x763   :  { %v2749_v38 = vpop.eup %2748  ;;  %v2165_v39 = vpop.f32.mrf.mxu3  ;;  %v1878_v40 = vsub.f32 1.0, %v1877_v31  ;;  %vm3418_vm13 = vcmp.eq.f32.partialorder %v1960_v34, 8.507059e+37  ;;  %v1917_v53 = vand.u32 2147483648, %v3387_v18  ;;  %v3432_v16 = vadd.f32 1.0, %v2745_v30 }
 0x764   :  { %v2751_v43 = vpop.eup %2750  ;;  %v1894_v44 = vmul.f32 %v2741_v20, %v1893_v36  ;;  %v1862_v45 = vmul.f32 %v2749_v38, %v3374_v12  ;;  %vm1867_vm12 = vweird.f32 %v2749_v38  ;;  %v3437_v55 = vadd.f32 1.0, %v2747_v15 }
 0x765   :  { %v2753_v49 = vpop.eup %2752  ;;  %v1879_v50 = vmul.f32 %v2743_v24, %v1878_v40  ;;  %v1952_v51 = vmul.f32 %v2751_v43, %v3376_v7  ;;  %vm1957_vm14 = vweird.f32 %v2751_v43  ;;  %vm1868_vm11 = vmor %vm1866_vm6, %vm1867_vm12  ;;  %2756 = vrcp.f32 %v3432_v16 }
 0x766   :  { %v1895_v54 = vadd.f32 %v2741_v20, %v1894_v44  ;;  %v1863_v57 = vsub.f32 1.0, %v1862_v45  ;;  %v1937_v58 = vmul.f32 %v2753_v49, %v3380_v61  ;;  %vm1942_vm1 = vweird.f32 %v2753_v49  ;;  %v2755_v3 = vpop.eup %2754 }
 0x767   :  { %v1880_v59 = vadd.f32 %v2743_v24, %v1879_v50  ;;  %v1953_v1 = vsub.f32 1.0, %v1952_v51  ;;  %v1907_v17 = vmul.f32 %v2755_v3, %v3387_v18  ;;  %vm1912_vm2 = vweird.f32 %v2755_v3 }
 0x768   :  { %v1899_v19 = vsel %vm1898_vm15, %v2741_v20, %v1895_v54  ;;  %v1864_v5 = vmul.f32 %v2749_v38, %v1863_v57  ;;  %v1938_v8 = vsub.f32 1.0, %v1937_v58  ;;  %vm1946_vm6 = vcmp.eq.f32.partialorder %v1945_v42, 8.507059e+37 }
 0x769   :  { %v1904_v9 = vsel %vm3394_vm3, %v1903_v27, %v1899_v19  ;;  %v1884_v63 = vsel %vm1883_vm10, %v2743_v24, %v1880_v59  ;;  %v1954_v11 = vmul.f32 %v2751_v43, %v1953_v1  ;;  %v1908_v26 = vsub.f32 1.0, %v1907_v17  ;;  %vm1958_vm3 = vmor %vm1956_vm8, %vm1957_vm14 }
 0x76a   :  { %v1987_v21 = vmul.f32 %v3426_v56, %v1904_v9  ;;  %v1889_v20 = vsel %vm3400_vm4, %v1888_v33, %v1884_v63  ;;  %v1865_v25 = vadd.f32 %v2749_v38, %v1864_v5  ;;  %v1939_v29 = vmul.f32 %v2753_v49, %v1938_v8 }
 0x76b   :  { %v1986_v2 = vmul.f32 %v3426_v56, %v1889_v20  ;;  %v1955_v30 = vadd.f32 %v2751_v43, %v1954_v11  ;;  %vm3539_vm4 = vweird.f32 %v3380_v61  ;;  %v1909_v34 = vmul.f32 %v2755_v3, %v1908_v26 }
 0x76c   :  { %v1999_v24 = vsel %vm222_vm0, %v1987_v21, 0.0  ;;  %v1869_v27 = vsel %vm1868_vm11, %v2749_v38, %v1865_v25  ;;  %v1940_v31 = vadd.f32 %v2753_v49, %v1939_v29  ;;  %vm1943_vm5 = vmor %vm3539_vm4, %vm1942_vm1  ;;  %vm1911_vm7 = vweird.f32 %v3387_v18 }
 0x76d   :  { %2000 = vadd.xlane.f32.xlu1 %v1999_v24  ;;  %v1996_v32 = vsel %vm222_vm0, %v1986_v2, 0.0  ;;  %v1874_v12 = vsel %vm3411_vm9, %v1873_v37, %v1869_v27  ;;  %v1959_v33 = vsel %vm1958_vm3, %v2751_v43, %v1955_v30  ;;  %v1910_v38 = vadd.f32 %v2755_v3, %v1909_v34  ;;  %vm1913_vm8 = vmor %vm1911_vm7, %vm1912_vm2  ;;  %v2047_v2 = vpop.permute.xlu0 %2046  ;;  %v2056_v30 = vpop.permute.xlu1 %2055  ;;  %v2628_v34 = vld [vmem:[#allocation18] sm:$0xff] }
 0x76e   :  { %1997 = vadd.xlane.f32.xlu0 %v1996_v32  ;;  %v1985_v35 = vmul.f32 %v3426_v56, %v1874_v12  ;;  %v1964_v7 = vsel %vm3418_vm13, %v1963_v41, %v1959_v33  ;;  %v1944_v15 = vsel %vm1943_vm5, %v2753_v49, %v1940_v31  ;;  %v1918_v61 = vor.u32 1.1754944e-38, %v1917_v53  ;;  %v2757_v41 = vpop.eup %2756  ;;  %v2629_v33 = vld [vmem:[#allocation18 + $0x8] sm:$0xff] }
 0x76f   :  { %v1949_v36 = vsel %vm1946_vm6, %v1948_v47, %v1944_v15  ;;  %v1991_v39 = vmul.f32 %v3426_v56, %v1964_v7  ;;  %2758 = vrcp.f32 %v3437_v55  ;;  %v1914_v43 = vsel %vm1913_vm8, %v2755_v3, %v1910_v38  ;;  %2135 = vmatpush.bf16.msra.mxu2 %v2629_v33 }
 0x770   :  { %v1993_v37 = vsel %vm222_vm0, %v1985_v35, 0.0  ;;  %v1990_v40 = vmul.f32 %v3426_v56, %v1949_v36  ;;  %vm1916_vm9 = vcmp.eq.f32.partialorder %v1915_v48, 8.507059e+37  ;;  %v1967_v44 = vmul.f32 %v2757_v41, %v3432_v16 }
 0x771   :  { %1994 = vadd.xlane.f32.xlu2 %v1993_v37  ;;  %v1919_v42 = vsel %vm1916_vm9, %v1918_v61, %v1914_v43  ;;  %v2011_v45 = vsel %vm222_vm0, %v1991_v39, 0.0  ;;  %v1975_v51 = vand.u32 2147483647, %v3432_v16  ;;  %v1977_v52 = vand.u32 2147483648, %v3432_v16 }
 0x772   :  { %v1988_v46 = vmul.f32 %v3426_v56, %v1919_v42  ;;  %v2008_v47 = vsel %vm222_vm0, %v1990_v40, 0.0  ;;  %v1968_v49 = vsub.f32 1.0, %v1967_v44  ;;  %vm1972_vm10 = vweird.f32 %v2757_v41 }
 0x773   :  { %vm1971_vm12 = vweird.f32 %v3432_v16  ;;  %vm1976_vm14 = vcmp.eq.f32.partialorder %v1975_v51, 8.507059e+37  ;;  %v1978_v58 = vor.u32 1.1754944e-38, %v1977_v52  ;;  %v1932_v59 = vand.u32 2147483648, %v3437_v55  ;;  %2136 = vmatpush.bf16.msra.mxu2 %v2628_v34 }
 0x774   :  { %v1969_v18 = vmul.f32 %v2757_v41, %v1968_v49  ;;  %v2002_v53 = vsel %vm222_vm0, %v1988_v46, 0.0  ;;  %vm1973_vm13 = vmor %vm1971_vm12, %vm1972_vm10  ;;  %v1930_v19 = vand.u32 2147483647, %v3437_v55  ;;  %vm1926_vm1 = vweird.f32 %v3437_v55 }
 0x775   :  { %2012 = vadd.xlane.f32.xlu1 %v2011_v45  ;;  %v2759_v50 = vpop.eup %2758  ;;  %v1933_v63 = vor.u32 1.1754944e-38, %v1932_v59  ;;  %vm2079_vm3 = vcmp.gt.s32.totalorder %v3300_v28, 5  ;;  %vm2097_vm4 = vcmp.gt.s32.totalorder %v3300_v28, 7  ;;  %vm2088_vm5 = vcmp.gt.s32.totalorder %v3300_v28, 6  ;;  %v2065_v26 = vpop.permute.xlu0 %2064 }
 0x776   :  { %2009 = vadd.xlane.f32.xlu0 %v2008_v47  ;;  %v1922_v48 = vmul.f32 %v2759_v50, %v3437_v55  ;;  %v1970_v54 = vadd.f32 %v2757_v41, %v1969_v18  ;;  %vm1927_vm15 = vweird.f32 %v2759_v50  ;;  %vm1931_vm2 = vcmp.eq.f32.partialorder %v1930_v19, 8.507059e+37 }
 0x777   :  { %vm1928_vm11 = vmor %vm1926_vm1, %vm1927_vm15  ;;  %v2080_v25 = vsel %vm2079_vm3, 1, %v2999_v0  ;;  %v2098_v55 = vsel %vm2097_vm4, 1, %v2999_v0  ;;  %v2089_v29 = vsel %vm2088_vm5, 1, %v2999_v0  ;;  %vm2048_vm6 = vcmp.eq.s32.totalorder %v2047_v2, 1 }
 0x778   :  { %v1923_v57 = vsub.f32 1.0, %v1922_v48  ;;  %v1974_v1 = vsel %vm1973_vm13, %v2757_v41, %v1970_v54  ;;  %vm2066_vm8 = vcmp.eq.s32.totalorder %v2065_v26, 1  ;;  %vm2057_vm9 = vcmp.eq.s32.totalorder %v2056_v30, 1 }
 0x779   :  { %2003 = vadd.xlane.f32.xlu2 %v2002_v53  ;;  %v1979_v5 = vsel %vm1976_vm14, %v1978_v58, %v1974_v1 }
 0x77a   :  { %v1924_v3 = vmul.f32 %v2759_v50, %v1923_v57  ;;  %v1992_v8 = vmul.f32 %v3426_v56, %v1979_v5 }
 0x77c   :  { %v1925_v9 = vadd.f32 %v2759_v50, %v1924_v3  ;;  %v2014_v16 = vsel %vm222_vm0, %v1992_v8, 0.0 }
 0x77d   :  { %2015 = vadd.xlane.f32.xlu1 %v2014_v16 }
 0x77e   :  { %v1929_v11 = vsel %vm1928_vm11, %v2759_v50, %v1925_v9 }
 0x77f   :  { %v1934_v17 = vsel %vm1931_vm2, %v1933_v63, %v1929_v11 }
 0x780   :  { %v1989_v21 = vmul.f32 %v3426_v56, %v1934_v17  ;;  %v2038_v56 = vpop.permute.xlu2 %2037 }
 0x781   :  { %vm2039_vm7 = vcmp.eq.s32.totalorder %v2038_v56, 1 }
 0x782   :  { %v2005_v20 = vsel %vm222_vm0, %v1989_v21, 0.0 }
 0x783   :  { %2006 = vadd.xlane.f32.xlu2 %v2005_v20 }
 0x788   :  { %v2074_v24 = vpop.permute.xlu2 %2073 }
 0x789   :  { %vm2075_vm10 = vcmp.eq.s32.totalorder %v2074_v24, 1 }
 0x78a   :  { %2082 = vperm.xlu0 %2644, %v2080_v25  }
 0x796   :  { %2100 = vperm.xlu1 %2645, %v2098_v55  }
 0x79b   :  { %2091 = vperm.xlu2 %2646, %v2089_v29  }
 0x7e0   :  { %v2001_v27 = vpop.xlane.xlu1 %2000 }
 0x7e1   :  { %v2019_v31 = vmul.f32 %v2001_v27, %v3339_v60  ;;  %v1998_v32 = vpop.xlane.xlu0 %1997 }
 0x7e2   :  { %v2018_v12 = vmul.f32 %v1998_v32, %v3336_v4 }
 0x7e3   :  { %2027 = vst.msk [vmem:[#allocation4 + $0x10] sm:$0xff] %vm222_vm0, %v2019_v31 }
 0x7e4   :  { %v1995_v28 = vpop.xlane.xlu2 %1994  ;;  %2026 = vst.msk [vmem:[#allocation4 + $0x8] sm:$0xff] %vm222_vm0, %v2018_v12 }
 0x7e5   :  { %v2017_v0 = vmul.f32 %v1995_v28, %v3328_v62 }
 0x7e7   :  { %2025 = vst.msk [vmem:[#allocation4] sm:$0xff] %vm222_vm0, %v2017_v0 }
 0x7e8   :  { %v2013_v35 = vpop.xlane.xlu1 %2012 }
 0x7e9   :  { %v2023_v7 = vmul.f32 %v2013_v35, %v3357_v22  ;;  %v2010_v15 = vpop.xlane.xlu0 %2009 }
 0x7ea   :  { %v2022_v60 = vmul.f32 %v2010_v15, %v3351_v14 }
 0x7eb   :  { %2031 = vst.msk [vmem:[#allocation4 + $0x30] sm:$0xff] %vm222_vm0, %v2023_v7  ;;  %v2042_v22 = vld [vmem:[#allocation4 + $0x8] sm:$0xff] }
 0x7ec   :  { %v2004_v4 = vpop.xlane.xlu2 %2003  ;;  %2030 = vst.msk [vmem:[#allocation4 + $0x28] sm:$0xff] %vm222_vm0, %v2022_v60  ;;  %v2049_v40 = vsel %vm2048_vm6, %v2042_v22, 0.0 }
 0x7ed   :  { %v2020_v36 = vmul.f32 %v2004_v4, %v3344_v10  ;;  %v2051_v10 = vld [vmem:[#allocation4 + $0x10] sm:$0xff] }
 0x7ee   :  { %v2033_v37 = vld [vmem:[#allocation4] sm:$0xff]  ;;  %v2058_v42 = vsel %vm2057_vm9, %v2051_v10, 0.0 }
 0x7ef   :  { %2028 = vst.msk [vmem:[#allocation4 + $0x18] sm:$0xff] %vm222_vm0, %v2020_v36  ;;  %v2040_v61 = vsel %vm2039_vm7, %v2033_v37, 0.0 }
 0x7f0   :  { %v2016_v62 = vpop.xlane.xlu1 %2015  ;;  %v2050_v43 = vadd.f32 %v2049_v40, %v2040_v61 }
 0x7f1   :  { %v2024_v38 = vmul.f32 %v2016_v62, %v3359_v23 }
 0x7f2   :  { %v2059_v45 = vadd.f32 %v2058_v42, %v2050_v43  ;;  %v2087_v48 = vld [vmem:[#allocation4 + $0x30] sm:$0xff] }
 0x7f3   :  { %2032 = vst.msk [vmem:[#allocation4 + $0x38] sm:$0xff] %vm222_vm0, %v2024_v38 }
 0x7f6   :  { %v2007_v39 = vpop.xlane.xlu2 %2006  ;;  %v2060_v41 = vld [vmem:[#allocation4 + $0x18] sm:$0xff] }
 0x7f7   :  { %v2021_v14 = vmul.f32 %v2007_v39, %v3349_v13  ;;  %v2067_v23 = vsel %vm2066_vm8, %v2060_v41, 0.0  ;;  %v2078_v13 = vld [vmem:[#allocation4 + $0x28] sm:$0xff] }
 0x7f8   :  { %v2068_v47 = vadd.f32 %v2067_v23, %v2059_v45 }
 0x7f9   :  { %2029 = vst.msk [vmem:[#allocation4 + $0x20] sm:$0xff] %vm222_vm0, %v2021_v14 }
 0x7fa   :  { %v2096_v57 = vld [vmem:[#allocation4 + $0x38] sm:$0xff] }
 0x7fc   :  { %v2083_v44 = vpop.permute.xlu0 %2082 }
 0x7fd   :  { %vm2084_vm12 = vcmp.eq.s32.totalorder %v2083_v44, 1 }
 0x7fe   :  { %v2092_v51 = vpop.permute.xlu2 %2091  ;;  %v2085_v52 = vsel %vm2084_vm12, %v2078_v13, 0.0 }
 0x7ff   :  { %vm2093_vm13 = vcmp.eq.s32.totalorder %v2092_v51, 1 }
 0x800   :  { %v2069_v46 = vld [vmem:[#allocation4 + $0x20] sm:$0xff]  ;;  %v2094_v53 = vsel %vm2093_vm13, %v2087_v48, 0.0 }
 0x801   :  { %v2076_v49 = vsel %vm2075_vm10, %v2069_v46, 0.0 }
 0x802   :  { %v2077_v50 = vadd.f32 %v2076_v49, %v2068_v47 }
 0x804   :  { %v2086_v18 = vadd.f32 %v2085_v52, %v2077_v50 }
 0x806   :  { %v2095_v58 = vadd.f32 %v2094_v53, %v2086_v18 }
 0x808   :  { %v2101_v54 = vpop.permute.xlu1 %2100 }
 0x809   :  { %vm2102_vm14 = vcmp.eq.s32.totalorder %v2101_v54, 1 }
 0x80a   :  { %v2103_v59 = vsel %vm2102_vm14, %v2096_v57, 0.0 }
 0x80b   :  { %v2104_v1 = vadd.f32 %v2103_v59, %v2095_v58 }
 0x80d   :  { %v2109_v3 = vpack.c.bf16 %v2104_v1, %v2104_v1 }
 0x80f   :  { %2546 = vmatmul.msk.bf16.vlgmr.msra.gmra.mxu2 %vm222_vm0, %v2109_v3 }
 0x892   :  { %v2138_v19 = vpop.f32.mrf.mxu2 }
 0x893   :  { %v2164_v5 = vadd.f32 %v3372_v6, %v2138_v19 }
 0x895   :  { %2167 = vst.msk [vmem:[#allocation20] sm:$0xff] %vm222_vm0, %v2164_v5 }
 0x896   :  { %2178 = dma.vmem_to_hbm [thread:$0]  %s2174_s22, 128, %s2176_s23, [#allocation8]  }
 0x89a   :  { %v2140_v8 = vpop.f32.mrf.mxu2 }
 0x89b   :  { %2987 = dma.done.wait [#allocation8], 128  }
 0x89c   :  { %2988 = vsyncadd [#allocation8], 4294967168 }
 0x89d   :  { %2183 = vsyncpa [#allocation7], 1 }
 0x89e   :  { %2184 = vsyncpa [#allocation10], 1 }
 0x89f   :  { %2185 = vsyncpa [#allocation13], 1 }
 0x8a0   :  { %2186 = vsyncpa [#allocation16], 1 }
 0x8a1   :  { %2187 = vsyncpa [#allocation19], 1 }
 0x8a2   :  { %2188 = vsyncpa [#allocation8], 1 }

</bundles_post_ra>
